<compile_context>
chip_gen: v7x
topology: tpu7x:2x2x1
jax: 0.10.0
libtpu: 0.0.40
codegen_flags: <defaults>
</compile_context>

<pallas_src>
import functools

import jax
import jax.numpy as jnp
from jax.experimental import pallas as pl
from jax.experimental.pallas import tpu as pltpu


def _layernorm(x, gamma, beta, eps=1e-5):
    mean = jnp.mean(x, axis=-1, keepdims=True)
    centered = x - mean
    var = jnp.mean(centered * centered, axis=-1, keepdims=True)
    return centered * jax.lax.rsqrt(var + eps) * gamma + beta


def rsa_kernel(x_ref,
               ln1_g_ref, ln1_b_ref,
               wqkv_ref, bqkv_ref,
               wo_ref, bo_ref,
               ln2_g_ref, ln2_b_ref,
               o_ref, *, heads, agents, embed, fuse_heads):
    M = x_ref.shape[0]          # tb * agents rows in this block (static)
    tb = M // agents
    dh = embed // heads

    x = x_ref[...].astype(jnp.float32)                          # (M, E)

    # input LayerNorm (f32)
    xn = _layernorm(x, ln1_g_ref[...], ln1_b_ref[...])

    # One fused QKV matmul: bf16 inputs, f32 accumulation.  Weights were
    # folded / transposed / packed host-side and the 1/sqrt(dh) scale is
    # already in the Q columns.  Result is packed [Q | K | V] along lanes.
    qkv = jnp.dot(xn.astype(jnp.bfloat16), wqkv_ref[...],
                  preferred_element_type=jnp.float32) + bqkv_ref[...]   # (M, 3E) f32

    if fuse_heads:
        # Merge (batch, heads) into a single batch dim and run ONE batched
        # score matmul + ONE batched PV matmul for all heads.
        def split_heads(t):                                     # (M, E) -> (tb*heads, A, dh)
            return (t.reshape(tb, agents, heads, dh)
                     .transpose(0, 2, 1, 3)
                     .reshape(tb * heads, agents, dh))

        qh = split_heads(qkv[:, :embed])
        kh = split_heads(qkv[:, embed:2 * embed])
        vh = split_heads(qkv[:, 2 * embed:])

        s = jnp.einsum('bqd,bkd->bqk', qh, kh,
                       preferred_element_type=jnp.float32)      # (tb*H, A, A)
        s = s - jnp.max(s, axis=-1, keepdims=True)
        p = jnp.exp(s)
        p = p * pl.reciprocal(jnp.sum(p, axis=-1, keepdims=True), approx=False)
        attn = jnp.einsum('bqk,bkd->bqd', p, vh,
                          preferred_element_type=jnp.float32)   # (tb*H, A, dh)
        attn = (attn.reshape(tb, heads, agents, dh)
                    .transpose(0, 2, 1, 3)
                    .reshape(M, embed))
    else:
        # Fallback path (previously validated): per-head loop.
        head_outs = []
        for h in range(heads):
            lo = h * dh
            qh = qkv[:, lo:lo + dh].reshape(tb, agents, dh)
            kh = qkv[:, embed + lo:embed + lo + dh].reshape(tb, agents, dh)
            vh = qkv[:, 2 * embed + lo:2 * embed + lo + dh].reshape(tb, agents, dh)
            s = jnp.einsum('bqd,bkd->bqk', qh, kh,
                           preferred_element_type=jnp.float32)
            s = s - jnp.max(s, axis=-1, keepdims=True)
            p = jnp.exp(s)
            p = p * pl.reciprocal(jnp.sum(p, axis=-1, keepdims=True), approx=False)
            oh = jnp.einsum('bqk,bkd->bqd', p, vh,
                            preferred_element_type=jnp.float32)
            head_outs.append(oh.reshape(M, dh))
        attn = jnp.concatenate(head_outs, axis=-1)              # (M, E)

    # MHA output projection (bf16 inputs, f32 accumulation)
    out = jnp.dot(attn.astype(jnp.bfloat16), wo_ref[...],
                  preferred_element_type=jnp.float32) + bo_ref[...]

    # residual against the *normalized* input (matches the PyTorch forward)
    y = xn + out

    # output LayerNorm (f32)
    o_ref[...] = _layernorm(y, ln2_g_ref[...], ln2_b_ref[...]).astype(o_ref.dtype)


def _pick_tb(batch, agents, embed, heads, *,
             vmem_budget=40 << 20, max_rows=2048):
    """Largest divisor of `batch` whose row slab fits the VMEM budget, keeps
    the (8, 128) sublane rule for non-full blocks, and (when possible) leaves
    >= 4 grid steps so both v7x TensorCores get >= 2 pipelined steps each."""

    def slab_bytes(tb):
        rows = tb * agents
        io = 2 * 2 * rows * embed * 4                       # dbl-buffered in+out (f32)
        interm = 9 * rows * embed * 4 + 3 * tb * heads * agents * agents * 4
        return io + interm

    candidates = []
    for tb in range(1, batch + 1):
        if batch % tb:
            continue
        rows = tb * agents
        if rows % 8 != 0 and tb != batch:                   # sublane rule unless full block
            continue
        if rows > max_rows or slab_bytes(tb) > vmem_budget:
            continue
        candidates.append(tb)
    if not candidates:
        return batch                                        # single full-array block fallback

    for min_steps in (4, 2, 1):                             # prefer 2 steps / TensorCore
        ok = [tb for tb in candidates if batch // tb >= min_steps]
        if ok:
            return max(ok)
    return max(candidates)


def rsa_forward(x, params, heads, *, tb=None):
    B, A, E = x.shape
    assert E % heads == 0, "embed_size must be divisible by heads"
    (ln1_g, ln1_b, wqkv_t, bqkv, wo_t, bo, ln2_g, ln2_b) = params
    flat_params = (ln1_g, ln1_b, wqkv_t, bqkv, wo_t, bo, ln2_g, ln2_b)

    if tb is None:
        tb = _pick_tb(B, A, E, heads)
    assert B % tb == 0
    rows = tb * A
    assert rows % 8 == 0 or tb == B, (
        "rows = tb*agents must be a multiple of 8 when the grid has > 1 step")

    x2 = x.reshape(B * A, E)     # batch-major, agent-minor row layout
    dh = E // heads

    # Explicit scoped-VMEM budget: resident params (+ possible double
    # buffering) + double-buffered row slabs + in-kernel intermediates.
    weight_bytes = sum(int(p.size) * p.dtype.itemsize for p in flat_params)
    act_bytes = 2 * 2 * rows * E * 4
    interm_bytes = 9 * rows * E * 4 + 3 * tb * heads * A * A * 4
    vmem_limit = int(1.5 * (2 * weight_bytes + act_bytes + interm_bytes)) + (8 << 20)
    vmem_limit = max(32 << 20, min(vmem_limit, 100 << 20))

    cost = pl.CostEstimate(
        flops=int(2 * B * A * E * 3 * E            # fused QKV matmul
                  + 2 * B * A * E * E              # output projection
                  + 4 * B * heads * A * A * dh),   # scores + PV
        transcendentals=int(B * heads * A * A),    # exp in softmax
        bytes_accessed=int(2 * B * A * E * 4 + weight_bytes))

    def build(fuse_heads, single_buffer_consts):
        kernel = functools.partial(rsa_kernel, heads=heads, agents=A, embed=E,
                                   fuse_heads=fuse_heads)

        def const_spec(arr):
            nd = arr.ndim
            kw = {"pipeline_mode": pl.Buffered(1)} if single_buffer_consts else {}
            return pl.BlockSpec(arr.shape, lambda b, _n=nd: (0,) * _n, **kw)

        return pl.pallas_call(
            kernel,
            out_shape=jax.ShapeDtypeStruct((B * A, E), jnp.float32),
            grid_spec=pltpu.PrefetchScalarGridSpec(
                num_scalar_prefetch=0,
                grid=(B // tb,),
                in_specs=[pl.BlockSpec((rows, E), lambda b: (b, 0)),
                          const_spec(ln1_g), const_spec(ln1_b),
                          const_spec(wqkv_t), const_spec(bqkv),
                          const_spec(wo_t), const_spec(bo),
                          const_spec(ln2_g), const_spec(ln2_b)],
                out_specs=pl.BlockSpec((rows, E), lambda b: (b, 0)),
            ),
            compiler_params=pltpu.CompilerParams(
                dimension_semantics=("parallel",),
                vmem_limit_bytes=vmem_limit),
            cost_estimate=cost,
        )

    # Fallback ladder: fused heads + single-buffered consts -> fused heads ->
    # per-head path (previously validated).  Guarantees a clean run even if
    # this jax/Mosaic build rejects Buffered(1) or the head-merge relayout.
    attempts = ((True, True), (True, False), (False, False))
    last_err = None
    for fuse, single in attempts:
        try:
            out2 = build(fuse, single)(x2, *flat_params)
            out2 = jax.block_until_ready(out2)
            break
        except Exception as err:      # noqa: BLE001 - keep the kernel runnable
            last_err = err
    else:
        raise last_err

    return out2.reshape(B, A, E)


# ----------------------------------------------------------------------------
# Host-side parameter construction / folding
# ----------------------------------------------------------------------------

def init_rsa_raw_params(key, embed_size):
    """Deterministic raw params mirroring the PyTorch module's __init__."""
    E = embed_size
    ks = jax.random.split(key, 10)
    kaiming_std = (2.0 / E) ** 0.5           # kaiming_normal_ for q/k/v embed
    lin_b_bound = 1.0 / (E ** 0.5)           # nn.Linear default bias init
    xavier_bound = (6.0 / (E + E)) ** 0.5    # MHA in_proj_weight (xavier_uniform_)

    return dict(
        wq=kaiming_std * jax.random.normal(ks[0], (E, E), jnp.float32),
        wk=kaiming_std * jax.random.normal(ks[1], (E, E), jnp.float32),
        wv=kaiming_std * jax.random.normal(ks[2], (E, E), jnp.float32),
        bq=jax.random.uniform(ks[3], (E,), jnp.float32, -lin_b_bound, lin_b_bound),
        bk=jax.random.uniform(ks[4], (E,), jnp.float32, -lin_b_bound, lin_b_bound),
        bv=jax.random.uniform(ks[5], (E,), jnp.float32, -lin_b_bound, lin_b_bound),
        wiq=jax.random.uniform(ks[6], (E, E), jnp.float32, -xavier_bound, xavier_bound),
        wik=jax.random.uniform(ks[7], (E, E), jnp.float32, -xavier_bound, xavier_bound),
        wiv=jax.random.uniform(ks[8], (E, E), jnp.float32, -xavier_bound, xavier_bound),
        biq=jnp.zeros((E,), jnp.float32),    # MHA in_proj_bias defaults to 0
        bik=jnp.zeros((E,), jnp.float32),
        biv=jnp.zeros((E,), jnp.float32),
        wo=jax.random.uniform(ks[9], (E, E), jnp.float32, -lin_b_bound, lin_b_bound),
        bo=jnp.zeros((E,), jnp.float32),     # MHA out_proj.bias defaults to 0
        ln1_g=jnp.ones((E,), jnp.float32), ln1_b=jnp.zeros((E,), jnp.float32),
        ln2_g=jnp.ones((E,), jnp.float32), ln2_b=jnp.zeros((E,), jnp.float32),
    )


def fold_rsa_params(raw, embed_size, heads):
    """Exact host-side algebra (done in f32, matmul weights then cast bf16):
       Q = (xn Wq^T + bq) Wiq^T + biq = xn (Wiq Wq)^T + (Wiq bq + biq)
    (same for K/V).  The 1/sqrt(dh) attention scale is folded into the Q
    stream, everything is pre-transposed for `x @ W`, and Q/K/V are packed
    into a single (E, 3E) weight so the kernel emits one QKV matmul."""
    E = embed_size
    dh = E // heads
    scale = 1.0 / (dh ** 0.5)

    wq_c = raw['wiq'] @ raw['wq']
    wk_c = raw['wik'] @ raw['wk']
    wv_c = raw['wiv'] @ raw['wv']
    bq_c = raw['wiq'] @ raw['bq'] + raw['biq']
    bk_c = raw['wik'] @ raw['bk'] + raw['bik']
    bv_c = raw['wiv'] @ raw['bv'] + raw['biv']

    wqkv_t = jnp.concatenate([(scale * wq_c).T, wk_c.T, wv_c.T],
                             axis=1).astype(jnp.bfloat16)              # (E, 3E) bf16
    bqkv = jnp.concatenate([scale * bq_c, bk_c, bv_c]).reshape(1, 3 * E)  # f32

    return (raw['ln1_g'].reshape(1, E), raw['ln1_b'].reshape(1, E),
            wqkv_t, bqkv,
            raw['wo'].T.astype(jnp.bfloat16), raw['bo'].reshape(1, E),
            raw['ln2_g'].reshape(1, E), raw['ln2_b'].reshape(1, E))


def rsa_reference(x, raw, heads):
    """Pure-JAX f32 reference matching the PyTorch module (correctness check)."""
    B, A, E = x.shape
    dh = E // heads

    def ln(v, g, b, eps=1e-5):
        m = v.mean(-1, keepdims=True)
        var = ((v - m) ** 2).mean(-1, keepdims=True)
        return (v - m) / jnp.sqrt(var + eps) * g + b

    xn = ln(x, raw['ln1_g'], raw['ln1_b'])
    q = xn @ raw['wq'].T + raw['bq']
    k = xn @ raw['wk'].T + raw['bk']
    v = xn @ raw['wv'].T + raw['bv']
    Q = q @ raw['wiq'].T + raw['biq']
    K = k @ raw['wik'].T + raw['bik']
    V = v @ raw['wiv'].T + raw['biv']
    Qh = Q.reshape(B, A, heads, dh).transpose(0, 2, 1, 3)
    Kh = K.reshape(B, A, heads, dh).transpose(0, 2, 1, 3)
    Vh = V.reshape(B, A, heads, dh).transpose(0, 2, 1, 3)
    s = jnp.einsum('bhqd,bhkd->bhqk', Qh, Kh) / jnp.sqrt(dh)
    p = jax.nn.softmax(s, axis=-1)
    attn = jnp.einsum('bhqk,bhkd->bhqd', p, Vh).transpose(0, 2, 1, 3).reshape(B, A, E)
    out = attn @ raw['wo'].T + raw['bo']
    return ln(xn + out, raw['ln2_g'], raw['ln2_b'])


if __name__ == "__main__":
    B, A, E, HEADS = 2, 8, 32, 4     # Batch, Agents, embed_size, heads
    # TODO(synk): attention dropout (dropout_rate > 0) is not implemented;
    # the module default is 0.0 (inference), so the forward is unaffected.

    key = jax.random.PRNGKey(0)
    k_x, k_p = jax.random.split(key)
    x = jax.random.normal(k_x, (B, A, E), jnp.float32)

    raw = init_rsa_raw_params(k_p, E)
    params = fold_rsa_params(raw, E, HEADS)

    out = rsa_forward(x, params, HEADS)
    out = jax.block_until_ready(out)

    assert out.shape == (B, A, E)
    assert bool(jnp.all(jnp.isfinite(out)))

    # correctness vs. pure-JAX f32 reference (tolerance accounts for the
    # bf16-input matmuls; softmax/LN math is exact f32)
    ref = rsa_reference(x, raw, HEADS)
    max_err = float(jnp.max(jnp.abs(out - ref)))
    assert max_err < 1e-1, f"max abs err {max_err}"

    print("KERNEL_OK")
</pallas_src>

<mosaic_0001>
module attributes {stable_mosaic.version = 11 : i64} {
  func.func @rsa_kernel(%arg0: i32, %arg1: memref<8x32xf32, #tpu.memory_space<vmem>>, %arg2: memref<1x32xf32, #tpu.memory_space<vmem>>, %arg3: memref<1x32xf32, #tpu.memory_space<vmem>>, %arg4: memref<32x96xbf16, #tpu.memory_space<vmem>>, %arg5: memref<1x96xf32, #tpu.memory_space<vmem>>, %arg6: memref<32x32xbf16, #tpu.memory_space<vmem>>, %arg7: memref<1x32xf32, #tpu.memory_space<vmem>>, %arg8: memref<1x32xf32, #tpu.memory_space<vmem>>, %arg9: memref<1x32xf32, #tpu.memory_space<vmem>>, %arg10: memref<8x32xf32, #tpu.memory_space<vmem>>) attributes {dimension_semantics = [#tpu.dimension_semantics<parallel>], iteration_bounds = array<i64: 2>, scalar_prefetch = 0 : i64, scratch_operands = 0 : i64, tpu.core_type = #tpu.core_type<tc>, window_params = [{transform_indices = @transform_0, window_bounds = array<i64: 8, 32>}, {pipeline_mode = #tpu.pipeline_mode<synchronous>, transform_indices = @transform_1, window_bounds = array<i64: 1, 32>}, {pipeline_mode = #tpu.pipeline_mode<synchronous>, transform_indices = @transform_2, window_bounds = array<i64: 1, 32>}, {pipeline_mode = #tpu.pipeline_mode<synchronous>, transform_indices = @transform_3, window_bounds = array<i64: 32, 96>}, {pipeline_mode = #tpu.pipeline_mode<synchronous>, transform_indices = @transform_4, window_bounds = array<i64: 1, 96>}, {pipeline_mode = #tpu.pipeline_mode<synchronous>, transform_indices = @transform_5, window_bounds = array<i64: 32, 32>}, {pipeline_mode = #tpu.pipeline_mode<synchronous>, transform_indices = @transform_6, window_bounds = array<i64: 1, 32>}, {pipeline_mode = #tpu.pipeline_mode<synchronous>, transform_indices = @transform_7, window_bounds = array<i64: 1, 32>}, {pipeline_mode = #tpu.pipeline_mode<synchronous>, transform_indices = @transform_8, window_bounds = array<i64: 1, 32>}, {transform_indices = @transform_9, window_bounds = array<i64: 8, 32>}]} {
    %c0 = arith.constant 0 : index
    %c0_0 = arith.constant 0 : index
    %0 = vector.load %arg1[%c0, %c0_0] : memref<8x32xf32, #tpu.memory_space<vmem>>, vector<8x32xf32>
    %c0_1 = arith.constant 0 : index
    %c0_2 = arith.constant 0 : index
    %1 = vector.load %arg2[%c0_1, %c0_2] : memref<1x32xf32, #tpu.memory_space<vmem>>, vector<1x32xf32>
    %c0_3 = arith.constant 0 : index
    %c0_4 = arith.constant 0 : index
    %2 = vector.load %arg3[%c0_3, %c0_4] : memref<1x32xf32, #tpu.memory_space<vmem>>, vector<1x32xf32>
    %cst = arith.constant dense<0.000000e+00> : vector<8xf32>
    %3 = vector.multi_reduction <add>, %0, %cst [1] : vector<8x32xf32> to vector<8xf32>
    %4 = vector.shape_cast %3 : vector<8xf32> to vector<8x1xf32>
    %cst_5 = arith.constant 3.200000e+01 : f32
    %5 = vector.broadcast %cst_5 : f32 to vector<8x1xf32>
    %6 = arith.divf %4, %5 : vector<8x1xf32>
    %7 = vector.broadcast %6 : vector<8x1xf32> to vector<8x32xf32>
    %8 = arith.subf %0, %7 : vector<8x32xf32>
    %9 = arith.mulf %8, %8 : vector<8x32xf32>
    %cst_6 = arith.constant dense<0.000000e+00> : vector<8xf32>
    %10 = vector.multi_reduction <add>, %9, %cst_6 [1] : vector<8x32xf32> to vector<8xf32>
    %11 = vector.shape_cast %10 : vector<8xf32> to vector<8x1xf32>
    %cst_7 = arith.constant 3.200000e+01 : f32
    %12 = vector.broadcast %cst_7 : f32 to vector<8x1xf32>
    %13 = arith.divf %11, %12 : vector<8x1xf32>
    %cst_8 = arith.constant 9.99999974E-6 : f32
    %14 = vector.broadcast %cst_8 : f32 to vector<8x1xf32>
    %15 = arith.addf %13, %14 : vector<8x1xf32>
    %16 = math.rsqrt %15 : vector<8x1xf32>
    %17 = vector.broadcast %16 : vector<8x1xf32> to vector<8x32xf32>
    %18 = arith.mulf %8, %17 : vector<8x32xf32>
    %19 = vector.broadcast %1 : vector<1x32xf32> to vector<8x32xf32>
    %20 = arith.mulf %18, %19 : vector<8x32xf32>
    %21 = vector.broadcast %2 : vector<1x32xf32> to vector<8x32xf32>
    %22 = arith.addf %20, %21 : vector<8x32xf32>
    %23 = arith.truncf %22 : vector<8x32xf32> to vector<8x32xbf16>
    %c0_9 = arith.constant 0 : index
    %c0_10 = arith.constant 0 : index
    %24 = vector.load %arg4[%c0_9, %c0_10] : memref<32x96xbf16, #tpu.memory_space<vmem>>, vector<32x96xbf16>
    %cst_11 = arith.constant dense<0.000000e+00> : vector<8x96xf32>
    %25 = tpu.matmul %23, %24, %cst_11 {dimension_numbers = #tpu.dot_dimension_numbers<[1], [0], [0], [1], [0, 0, 1, 1], [], []>} : vector<8x32xbf16>, vector<32x96xbf16>, vector<8x96xf32> -> vector<8x96xf32>
    %c0_12 = arith.constant 0 : index
    %c0_13 = arith.constant 0 : index
    %26 = vector.load %arg5[%c0_12, %c0_13] : memref<1x96xf32, #tpu.memory_space<vmem>>, vector<1x96xf32>
    %27 = vector.broadcast %26 : vector<1x96xf32> to vector<8x96xf32>
    %28 = arith.addf %25, %27 : vector<8x96xf32>
    %29 = vector.extract_strided_slice %28 {offsets = [0, 0], sizes = [8, 32], strides = [1, 1]} : vector<8x96xf32> to vector<8x32xf32>
    %30 = vector.shape_cast %29 : vector<8x32xf32> to vector<1x8x4x8xf32>
    %31 = tpu.transpose %30, [0, 2, 1, 3] : vector<1x8x4x8xf32> -> vector<1x4x8x8xf32>
    %32 = vector.shape_cast %31 : vector<1x4x8x8xf32> to vector<4x8x8xf32>
    %33 = vector.extract_strided_slice %28 {offsets = [0, 32], sizes = [8, 32], strides = [1, 1]} : vector<8x96xf32> to vector<8x32xf32>
    %34 = vector.shape_cast %33 : vector<8x32xf32> to vector<1x8x4x8xf32>
    %35 = tpu.transpose %34, [0, 2, 1, 3] : vector<1x8x4x8xf32> -> vector<1x4x8x8xf32>
    %36 = vector.shape_cast %35 : vector<1x4x8x8xf32> to vector<4x8x8xf32>
    %37 = vector.extract_strided_slice %28 {offsets = [0, 64], sizes = [8, 32], strides = [1, 1]} : vector<8x96xf32> to vector<8x32xf32>
    %38 = vector.shape_cast %37 : vector<8x32xf32> to vector<1x8x4x8xf32>
    %39 = tpu.transpose %38, [0, 2, 1, 3] : vector<1x8x4x8xf32> -> vector<1x4x8x8xf32>
    %40 = vector.shape_cast %39 : vector<1x4x8x8xf32> to vector<4x8x8xf32>
    "tpu.trace_start"() <{level = 10 : i32, message = "bqd,bkd->bqk"}> : () -> ()
    %cst_14 = arith.constant dense<0.000000e+00> : vector<4x8x8xf32>
    %41 = tpu.matmul %32, %36, %cst_14 {dimension_numbers = #tpu.dot_dimension_numbers<[2], [2], [1], [1], [0, 0, 0, 1, 1, 1], [0], [0]>} : vector<4x8x8xf32>, vector<4x8x8xf32>, vector<4x8x8xf32> -> vector<4x8x8xf32>
    "tpu.trace_stop"() : () -> ()
    %cst_15 = arith.constant dense<0xFF800000> : vector<4x8xf32>
    %42 = vector.multi_reduction <maximumf>, %41, %cst_15 [2] : vector<4x8x8xf32> to vector<4x8xf32>
    %43 = vector.shape_cast %42 : vector<4x8xf32> to vector<4x8x1xf32>
    %44 = vector.broadcast %43 : vector<4x8x1xf32> to vector<4x8x8xf32>
    %45 = arith.subf %41, %44 : vector<4x8x8xf32>
    %46 = math.exp %45 : vector<4x8x8xf32>
    %cst_16 = arith.constant dense<0.000000e+00> : vector<4x8xf32>
    %47 = vector.multi_reduction <add>, %46, %cst_16 [2] : vector<4x8x8xf32> to vector<4x8xf32>
    %48 = vector.shape_cast %47 : vector<4x8xf32> to vector<4x8x1xf32>
    %49 = tpu.reciprocal %48 : vector<4x8x1xf32> -> vector<4x8x1xf32>
    %50 = vector.broadcast %49 : vector<4x8x1xf32> to vector<4x8x8xf32>
    %51 = arith.mulf %46, %50 : vector<4x8x8xf32>
    "tpu.trace_start"() <{level = 10 : i32, message = "bqk,bkd->bqd"}> : () -> ()
    %cst_17 = arith.constant dense<0.000000e+00> : vector<4x8x8xf32>
    %52 = tpu.matmul %51, %40, %cst_17 {dimension_numbers = #tpu.dot_dimension_numbers<[2], [1], [1], [2], [0, 0, 0, 1, 1, 2], [0], [0]>} : vector<4x8x8xf32>, vector<4x8x8xf32>, vector<4x8x8xf32> -> vector<4x8x8xf32>
    "tpu.trace_stop"() : () -> ()
    %53 = vector.shape_cast %52 : vector<4x8x8xf32> to vector<1x4x8x8xf32>
    %54 = tpu.transpose %53, [0, 2, 1, 3] : vector<1x4x8x8xf32> -> vector<1x8x4x8xf32>
    %55 = vector.shape_cast %54 : vector<1x8x4x8xf32> to vector<8x32xf32>
    %56 = arith.truncf %55 : vector<8x32xf32> to vector<8x32xbf16>
    %c0_18 = arith.constant 0 : index
    %c0_19 = arith.constant 0 : index
    %57 = vector.load %arg6[%c0_18, %c0_19] : memref<32x32xbf16, #tpu.memory_space<vmem>>, vector<32x32xbf16>
    %cst_20 = arith.constant dense<0.000000e+00> : vector<8x32xf32>
    %58 = tpu.matmul %56, %57, %cst_20 {dimension_numbers = #tpu.dot_dimension_numbers<[1], [0], [0], [1], [0, 0, 1, 1], [], []>} : vector<8x32xbf16>, vector<32x32xbf16>, vector<8x32xf32> -> vector<8x32xf32>
    %c0_21 = arith.constant 0 : index
    %c0_22 = arith.constant 0 : index
    %59 = vector.load %arg7[%c0_21, %c0_22] : memref<1x32xf32, #tpu.memory_space<vmem>>, vector<1x32xf32>
    %60 = vector.broadcast %59 : vector<1x32xf32> to vector<8x32xf32>
    %61 = arith.addf %58, %60 : vector<8x32xf32>
    %62 = arith.addf %22, %61 : vector<8x32xf32>
    %c0_23 = arith.constant 0 : index
    %c0_24 = arith.constant 0 : index
    %63 = vector.load %arg8[%c0_23, %c0_24] : memref<1x32xf32, #tpu.memory_space<vmem>>, vector<1x32xf32>
    %c0_25 = arith.constant 0 : index
    %c0_26 = arith.constant 0 : index
    %64 = vector.load %arg9[%c0_25, %c0_26] : memref<1x32xf32, #tpu.memory_space<vmem>>, vector<1x32xf32>
    %cst_27 = arith.constant dense<0.000000e+00> : vector<8xf32>
    %65 = vector.multi_reduction <add>, %62, %cst_27 [1] : vector<8x32xf32> to vector<8xf32>
    %66 = vector.shape_cast %65 : vector<8xf32> to vector<8x1xf32>
    %cst_28 = arith.constant 3.200000e+01 : f32
    %67 = vector.broadcast %cst_28 : f32 to vector<8x1xf32>
    %68 = arith.divf %66, %67 : vector<8x1xf32>
    %69 = vector.broadcast %68 : vector<8x1xf32> to vector<8x32xf32>
    %70 = arith.subf %62, %69 : vector<8x32xf32>
    %71 = arith.mulf %70, %70 : vector<8x32xf32>
    %cst_29 = arith.constant dense<0.000000e+00> : vector<8xf32>
    %72 = vector.multi_reduction <add>, %71, %cst_29 [1] : vector<8x32xf32> to vector<8xf32>
    %73 = vector.shape_cast %72 : vector<8xf32> to vector<8x1xf32>
    %cst_30 = arith.constant 3.200000e+01 : f32
    %74 = vector.broadcast %cst_30 : f32 to vector<8x1xf32>
    %75 = arith.divf %73, %74 : vector<8x1xf32>
    %cst_31 = arith.constant 9.99999974E-6 : f32
    %76 = vector.broadcast %cst_31 : f32 to vector<8x1xf32>
    %77 = arith.addf %75, %76 : vector<8x1xf32>
    %78 = math.rsqrt %77 : vector<8x1xf32>
    %79 = vector.broadcast %78 : vector<8x1xf32> to vector<8x32xf32>
    %80 = arith.mulf %70, %79 : vector<8x32xf32>
    %81 = vector.broadcast %63 : vector<1x32xf32> to vector<8x32xf32>
    %82 = arith.mulf %80, %81 : vector<8x32xf32>
    %83 = vector.broadcast %64 : vector<1x32xf32> to vector<8x32xf32>
    %84 = arith.addf %82, %83 : vector<8x32xf32>
    %c0_32 = arith.constant 0 : index
    %c0_33 = arith.constant 0 : index
    %85 = vector.load %arg10[%c0_32, %c0_33] : memref<8x32xf32, #tpu.memory_space<vmem>>, vector<8x32xf32>
    tpu.vector_store %arg10[%c0_32, %c0_33], %84 {strides = array<i32>} : memref<8x32xf32, #tpu.memory_space<vmem>>, vector<8x32xf32>,
    return
  }
  func.func @transform_0(%arg0: i32) -> (i32, i32) {
    %c0_i32 = arith.constant 0 : i32
    %c0_i32_0 = arith.constant 0 : i32
    return %arg0, %c0_i32 : i32, i32
  }
  func.func @transform_1(%arg0: i32) -> (i32, i32) {
    %c0_i32 = arith.constant 0 : i32
    %c0_i32_0 = arith.constant 0 : i32
    %c0_i32_1 = arith.constant 0 : i32
    return %c0_i32, %c0_i32_0 : i32, i32
  }
  func.func @transform_2(%arg0: i32) -> (i32, i32) {
    %c0_i32 = arith.constant 0 : i32
    %c0_i32_0 = arith.constant 0 : i32
    %c0_i32_1 = arith.constant 0 : i32
    return %c0_i32, %c0_i32_0 : i32, i32
  }
  func.func @transform_3(%arg0: i32) -> (i32, i32) {
    %c0_i32 = arith.constant 0 : i32
    %c0_i32_0 = arith.constant 0 : i32
    %c0_i32_1 = arith.constant 0 : i32
    return %c0_i32, %c0_i32_0 : i32, i32
  }
  func.func @transform_4(%arg0: i32) -> (i32, i32) {
    %c0_i32 = arith.constant 0 : i32
    %c0_i32_0 = arith.constant 0 : i32
    %c0_i32_1 = arith.constant 0 : i32
    return %c0_i32, %c0_i32_0 : i32, i32
  }
  func.func @transform_5(%arg0: i32) -> (i32, i32) {
    %c0_i32 = arith.constant 0 : i32
    %c0_i32_0 = arith.constant 0 : i32
    %c0_i32_1 = arith.constant 0 : i32
    return %c0_i32, %c0_i32_0 : i32, i32
  }
  func.func @transform_6(%arg0: i32) -> (i32, i32) {
    %c0_i32 = arith.constant 0 : i32
    %c0_i32_0 = arith.constant 0 : i32
    %c0_i32_1 = arith.constant 0 : i32
    return %c0_i32, %c0_i32_0 : i32, i32
  }
  func.func @transform_7(%arg0: i32) -> (i32, i32) {
    %c0_i32 = arith.constant 0 : i32
    %c0_i32_0 = arith.constant 0 : i32
    %c0_i32_1 = arith.constant 0 : i32
    return %c0_i32, %c0_i32_0 : i32, i32
  }
  func.func @transform_8(%arg0: i32) -> (i32, i32) {
    %c0_i32 = arith.constant 0 : i32
    %c0_i32_0 = arith.constant 0 : i32
    %c0_i32_1 = arith.constant 0 : i32
    return %c0_i32, %c0_i32_0 : i32, i32
  }
  func.func @transform_9(%arg0: i32) -> (i32, i32) {
    %c0_i32 = arith.constant 0 : i32
    %c0_i32_0 = arith.constant 0 : i32
    return %arg0, %c0_i32 : i32, i32
  }
}

module attributes {stable_mosaic.version = 11 : i64} {
  func.func @rsa_kernel(%arg0: i32, %arg1: memref<8x32xf32, #tpu.memory_space<vmem>>, %arg2: memref<1x32xf32, #tpu.memory_space<vmem>>, %arg3: memref<1x32xf32, #tpu.memory_space<vmem>>, %arg4: memref<32x96xbf16, #tpu.memory_space<vmem>>, %arg5: memref<1x96xf32, #tpu.memory_space<vmem>>, %arg6: memref<32x32xbf16, #tpu.memory_space<vmem>>, %arg7: memref<1x32xf32, #tpu.memory_space<vmem>>, %arg8: memref<1x32xf32, #tpu.memory_space<vmem>>, %arg9: memref<1x32xf32, #tpu.memory_space<vmem>>, %arg10: memref<8x32xf32, #tpu.memory_space<vmem>>) attributes {dimension_semantics = [#tpu.dimension_semantics<parallel>], iteration_bounds = array<i64: 2>, scalar_prefetch = 0 : i64, scratch_operands = 0 : i64, tpu.core_type = #tpu.core_type<tc>, window_params = [{transform_indices = @transform_0, window_bounds = array<i64: 8, 32>}, {pipeline_mode = #tpu.pipeline_mode<synchronous>, transform_indices = @transform_1, window_bounds = array<i64: 1, 32>}, {pipeline_mode = #tpu.pipeline_mode<synchronous>, transform_indices = @transform_2, window_bounds = array<i64: 1, 32>}, {pipeline_mode = #tpu.pipeline_mode<synchronous>, transform_indices = @transform_3, window_bounds = array<i64: 32, 96>}, {pipeline_mode = #tpu.pipeline_mode<synchronous>, transform_indices = @transform_4, window_bounds = array<i64: 1, 96>}, {pipeline_mode = #tpu.pipeline_mode<synchronous>, transform_indices = @transform_5, window_bounds = array<i64: 32, 32>}, {pipeline_mode = #tpu.pipeline_mode<synchronous>, transform_indices = @transform_6, window_bounds = array<i64: 1, 32>}, {pipeline_mode = #tpu.pipeline_mode<synchronous>, transform_indices = @transform_7, window_bounds = array<i64: 1, 32>}, {pipeline_mode = #tpu.pipeline_mode<synchronous>, transform_indices = @transform_8, window_bounds = array<i64: 1, 32>}, {transform_indices = @transform_9, window_bounds = array<i64: 8, 32>}]} {
    %c0 = arith.constant 0 : index
    %c0_0 = arith.constant 0 : index
    %0 = vector.load %arg1[%c0, %c0_0] : memref<8x32xf32, #tpu.memory_space<vmem>>, vector<8x32xf32>
    %c0_1 = arith.constant 0 : index
    %c0_2 = arith.constant 0 : index
    %1 = vector.load %arg2[%c0_1, %c0_2] : memref<1x32xf32, #tpu.memory_space<vmem>>, vector<1x32xf32>
    %c0_3 = arith.constant 0 : index
    %c0_4 = arith.constant 0 : index
    %2 = vector.load %arg3[%c0_3, %c0_4] : memref<1x32xf32, #tpu.memory_space<vmem>>, vector<1x32xf32>
    %cst = arith.constant dense<0.000000e+00> : vector<8xf32>
    %3 = vector.multi_reduction <add>, %0, %cst [1] : vector<8x32xf32> to vector<8xf32>
    %4 = vector.shape_cast %3 : vector<8xf32> to vector<8x1xf32>
    %cst_5 = arith.constant 3.200000e+01 : f32
    %5 = vector.broadcast %cst_5 : f32 to vector<8x1xf32>
    %6 = arith.divf %4, %5 : vector<8x1xf32>
    %7 = vector.broadcast %6 : vector<8x1xf32> to vector<8x32xf32>
    %8 = arith.subf %0, %7 : vector<8x32xf32>
    %9 = arith.mulf %8, %8 : vector<8x32xf32>
    %cst_6 = arith.constant dense<0.000000e+00> : vector<8xf32>
    %10 = vector.multi_reduction <add>, %9, %cst_6 [1] : vector<8x32xf32> to vector<8xf32>
    %11 = vector.shape_cast %10 : vector<8xf32> to vector<8x1xf32>
    %cst_7 = arith.constant 3.200000e+01 : f32
    %12 = vector.broadcast %cst_7 : f32 to vector<8x1xf32>
    %13 = arith.divf %11, %12 : vector<8x1xf32>
    %cst_8 = arith.constant 9.99999974E-6 : f32
    %14 = vector.broadcast %cst_8 : f32 to vector<8x1xf32>
    %15 = arith.addf %13, %14 : vector<8x1xf32>
    %16 = math.rsqrt %15 : vector<8x1xf32>
    %17 = vector.broadcast %16 : vector<8x1xf32> to vector<8x32xf32>
    %18 = arith.mulf %8, %17 : vector<8x32xf32>
    %19 = vector.broadcast %1 : vector<1x32xf32> to vector<8x32xf32>
    %20 = arith.mulf %18, %19 : vector<8x32xf32>
    %21 = vector.broadcast %2 : vector<1x32xf32> to vector<8x32xf32>
    %22 = arith.addf %20, %21 : vector<8x32xf32>
    %23 = arith.truncf %22 : vector<8x32xf32> to vector<8x32xbf16>
    %c0_9 = arith.constant 0 : index
    %c0_10 = arith.constant 0 : index
    %24 = vector.load %arg4[%c0_9, %c0_10] : memref<32x96xbf16, #tpu.memory_space<vmem>>, vector<32x96xbf16>
    %cst_11 = arith.constant dense<0.000000e+00> : vector<8x96xf32>
    %25 = tpu.matmul %23, %24, %cst_11 {dimension_numbers = #tpu.dot_dimension_numbers<[1], [0], [0], [1], [0, 0, 1, 1], [], []>} : vector<8x32xbf16>, vector<32x96xbf16>, vector<8x96xf32> -> vector<8x96xf32>
    %c0_12 = arith.constant 0 : index
    %c0_13 = arith.constant 0 : index
    %26 = vector.load %arg5[%c0_12, %c0_13] : memref<1x96xf32, #tpu.memory_space<vmem>>, vector<1x96xf32>
    %27 = vector.broadcast %26 : vector<1x96xf32> to vector<8x96xf32>
    %28 = arith.addf %25, %27 : vector<8x96xf32>
    %29 = vector.extract_strided_slice %28 {offsets = [0, 0], sizes = [8, 32], strides = [1, 1]} : vector<8x96xf32> to vector<8x32xf32>
    %30 = vector.shape_cast %29 : vector<8x32xf32> to vector<1x8x4x8xf32>
    %31 = tpu.transpose %30, [0, 2, 1, 3] : vector<1x8x4x8xf32> -> vector<1x4x8x8xf32>
    %32 = vector.shape_cast %31 : vector<1x4x8x8xf32> to vector<4x8x8xf32>
    %33 = vector.extract_strided_slice %28 {offsets = [0, 32], sizes = [8, 32], strides = [1, 1]} : vector<8x96xf32> to vector<8x32xf32>
    %34 = vector.shape_cast %33 : vector<8x32xf32> to vector<1x8x4x8xf32>
    %35 = tpu.transpose %34, [0, 2, 1, 3] : vector<1x8x4x8xf32> -> vector<1x4x8x8xf32>
    %36 = vector.shape_cast %35 : vector<1x4x8x8xf32> to vector<4x8x8xf32>
    %37 = vector.extract_strided_slice %28 {offsets = [0, 64], sizes = [8, 32], strides = [1, 1]} : vector<8x96xf32> to vector<8x32xf32>
    %38 = vector.shape_cast %37 : vector<8x32xf32> to vector<1x8x4x8xf32>
    %39 = tpu.transpose %38, [0, 2, 1, 3] : vector<1x8x4x8xf32> -> vector<1x4x8x8xf32>
    %40 = vector.shape_cast %39 : vector<1x4x8x8xf32> to vector<4x8x8xf32>
    "tpu.trace_start"() <{level = 10 : i32, message = "bqd,bkd->bqk"}> : () -> ()
    %cst_14 = arith.constant dense<0.000000e+00> : vector<4x8x8xf32>
    %41 = tpu.matmul %32, %36, %cst_14 {dimension_numbers = #tpu.dot_dimension_numbers<[2], [2], [1], [1], [0, 0, 0, 1, 1, 1], [0], [0]>} : vector<4x8x8xf32>, vector<4x8x8xf32>, vector<4x8x8xf32> -> vector<4x8x8xf32>
    "tpu.trace_stop"() : () -> ()
    %cst_15 = arith.constant dense<0xFF800000> : vector<4x8xf32>
    %42 = vector.multi_reduction <maximumf>, %41, %cst_15 [2] : vector<4x8x8xf32> to vector<4x8xf32>
    %43 = vector.shape_cast %42 : vector<4x8xf32> to vector<4x8x1xf32>
    %44 = vector.broadcast %43 : vector<4x8x1xf32> to vector<4x8x8xf32>
    %45 = arith.subf %41, %44 : vector<4x8x8xf32>
    %46 = math.exp %45 : vector<4x8x8xf32>
    %cst_16 = arith.constant dense<0.000000e+00> : vector<4x8xf32>
    %47 = vector.multi_reduction <add>, %46, %cst_16 [2] : vector<4x8x8xf32> to vector<4x8xf32>
    %48 = vector.shape_cast %47 : vector<4x8xf32> to vector<4x8x1xf32>
    %49 = tpu.reciprocal %48 : vector<4x8x1xf32> -> vector<4x8x1xf32>
    %50 = vector.broadcast %49 : vector<4x8x1xf32> to vector<4x8x8xf32>
    %51 = arith.mulf %46, %50 : vector<4x8x8xf32>
    "tpu.trace_start"() <{level = 10 : i32, message = "bqk,bkd->bqd"}> : () -> ()
    %cst_17 = arith.constant dense<0.000000e+00> : vector<4x8x8xf32>
    %52 = tpu.matmul %51, %40, %cst_17 {dimension_numbers = #tpu.dot_dimension_numbers<[2], [1], [1], [2], [0, 0, 0, 1, 1, 2], [0], [0]>} : vector<4x8x8xf32>, vector<4x8x8xf32>, vector<4x8x8xf32> -> vector<4x8x8xf32>
    "tpu.trace_stop"() : () -> ()
    %53 = vector.shape_cast %52 : vector<4x8x8xf32> to vector<1x4x8x8xf32>
    %54 = tpu.transpose %53, [0, 2, 1, 3] : vector<1x4x8x8xf32> -> vector<1x8x4x8xf32>
    %55 = vector.shape_cast %54 : vector<1x8x4x8xf32> to vector<8x32xf32>
    %56 = arith.truncf %55 : vector<8x32xf32> to vector<8x32xbf16>
    %c0_18 = arith.constant 0 : index
    %c0_19 = arith.constant 0 : index
    %57 = vector.load %arg6[%c0_18, %c0_19] : memref<32x32xbf16, #tpu.memory_space<vmem>>, vector<32x32xbf16>
    %cst_20 = arith.constant dense<0.000000e+00> : vector<8x32xf32>
    %58 = tpu.matmul %56, %57, %cst_20 {dimension_numbers = #tpu.dot_dimension_numbers<[1], [0], [0], [1], [0, 0, 1, 1], [], []>} : vector<8x32xbf16>, vector<32x32xbf16>, vector<8x32xf32> -> vector<8x32xf32>
    %c0_21 = arith.constant 0 : index
    %c0_22 = arith.constant 0 : index
    %59 = vector.load %arg7[%c0_21, %c0_22] : memref<1x32xf32, #tpu.memory_space<vmem>>, vector<1x32xf32>
    %60 = vector.broadcast %59 : vector<1x32xf32> to vector<8x32xf32>
    %61 = arith.addf %58, %60 : vector<8x32xf32>
    %62 = arith.addf %22, %61 : vector<8x32xf32>
    %c0_23 = arith.constant 0 : index
    %c0_24 = arith.constant 0 : index
    %63 = vector.load %arg8[%c0_23, %c0_24] : memref<1x32xf32, #tpu.memory_space<vmem>>, vector<1x32xf32>
    %c0_25 = arith.constant 0 : index
    %c0_26 = arith.constant 0 : index
    %64 = vector.load %arg9[%c0_25, %c0_26] : memref<1x32xf32, #tpu.memory_space<vmem>>, vector<1x32xf32>
    %cst_27 = arith.constant dense<0.000000e+00> : vector<8xf32>
    %65 = vector.multi_reduction <add>, %62, %cst_27 [1] : vector<8x32xf32> to vector<8xf32>
    %66 = vector.shape_cast %65 : vector<8xf32> to vector<8x1xf32>
    %cst_28 = arith.constant 3.200000e+01 : f32
    %67 = vector.broadcast %cst_28 : f32 to vector<8x1xf32>
    %68 = arith.divf %66, %67 : vector<8x1xf32>
    %69 = vector.broadcast %68 : vector<8x1xf32> to vector<8x32xf32>
    %70 = arith.subf %62, %69 : vector<8x32xf32>
    %71 = arith.mulf %70, %70 : vector<8x32xf32>
    %cst_29 = arith.constant dense<0.000000e+00> : vector<8xf32>
    %72 = vector.multi_reduction <add>, %71, %cst_29 [1] : vector<8x32xf32> to vector<8xf32>
    %73 = vector.shape_cast %72 : vector<8xf32> to vector<8x1xf32>
    %cst_30 = arith.constant 3.200000e+01 : f32
    %74 = vector.broadcast %cst_30 : f32 to vector<8x1xf32>
    %75 = arith.divf %73, %74 : vector<8x1xf32>
    %cst_31 = arith.constant 9.99999974E-6 : f32
    %76 = vector.broadcast %cst_31 : f32 to vector<8x1xf32>
    %77 = arith.addf %75, %76 : vector<8x1xf32>
    %78 = math.rsqrt %77 : vector<8x1xf32>
    %79 = vector.broadcast %78 : vector<8x1xf32> to vector<8x32xf32>
    %80 = arith.mulf %70, %79 : vector<8x32xf32>
    %81 = vector.broadcast %63 : vector<1x32xf32> to vector<8x32xf32>
    %82 = arith.mulf %80, %81 : vector<8x32xf32>
    %83 = vector.broadcast %64 : vector<1x32xf32> to vector<8x32xf32>
    %84 = arith.addf %82, %83 : vector<8x32xf32>
    %c0_32 = arith.constant 0 : index
    %c0_33 = arith.constant 0 : index
    %85 = vector.load %arg10[%c0_32, %c0_33] : memref<8x32xf32, #tpu.memory_space<vmem>>, vector<8x32xf32>
    tpu.vector_store %arg10[%c0_32, %c0_33], %84 {strides = array<i32>} : memref<8x32xf32, #tpu.memory_space<vmem>>, vector<8x32xf32>,
    return
  }
  func.func @transform_0(%arg0: i32) -> (i32, i32) {
    %c0_i32 = arith.constant 0 : i32
    %c0_i32_0 = arith.constant 0 : i32
    return %arg0, %c0_i32 : i32, i32
  }
  func.func @transform_1(%arg0: i32) -> (i32, i32) {
    %c0_i32 = arith.constant 0 : i32
    %c0_i32_0 = arith.constant 0 : i32
    %c0_i32_1 = arith.constant 0 : i32
    return %c0_i32, %c0_i32_0 : i32, i32
  }
  func.func @transform_2(%arg0: i32) -> (i32, i32) {
    %c0_i32 = arith.constant 0 : i32
    %c0_i32_0 = arith.constant 0 : i32
    %c0_i32_1 = arith.constant 0 : i32
    return %c0_i32, %c0_i32_0 : i32, i32
  }
  func.func @transform_3(%arg0: i32) -> (i32, i32) {
    %c0_i32 = arith.constant 0 : i32
    %c0_i32_0 = arith.constant 0 : i32
    %c0_i32_1 = arith.constant 0 : i32
    return %c0_i32, %c0_i32_0 : i32, i32
  }
  func.func @transform_4(%arg0: i32) -> (i32, i32) {
    %c0_i32 = arith.constant 0 : i32
    %c0_i32_0 = arith.constant 0 : i32
    %c0_i32_1 = arith.constant 0 : i32
    return %c0_i32, %c0_i32_0 : i32, i32
  }
  func.func @transform_5(%arg0: i32) -> (i32, i32) {
    %c0_i32 = arith.constant 0 : i32
    %c0_i32_0 = arith.constant 0 : i32
    %c0_i32_1 = arith.constant 0 : i32
    return %c0_i32, %c0_i32_0 : i32, i32
  }
  func.func @transform_6(%arg0: i32) -> (i32, i32) {
    %c0_i32 = arith.constant 0 : i32
    %c0_i32_0 = arith.constant 0 : i32
    %c0_i32_1 = arith.constant 0 : i32
    return %c0_i32, %c0_i32_0 : i32, i32
  }
  func.func @transform_7(%arg0: i32) -> (i32, i32) {
    %c0_i32 = arith.constant 0 : i32
    %c0_i32_0 = arith.constant 0 : i32
    %c0_i32_1 = arith.constant 0 : i32
    return %c0_i32, %c0_i32_0 : i32, i32
  }
  func.func @transform_8(%arg0: i32) -> (i32, i32) {
    %c0_i32 = arith.constant 0 : i32
    %c0_i32_0 = arith.constant 0 : i32
    %c0_i32_1 = arith.constant 0 : i32
    return %c0_i32, %c0_i32_0 : i32, i32
  }
  func.func @transform_9(%arg0: i32) -> (i32, i32) {
    %c0_i32 = arith.constant 0 : i32
    %c0_i32_0 = arith.constant 0 : i32
    return %arg0, %c0_i32 : i32, i32
  }
}

module attributes {stable_mosaic.version = 11 : i64} {
  func.func @rsa_kernel(%arg0: i32, %arg1: memref<8x32xf32, #tpu.memory_space<vmem>>, %arg2: memref<1x32xf32, #tpu.memory_space<vmem>>, %arg3: memref<1x32xf32, #tpu.memory_space<vmem>>, %arg4: memref<32x96xbf16, #tpu.memory_space<vmem>>, %arg5: memref<1x96xf32, #tpu.memory_space<vmem>>, %arg6: memref<32x32xbf16, #tpu.memory_space<vmem>>, %arg7: memref<1x32xf32, #tpu.memory_space<vmem>>, %arg8: memref<1x32xf32, #tpu.memory_space<vmem>>, %arg9: memref<1x32xf32, #tpu.memory_space<vmem>>, %arg10: memref<8x32xf32, #tpu.memory_space<vmem>>) attributes {dimension_semantics = [#tpu.dimension_semantics<parallel>], iteration_bounds = array<i64: 2>, scalar_prefetch = 0 : i64, scratch_operands = 0 : i64, tpu.core_type = #tpu.core_type<tc>, window_params = [{transform_indices = @transform_0, window_bounds = array<i64: 8, 32>}, {pipeline_mode = #tpu.pipeline_mode<synchronous>, transform_indices = @transform_1, window_bounds = array<i64: 1, 32>}, {pipeline_mode = #tpu.pipeline_mode<synchronous>, transform_indices = @transform_2, window_bounds = array<i64: 1, 32>}, {pipeline_mode = #tpu.pipeline_mode<synchronous>, transform_indices = @transform_3, window_bounds = array<i64: 32, 96>}, {pipeline_mode = #tpu.pipeline_mode<synchronous>, transform_indices = @transform_4, window_bounds = array<i64: 1, 96>}, {pipeline_mode = #tpu.pipeline_mode<synchronous>, transform_indices = @transform_5, window_bounds = array<i64: 32, 32>}, {pipeline_mode = #tpu.pipeline_mode<synchronous>, transform_indices = @transform_6, window_bounds = array<i64: 1, 32>}, {pipeline_mode = #tpu.pipeline_mode<synchronous>, transform_indices = @transform_7, window_bounds = array<i64: 1, 32>}, {pipeline_mode = #tpu.pipeline_mode<synchronous>, transform_indices = @transform_8, window_bounds = array<i64: 1, 32>}, {transform_indices = @transform_9, window_bounds = array<i64: 8, 32>}]} {
    %c0 = arith.constant 0 : index
    %c0_0 = arith.constant 0 : index
    %0 = vector.load %arg1[%c0, %c0_0] : memref<8x32xf32, #tpu.memory_space<vmem>>, vector<8x32xf32>
    %c0_1 = arith.constant 0 : index
    %c0_2 = arith.constant 0 : index
    %1 = vector.load %arg2[%c0_1, %c0_2] : memref<1x32xf32, #tpu.memory_space<vmem>>, vector<1x32xf32>
    %c0_3 = arith.constant 0 : index
    %c0_4 = arith.constant 0 : index
    %2 = vector.load %arg3[%c0_3, %c0_4] : memref<1x32xf32, #tpu.memory_space<vmem>>, vector<1x32xf32>
    %cst = arith.constant dense<0.000000e+00> : vector<8xf32>
    %3 = vector.multi_reduction <add>, %0, %cst [1] : vector<8x32xf32> to vector<8xf32>
    %4 = vector.shape_cast %3 : vector<8xf32> to vector<8x1xf32>
    %cst_5 = arith.constant 3.200000e+01 : f32
    %5 = vector.broadcast %cst_5 : f32 to vector<8x1xf32>
    %6 = arith.divf %4, %5 : vector<8x1xf32>
    %7 = vector.broadcast %6 : vector<8x1xf32> to vector<8x32xf32>
    %8 = arith.subf %0, %7 : vector<8x32xf32>
    %9 = arith.mulf %8, %8 : vector<8x32xf32>
    %cst_6 = arith.constant dense<0.000000e+00> : vector<8xf32>
    %10 = vector.multi_reduction <add>, %9, %cst_6 [1] : vector<8x32xf32> to vector<8xf32>
    %11 = vector.shape_cast %10 : vector<8xf32> to vector<8x1xf32>
    %cst_7 = arith.constant 3.200000e+01 : f32
    %12 = vector.broadcast %cst_7 : f32 to vector<8x1xf32>
    %13 = arith.divf %11, %12 : vector<8x1xf32>
    %cst_8 = arith.constant 9.99999974E-6 : f32
    %14 = vector.broadcast %cst_8 : f32 to vector<8x1xf32>
    %15 = arith.addf %13, %14 : vector<8x1xf32>
    %16 = math.rsqrt %15 : vector<8x1xf32>
    %17 = vector.broadcast %16 : vector<8x1xf32> to vector<8x32xf32>
    %18 = arith.mulf %8, %17 : vector<8x32xf32>
    %19 = vector.broadcast %1 : vector<1x32xf32> to vector<8x32xf32>
    %20 = arith.mulf %18, %19 : vector<8x32xf32>
    %21 = vector.broadcast %2 : vector<1x32xf32> to vector<8x32xf32>
    %22 = arith.addf %20, %21 : vector<8x32xf32>
    %23 = arith.truncf %22 : vector<8x32xf32> to vector<8x32xbf16>
    %c0_9 = arith.constant 0 : index
    %c0_10 = arith.constant 0 : index
    %24 = vector.load %arg4[%c0_9, %c0_10] : memref<32x96xbf16, #tpu.memory_space<vmem>>, vector<32x96xbf16>
    %cst_11 = arith.constant dense<0.000000e+00> : vector<8x96xf32>
    %25 = tpu.matmul %23, %24, %cst_11 {dimension_numbers = #tpu.dot_dimension_numbers<[1], [0], [0], [1], [0, 0, 1, 1], [], []>} : vector<8x32xbf16>, vector<32x96xbf16>, vector<8x96xf32> -> vector<8x96xf32>
    %c0_12 = arith.constant 0 : index
    %c0_13 = arith.constant 0 : index
    %26 = vector.load %arg5[%c0_12, %c0_13] : memref<1x96xf32, #tpu.memory_space<vmem>>, vector<1x96xf32>
    %27 = vector.broadcast %26 : vector<1x96xf32> to vector<8x96xf32>
    %28 = arith.addf %25, %27 : vector<8x96xf32>
    %29 = vector.extract_strided_slice %28 {offsets = [0, 0], sizes = [8, 8], strides = [1, 1]} : vector<8x96xf32> to vector<8x8xf32>
    %30 = vector.shape_cast %29 : vector<8x8xf32> to vector<1x8x8xf32>
    %31 = vector.extract_strided_slice %28 {offsets = [0, 32], sizes = [8, 8], strides = [1, 1]} : vector<8x96xf32> to vector<8x8xf32>
    %32 = vector.shape_cast %31 : vector<8x8xf32> to vector<1x8x8xf32>
    %33 = vector.extract_strided_slice %28 {offsets = [0, 64], sizes = [8, 8], strides = [1, 1]} : vector<8x96xf32> to vector<8x8xf32>
    %34 = vector.shape_cast %33 : vector<8x8xf32> to vector<1x8x8xf32>
    "tpu.trace_start"() <{level = 10 : i32, message = "bqd,bkd->bqk"}> : () -> ()
    %cst_14 = arith.constant dense<0.000000e+00> : vector<1x8x8xf32>
    %35 = tpu.matmul %30, %32, %cst_14 {dimension_numbers = #tpu.dot_dimension_numbers<[2], [2], [1], [1], [0, 0, 0, 1, 1, 1], [0], [0]>} : vector<1x8x8xf32>, vector<1x8x8xf32>, vector<1x8x8xf32> -> vector<1x8x8xf32>
    "tpu.trace_stop"() : () -> ()
    %cst_15 = arith.constant dense<0xFF800000> : vector<1x8xf32>
    %36 = vector.multi_reduction <maximumf>, %35, %cst_15 [2] : vector<1x8x8xf32> to vector<1x8xf32>
    %37 = vector.shape_cast %36 : vector<1x8xf32> to vector<1x8x1xf32>
    %38 = vector.broadcast %37 : vector<1x8x1xf32> to vector<1x8x8xf32>
    %39 = arith.subf %35, %38 : vector<1x8x8xf32>
    %40 = math.exp %39 : vector<1x8x8xf32>
    %cst_16 = arith.constant dense<0.000000e+00> : vector<1x8xf32>
    %41 = vector.multi_reduction <add>, %40, %cst_16 [2] : vector<1x8x8xf32> to vector<1x8xf32>
    %42 = vector.shape_cast %41 : vector<1x8xf32> to vector<1x8x1xf32>
    %43 = tpu.reciprocal %42 : vector<1x8x1xf32> -> vector<1x8x1xf32>
    %44 = vector.broadcast %43 : vector<1x8x1xf32> to vector<1x8x8xf32>
    %45 = arith.mulf %40, %44 : vector<1x8x8xf32>
    "tpu.trace_start"() <{level = 10 : i32, message = "bqk,bkd->bqd"}> : () -> ()
    %cst_17 = arith.constant dense<0.000000e+00> : vector<1x8x8xf32>
    %46 = tpu.matmul %45, %34, %cst_17 {dimension_numbers = #tpu.dot_dimension_numbers<[2], [1], [1], [2], [0, 0, 0, 1, 1, 2], [0], [0]>} : vector<1x8x8xf32>, vector<1x8x8xf32>, vector<1x8x8xf32> -> vector<1x8x8xf32>
    "tpu.trace_stop"() : () -> ()
    %47 = vector.shape_cast %46 : vector<1x8x8xf32> to vector<8x8xf32>
    %48 = vector.extract_strided_slice %28 {offsets = [0, 8], sizes = [8, 8], strides = [1, 1]} : vector<8x96xf32> to vector<8x8xf32>
    %49 = vector.shape_cast %48 : vector<8x8xf32> to vector<1x8x8xf32>
    %50 = vector.extract_strided_slice %28 {offsets = [0, 40], sizes = [8, 8], strides = [1, 1]} : vector<8x96xf32> to vector<8x8xf32>
    %51 = vector.shape_cast %50 : vector<8x8xf32> to vector<1x8x8xf32>
    %52 = vector.extract_strided_slice %28 {offsets = [0, 72], sizes = [8, 8], strides = [1, 1]} : vector<8x96xf32> to vector<8x8xf32>
    %53 = vector.shape_cast %52 : vector<8x8xf32> to vector<1x8x8xf32>
    "tpu.trace_start"() <{level = 10 : i32, message = "bqd,bkd->bqk"}> : () -> ()
    %cst_18 = arith.constant dense<0.000000e+00> : vector<1x8x8xf32>
    %54 = tpu.matmul %49, %51, %cst_18 {dimension_numbers = #tpu.dot_dimension_numbers<[2], [2], [1], [1], [0, 0, 0, 1, 1, 1], [0], [0]>} : vector<1x8x8xf32>, vector<1x8x8xf32>, vector<1x8x8xf32> -> vector<1x8x8xf32>
    "tpu.trace_stop"() : () -> ()
    %cst_19 = arith.constant dense<0xFF800000> : vector<1x8xf32>
    %55 = vector.multi_reduction <maximumf>, %54, %cst_19 [2] : vector<1x8x8xf32> to vector<1x8xf32>
    %56 = vector.shape_cast %55 : vector<1x8xf32> to vector<1x8x1xf32>
    %57 = vector.broadcast %56 : vector<1x8x1xf32> to vector<1x8x8xf32>
    %58 = arith.subf %54, %57 : vector<1x8x8xf32>
    %59 = math.exp %58 : vector<1x8x8xf32>
    %cst_20 = arith.constant dense<0.000000e+00> : vector<1x8xf32>
    %60 = vector.multi_reduction <add>, %59, %cst_20 [2] : vector<1x8x8xf32> to vector<1x8xf32>
    %61 = vector.shape_cast %60 : vector<1x8xf32> to vector<1x8x1xf32>
    %62 = tpu.reciprocal %61 : vector<1x8x1xf32> -> vector<1x8x1xf32>
    %63 = vector.broadcast %62 : vector<1x8x1xf32> to vector<1x8x8xf32>
    %64 = arith.mulf %59, %63 : vector<1x8x8xf32>
    "tpu.trace_start"() <{level = 10 : i32, message = "bqk,bkd->bqd"}> : () -> ()
    %cst_21 = arith.constant dense<0.000000e+00> : vector<1x8x8xf32>
    %65 = tpu.matmul %64, %53, %cst_21 {dimension_numbers = #tpu.dot_dimension_numbers<[2], [1], [1], [2], [0, 0, 0, 1, 1, 2], [0], [0]>} : vector<1x8x8xf32>, vector<1x8x8xf32>, vector<1x8x8xf32> -> vector<1x8x8xf32>
    "tpu.trace_stop"() : () -> ()
    %66 = vector.shape_cast %65 : vector<1x8x8xf32> to vector<8x8xf32>
    %67 = vector.extract_strided_slice %28 {offsets = [0, 16], sizes = [8, 8], strides = [1, 1]} : vector<8x96xf32> to vector<8x8xf32>
    %68 = vector.shape_cast %67 : vector<8x8xf32> to vector<1x8x8xf32>
    %69 = vector.extract_strided_slice %28 {offsets = [0, 48], sizes = [8, 8], strides = [1, 1]} : vector<8x96xf32> to vector<8x8xf32>
    %70 = vector.shape_cast %69 : vector<8x8xf32> to vector<1x8x8xf32>
    %71 = vector.extract_strided_slice %28 {offsets = [0, 80], sizes = [8, 8], strides = [1, 1]} : vector<8x96xf32> to vector<8x8xf32>
    %72 = vector.shape_cast %71 : vector<8x8xf32> to vector<1x8x8xf32>
    "tpu.trace_start"() <{level = 10 : i32, message = "bqd,bkd->bqk"}> : () -> ()
    %cst_22 = arith.constant dense<0.000000e+00> : vector<1x8x8xf32>
    %73 = tpu.matmul %68, %70, %cst_22 {dimension_numbers = #tpu.dot_dimension_numbers<[2], [2], [1], [1], [0, 0, 0, 1, 1, 1], [0], [0]>} : vector<1x8x8xf32>, vector<1x8x8xf32>, vector<1x8x8xf32> -> vector<1x8x8xf32>
    "tpu.trace_stop"() : () -> ()
    %cst_23 = arith.constant dense<0xFF800000> : vector<1x8xf32>
    %74 = vector.multi_reduction <maximumf>, %73, %cst_23 [2] : vector<1x8x8xf32> to vector<1x8xf32>
    %75 = vector.shape_cast %74 : vector<1x8xf32> to vector<1x8x1xf32>
    %76 = vector.broadcast %75 : vector<1x8x1xf32> to vector<1x8x8xf32>
    %77 = arith.subf %73, %76 : vector<1x8x8xf32>
    %78 = math.exp %77 : vector<1x8x8xf32>
    %cst_24 = arith.constant dense<0.000000e+00> : vector<1x8xf32>
    %79 = vector.multi_reduction <add>, %78, %cst_24 [2] : vector<1x8x8xf32> to vector<1x8xf32>
    %80 = vector.shape_cast %79 : vector<1x8xf32> to vector<1x8x1xf32>
    %81 = tpu.reciprocal %80 : vector<1x8x1xf32> -> vector<1x8x1xf32>
    %82 = vector.broadcast %81 : vector<1x8x1xf32> to vector<1x8x8xf32>
    %83 = arith.mulf %78, %82 : vector<1x8x8xf32>
    "tpu.trace_start"() <{level = 10 : i32, message = "bqk,bkd->bqd"}> : () -> ()
    %cst_25 = arith.constant dense<0.000000e+00> : vector<1x8x8xf32>
    %84 = tpu.matmul %83, %72, %cst_25 {dimension_numbers = #tpu.dot_dimension_numbers<[2], [1], [1], [2], [0, 0, 0, 1, 1, 2], [0], [0]>} : vector<1x8x8xf32>, vector<1x8x8xf32>, vector<1x8x8xf32> -> vector<1x8x8xf32>
    "tpu.trace_stop"() : () -> ()
    %85 = vector.shape_cast %84 : vector<1x8x8xf32> to vector<8x8xf32>
    %86 = vector.extract_strided_slice %28 {offsets = [0, 24], sizes = [8, 8], strides = [1, 1]} : vector<8x96xf32> to vector<8x8xf32>
    %87 = vector.shape_cast %86 : vector<8x8xf32> to vector<1x8x8xf32>
    %88 = vector.extract_strided_slice %28 {offsets = [0, 56], sizes = [8, 8], strides = [1, 1]} : vector<8x96xf32> to vector<8x8xf32>
    %89 = vector.shape_cast %88 : vector<8x8xf32> to vector<1x8x8xf32>
    %90 = vector.extract_strided_slice %28 {offsets = [0, 88], sizes = [8, 8], strides = [1, 1]} : vector<8x96xf32> to vector<8x8xf32>
    %91 = vector.shape_cast %90 : vector<8x8xf32> to vector<1x8x8xf32>
    "tpu.trace_start"() <{level = 10 : i32, message = "bqd,bkd->bqk"}> : () -> ()
    %cst_26 = arith.constant dense<0.000000e+00> : vector<1x8x8xf32>
    %92 = tpu.matmul %87, %89, %cst_26 {dimension_numbers = #tpu.dot_dimension_numbers<[2], [2], [1], [1], [0, 0, 0, 1, 1, 1], [0], [0]>} : vector<1x8x8xf32>, vector<1x8x8xf32>, vector<1x8x8xf32> -> vector<1x8x8xf32>
    "tpu.trace_stop"() : () -> ()
    %cst_27 = arith.constant dense<0xFF800000> : vector<1x8xf32>
    %93 = vector.multi_reduction <maximumf>, %92, %cst_27 [2] : vector<1x8x8xf32> to vector<1x8xf32>
    %94 = vector.shape_cast %93 : vector<1x8xf32> to vector<1x8x1xf32>
    %95 = vector.broadcast %94 : vector<1x8x1xf32> to vector<1x8x8xf32>
    %96 = arith.subf %92, %95 : vector<1x8x8xf32>
    %97 = math.exp %96 : vector<1x8x8xf32>
    %cst_28 = arith.constant dense<0.000000e+00> : vector<1x8xf32>
    %98 = vector.multi_reduction <add>, %97, %cst_28 [2] : vector<1x8x8xf32> to vector<1x8xf32>
    %99 = vector.shape_cast %98 : vector<1x8xf32> to vector<1x8x1xf32>
    %100 = tpu.reciprocal %99 : vector<1x8x1xf32> -> vector<1x8x1xf32>
    %101 = vector.broadcast %100 : vector<1x8x1xf32> to vector<1x8x8xf32>
    %102 = arith.mulf %97, %101 : vector<1x8x8xf32>
    "tpu.trace_start"() <{level = 10 : i32, message = "bqk,bkd->bqd"}> : () -> ()
    %cst_29 = arith.constant dense<0.000000e+00> : vector<1x8x8xf32>
    %103 = tpu.matmul %102, %91, %cst_29 {dimension_numbers = #tpu.dot_dimension_numbers<[2], [1], [1], [2], [0, 0, 0, 1, 1, 2], [0], [0]>} : vector<1x8x8xf32>, vector<1x8x8xf32>, vector<1x8x8xf32> -> vector<1x8x8xf32>
    "tpu.trace_stop"() : () -> ()
    %104 = vector.shape_cast %103 : vector<1x8x8xf32> to vector<8x8xf32>
    %105 = tpu.concatenate %47, %66, %85, %104 in 1 : vector<8x8xf32>, vector<8x8xf32>, vector<8x8xf32>, vector<8x8xf32> -> vector<8x32xf32>
    %106 = arith.truncf %105 : vector<8x32xf32> to vector<8x32xbf16>
    %c0_30 = arith.constant 0 : index
    %c0_31 = arith.constant 0 : index
    %107 = vector.load %arg6[%c0_30, %c0_31] : memref<32x32xbf16, #tpu.memory_space<vmem>>, vector<32x32xbf16>
    %cst_32 = arith.constant dense<0.000000e+00> : vector<8x32xf32>
    %108 = tpu.matmul %106, %107, %cst_32 {dimension_numbers = #tpu.dot_dimension_numbers<[1], [0], [0], [1], [0, 0, 1, 1], [], []>} : vector<8x32xbf16>, vector<32x32xbf16>, vector<8x32xf32> -> vector<8x32xf32>
    %c0_33 = arith.constant 0 : index
    %c0_34 = arith.constant 0 : index
    %109 = vector.load %arg7[%c0_33, %c0_34] : memref<1x32xf32, #tpu.memory_space<vmem>>, vector<1x32xf32>
    %110 = vector.broadcast %109 : vector<1x32xf32> to vector<8x32xf32>
    %111 = arith.addf %108, %110 : vector<8x32xf32>
    %112 = arith.addf %22, %111 : vector<8x32xf32>
    %c0_35 = arith.constant 0 : index
    %c0_36 = arith.constant 0 : index
    %113 = vector.load %arg8[%c0_35, %c0_36] : memref<1x32xf32, #tpu.memory_space<vmem>>, vector<1x32xf32>
    %c0_37 = arith.constant 0 : index
    %c0_38 = arith.constant 0 : index
    %114 = vector.load %arg9[%c0_37, %c0_38] : memref<1x32xf32, #tpu.memory_space<vmem>>, vector<1x32xf32>
    %cst_39 = arith.constant dense<0.000000e+00> : vector<8xf32>
    %115 = vector.multi_reduction <add>, %112, %cst_39 [1] : vector<8x32xf32> to vector<8xf32>
    %116 = vector.shape_cast %115 : vector<8xf32> to vector<8x1xf32>
    %cst_40 = arith.constant 3.200000e+01 : f32
    %117 = vector.broadcast %cst_40 : f32 to vector<8x1xf32>
    %118 = arith.divf %116, %117 : vector<8x1xf32>
    %119 = vector.broadcast %118 : vector<8x1xf32> to vector<8x32xf32>
    %120 = arith.subf %112, %119 : vector<8x32xf32>
    %121 = arith.mulf %120, %120 : vector<8x32xf32>
    %cst_41 = arith.constant dense<0.000000e+00> : vector<8xf32>
    %122 = vector.multi_reduction <add>, %121, %cst_41 [1] : vector<8x32xf32> to vector<8xf32>
    %123 = vector.shape_cast %122 : vector<8xf32> to vector<8x1xf32>
    %cst_42 = arith.constant 3.200000e+01 : f32
    %124 = vector.broadcast %cst_42 : f32 to vector<8x1xf32>
    %125 = arith.divf %123, %124 : vector<8x1xf32>
    %cst_43 = arith.constant 9.99999974E-6 : f32
    %126 = vector.broadcast %cst_43 : f32 to vector<8x1xf32>
    %127 = arith.addf %125, %126 : vector<8x1xf32>
    %128 = math.rsqrt %127 : vector<8x1xf32>
    %129 = vector.broadcast %128 : vector<8x1xf32> to vector<8x32xf32>
    %130 = arith.mulf %120, %129 : vector<8x32xf32>
    %131 = vector.broadcast %113 : vector<1x32xf32> to vector<8x32xf32>
    %132 = arith.mulf %130, %131 : vector<8x32xf32>
    %133 = vector.broadcast %114 : vector<1x32xf32> to vector<8x32xf32>
    %134 = arith.addf %132, %133 : vector<8x32xf32>
    %c0_44 = arith.constant 0 : index
    %c0_45 = arith.constant 0 : index
    %135 = vector.load %arg10[%c0_44, %c0_45] : memref<8x32xf32, #tpu.memory_space<vmem>>, vector<8x32xf32>
    tpu.vector_store %arg10[%c0_44, %c0_45], %134 {strides = array<i32>} : memref<8x32xf32, #tpu.memory_space<vmem>>, vector<8x32xf32>,
    return
  }
  func.func @transform_0(%arg0: i32) -> (i32, i32) {
    %c0_i32 = arith.constant 0 : i32
    %c0_i32_0 = arith.constant 0 : i32
    return %arg0, %c0_i32 : i32, i32
  }
  func.func @transform_1(%arg0: i32) -> (i32, i32) {
    %c0_i32 = arith.constant 0 : i32
    %c0_i32_0 = arith.constant 0 : i32
    %c0_i32_1 = arith.constant 0 : i32
    return %c0_i32, %c0_i32_0 : i32, i32
  }
  func.func @transform_2(%arg0: i32) -> (i32, i32) {
    %c0_i32 = arith.constant 0 : i32
    %c0_i32_0 = arith.constant 0 : i32
    %c0_i32_1 = arith.constant 0 : i32
    return %c0_i32, %c0_i32_0 : i32, i32
  }
  func.func @transform_3(%arg0: i32) -> (i32, i32) {
    %c0_i32 = arith.constant 0 : i32
    %c0_i32_0 = arith.constant 0 : i32
    %c0_i32_1 = arith.constant 0 : i32
    return %c0_i32, %c0_i32_0 : i32, i32
  }
  func.func @transform_4(%arg0: i32) -> (i32, i32) {
    %c0_i32 = arith.constant 0 : i32
    %c0_i32_0 = arith.constant 0 : i32
    %c0_i32_1 = arith.constant 0 : i32
    return %c0_i32, %c0_i32_0 : i32, i32
  }
  func.func @transform_5(%arg0: i32) -> (i32, i32) {
    %c0_i32 = arith.constant 0 : i32
    %c0_i32_0 = arith.constant 0 : i32
    %c0_i32_1 = arith.constant 0 : i32
    return %c0_i32, %c0_i32_0 : i32, i32
  }
  func.func @transform_6(%arg0: i32) -> (i32, i32) {
    %c0_i32 = arith.constant 0 : i32
    %c0_i32_0 = arith.constant 0 : i32
    %c0_i32_1 = arith.constant 0 : i32
    return %c0_i32, %c0_i32_0 : i32, i32
  }
  func.func @transform_7(%arg0: i32) -> (i32, i32) {
    %c0_i32 = arith.constant 0 : i32
    %c0_i32_0 = arith.constant 0 : i32
    %c0_i32_1 = arith.constant 0 : i32
    return %c0_i32, %c0_i32_0 : i32, i32
  }
  func.func @transform_8(%arg0: i32) -> (i32, i32) {
    %c0_i32 = arith.constant 0 : i32
    %c0_i32_0 = arith.constant 0 : i32
    %c0_i32_1 = arith.constant 0 : i32
    return %c0_i32, %c0_i32_0 : i32, i32
  }
  func.func @transform_9(%arg0: i32) -> (i32, i32) {
    %c0_i32 = arith.constant 0 : i32
    %c0_i32_0 = arith.constant 0 : i32
    return %arg0, %c0_i32 : i32, i32
  }
}

</mosaic_0001>

<bundles_post_ra>
// kernel: tpu_custom_call.1
= control target key start
LH: loop header
LB: loop body
LE: loop exit
PB: predicated region body
PF: predicated region fallthrough
CT: control target
= control target key end

     0   :  { %14 = vsyncpa [#allocation3], 0  ;;  %s2804_s0 = inlined_call_operand.hbm [shape: f32[16,32], index: 0, kind: input, shape index: {}]   ;;  %s2805_s1 = inlined_call_operand.vmem [shape: f32[1,32], index: 1, kind: input, shape index: {}]   ;;  %s2806_s2 = inlined_call_operand.vmem [shape: f32[1,32], index: 2, kind: input, shape index: {}]   ;;  %s2807_s3 = inlined_call_operand.hbm [shape: bf16[32,96], index: 3, kind: input, shape index: {}]   ;;  %s2808_s4 = inlined_call_operand.hbm [shape: f32[1,96], index: 4, kind: input, shape index: {}]   ;;  %s2809_s5 = inlined_call_operand.vmem [shape: bf16[32,32], index: 5, kind: input, shape index: {}]   ;;  %s2810_s6 = inlined_call_operand.vmem [shape: f32[1,32], index: 6, kind: input, shape index: {}]   ;;  %s2811_s7 = inlined_call_operand.vmem [shape: f32[1,32], index: 7, kind: input, shape index: {}]   ;;  %s2812_s8 = inlined_call_operand.vmem [shape: f32[1,32], index: 8, kind: input, shape index: {}]   ;;  %s2813_s9 = inlined_call_operand.hbm [shape: f32[16,32], index: 9, kind: output, shape index: {}]  }
   0x1   :  { %16 = vsyncpa [#allocation3 + $0x1], 0 }
   0x2   :  { %17 = vsyncpa [#allocation6], 0 }
   0x3   :  { %18 = vsyncpa [#allocation4], 0 }
   0x4   :  { %20 = vsyncpa [#allocation4 + $0x1], 0  ;;  %s2369_s30 = smov 0   ;;  %s2371_s10 = smov 0  }
   0x5   :  { %s2373_s11 = smov 0   ;;  %s2375_s12 = smov 0  }
   0x6 LB: > { %s2390_s13 = sadd.s32 4294967295, %s2299_s12   ;;  %s1912_s14 = sadd.s32 4294967294, %s2299_s12   ;;  %s2299_s12 = sphi %s2375_s12, %s2836_s12   ;;  %s2295_s11 = sphi %s2373_s11, %s2835_s11   ;;  %s2291_s10 = sphi %s2371_s10, %s2834_s10   ;;  %s2287_s30 = sphi %s2369_s30, %s2833_s30  }
   0x7   : > { %p46_p0 = scmp.ne.s32.totalorder %s2291_s10, %s2287_s30  ;;  %p2814_p1 = scmp.eq.s32.totalorder %s2390_s13, 0 }
   0x8   : > { %p244_p3 = scmp.eq.s32.totalorder %s1912_s14, 1  ;;  %p1913_p5 = scmp.ge.s32.totalorder %s2299_s12, 1 }
   0x9   : > { %p2399_p4 = por %p2814_p1, %p46_p0  ;;  %p251_p7 = scmp.lt.s32.totalorder %s2299_s12, 3 }
   0xa   : > { %p2404_p6 = por %p244_p3, %p46_p0  ;;  %s2301_s18 = smov [#allocation5]  }
   0xb   : > { %s2818_s15 = scalar_select %p2399_p4, 1, 0 }
   0xc   : > { %s2819_s16 = scalar_select %p2404_p6, 1, 0 }
   0xd   : > { %p2409_p8 = pnand %p1913_p5, %p251_p7  ;;  %s269_s19 = sshll.u32 %s2301_s18, 4  ;;  %s2413_s19 = int_to_ptr.vmem [resolvable:$true] %s269_s19 }
   0xe   : > { %2820 = sst [smem:[#allocation12_spill]] %s2819_s16  ;;  %s2302_s21 = smov [#allocation7]  }
   0xf   : > { %p2050_p9 = pneg %p2409_p8  ;;  %s283_s22 = sshll.u32 %s2302_s21, 4  ;;  %s2424_s22 = int_to_ptr.vmem [resolvable:$true] %s283_s22 }
  0x10   : > { %s2143_s25 = scalar_lea.hbm %s2807_s3, 256 }
  0x11   : > { %p2420_p11 = pnand %p2050_p9, %p2814_p1  ;;  %p2144_p12 = scmp.ne.s32.totalorder %s2807_s3, %s2143_s25 }
  0x12   : > { %p2150_p5 = scmp.lt.u32.totalorder %s2143_s25, %s2807_s3 }
  0x13   : > { %p2145_p13 = pneg %p2420_p11 }
  0x15   : > { %p2146_p0 = pnand %p2145_p13, %p2144_p12 }
  0x17   : > { %p2147_p3 = pneg %p2146_p0 }
  0x19   : > { %p2152_p7 = pnand %p2150_p5, %p2147_p3 }
  0x1b   : > { %2155 = shalt.err (!%p2152_p7)
}
  0x1c   : > { %s2156_s14 = scalar_lea.vmem %s2413_s19, 256  ;;  %p2164_p2 = scmp.lt.s32.totalorder %s2413_s19, %s2413_s19 }
  0x1d   : > { %p2157_p9 = scmp.ne.s32.totalorder %s2413_s19, %s2156_s14  ;;  %p2165_p12 = scmp.lt.s32.totalorder %s2156_s14, %s2156_s14 }
  0x1f   : > { %p2159_p10 = pnand %p2157_p9, %p2145_p13  ;;  %p2166_p0 = por %p2165_p12, %p2164_p2 }
  0x21   : > { %p2160_p1 = pneg %p2159_p10 }
  0x23   : > { %p2167_p6 = pnand %p2166_p0, %p2160_p1 }
  0x25   : > { %2170 = shalt.err (!%p2167_p6)
}
  0x26   : > { %s2303_s18 = smov 64   ;;  %s2304_s21 = smov 4  }
  0x27   : > { %2053 = dma.hbm_to_vmem [thread:$0]  (!%p2420_p11), %s2807_s3, 256, %s2413_s19, [#allocation6], %s2303_s18, %s2303_s18, %s2304_s21  }
  0x28   : > { %s2171_s27 = scalar_lea.hbm %s2808_s4, 16 }
  0x29   : > { %p2172_p2 = scmp.ne.s32.totalorder %s2808_s4, %s2171_s27  ;;  %p2178_p10 = scmp.lt.u32.totalorder %s2171_s27, %s2808_s4 }
  0x2b   : > { %p2174_p1 = pnand %p2172_p2, %p2145_p13 }
  0x2d   : > { %p2175_p6 = pneg %p2174_p1 }
  0x2f   : > { %p2180_p3 = pnand %p2178_p10, %p2175_p6 }
  0x31   : > { %2183 = shalt.err (!%p2180_p3)
}
  0x32   : > { %s2184_s19 = scalar_lea.vmem %s2424_s22, 16  ;;  %s2191_s18 = scalar_lea.vmem %s2424_s22, 32 }
  0x33   : > { %p2185_p5 = scmp.ne.s32.totalorder %s2424_s22, %s2184_s19  ;;  %p2192_p12 = scmp.lt.s32.totalorder %s2424_s22, %s2424_s22 }
  0x34   : > { %p2193_p0 = scmp.lt.s32.totalorder %s2191_s18, %s2184_s19 }
  0x35   : > { %p2187_p7 = pnand %p2185_p5, %p2145_p13 }
  0x36   : > { %p2194_p2 = por %p2193_p0, %p2192_p12 }
  0x37   : > { %p2188_p9 = pneg %p2187_p7 }
  0x39   : > { %p2195_p1 = pnand %p2194_p2, %p2188_p9 }
  0x3b   : > { %2198 = shalt.err (!%p2195_p1)
}
  0x3c   : > { %2056 = dma.hbm_to_vmem [thread:$0]  (!%p2420_p11), %s2808_s4, 16, %s2424_s22, [#allocation6]  }
  0x3d   : > { %s2480_s23 = sadd.s32 1, %s2299_s12   ;;  %s33_s20 = sadd.s32 1, %s2295_s11 }
  0x3e   : > { %s30_s24 = ssub.s32 %s2299_s12, %s2480_s23  ;;  %p40_p13 = scmp.ne.s32.totalorder %s2295_s11, %s2291_s10 }
  0x3f   : > { %p31_p6 = scmp.eq.s32.totalorder %s30_s24, 0  ;;  %p41_p10 = scmp.eq.s32.totalorder %s2299_s12, 0 }
  0x40   : > { %p2823_p3 = scmp.eq.s32.totalorder %s2390_s13, 1  ;;  %p2067_p7 = scmp.lt.s32.totalorder %s2299_s12, 2 }
  0x41   : > { %s2496_s26 = scalar_select %p31_p6, %s2295_s11, %s33_s20  }
  0x42   : > { %p2490_p5 = por %p2823_p3, %p40_p13  ;;  %p42_p9 = por %p41_p10, %p40_p13 }
  0x43   : > { %s306_s27 = sand.u32 1, %s2295_s11   ;;  %s1918_s22 = sshll.u32 %s2299_s12, 7 }
  0x44   : > { %s2824_s25 = scalar_select %p2490_p5, 1, 0 }
  0x45   : > { %s1917_s28 = sshll.u32 %s306_s27, 3  ;;  %s2503_s19 = scalar_lea.hbm %s2804_s0, %s1918_s22 }
  0x46   : > { %s310_s18 = scalar_lea.vmem [#allocation2], %s1917_s28  ;;  %p2507_p11 = pnand %p2067_p7, %p42_p9 }
  0x47   : > { %s317_s16 = sshll.u32 %s310_s18, 4  ;;  %s307_s20 = scalar_lea.sflag [#allocation3], %s306_s27  ;;  %s2505_s16 = int_to_ptr.vmem [resolvable:$true] %s317_s16 }
  0x48   : > { %s2199_s24 = scalar_lea.hbm %s2503_s19, 128  ;;  %p2201_p0 = pneg %p2507_p11 }
  0x49   : > { %p2200_p12 = scmp.ne.s32.totalorder %s2503_s19, %s2199_s24  ;;  %s2204_s29 = scalar_lea.hbm %s2804_s0, 256 }
  0x4a   : > { %p2205_p13 = scmp.lt.u32.totalorder %s2503_s19, %s2804_s0  ;;  %p2206_p6 = scmp.lt.u32.totalorder %s2204_s29, %s2199_s24 }
  0x4b   : > { %p2202_p2 = pnand %p2201_p0, %p2200_p12  ;;  %p2208_p3 = scmp.lt.u32.totalorder %s2199_s24, %s2503_s19 }
  0x4c   : > { %p2207_p10 = por %p2206_p6, %p2205_p13 }
  0x4d   : > { %p2203_p1 = pneg %p2202_p2 }
  0x4e   : > { %p2209_p7 = por %p2208_p3, %p2207_p10 }
  0x50   : > { %p2210_p9 = pnand %p2209_p7, %p2203_p1 }
  0x52   : > { %2213 = shalt.err (!%p2210_p9)
}
  0x53   : > { %s2214_s27 = scalar_lea.vmem %s2505_s16, 128  ;;  %s2305_s22 = smov [#allocation2]  }
  0x54   : > { %p2215_p12 = scmp.ne.s32.totalorder %s2505_s16, %s2214_s27  ;;  %s2219_s28 = sshll.u32 %s2305_s22, 4  ;;  %s2220_s28 = int_to_ptr.vmem [resolvable:$false] %s2219_s28 }
  0x55   : > { %s2221_s14 = scalar_lea.vmem %s2220_s28, 256  ;;  %p2222_p4 = scmp.lt.s32.totalorder %s2505_s16, %s2220_s28 }
  0x56   : > { %p2217_p2 = pnand %p2215_p12, %p2201_p0  ;;  %p2223_p13 = scmp.lt.s32.totalorder %s2221_s14, %s2214_s27 }
  0x58   : > { %p2218_p5 = pneg %p2217_p2  ;;  %p2224_p6 = por %p2223_p13, %p2222_p4 }
  0x5a   : > { %p2225_p10 = pnand %p2224_p6, %p2218_p5 }
  0x5c   : > { %2228 = shalt.err (!%p2225_p10)
}
  0x5d   : > { %2060 = dma.hbm_to_vmem [thread:$0]  (!%p2507_p11), %s2503_s19, 128, %s2505_s16, %s307_s20  }
  0x5e   : > { %326 = sbr.rel (%p2409_p8) target bundleno = 2338 (0x922), region = 56  ;;  %s2539_s24 = sand.u32 (!%p2409_p8), 1, %s2291_s10  }
  0x5f   : > { %s1920_s29 = sshll.u32 (!%p2409_p8), %s2539_s24, 3  ;;  %s329_s18 = scalar_lea.sflag (!%p2409_p8), [#allocation3], %s2539_s24 }
  0x60   : > { %s332_s27 = scalar_lea.vmem (!%p2409_p8), [#allocation2], %s1920_s29  ;;  %p2826_p4 = scmp.ne.s32.totalorder (!%p2409_p8), %s2818_s15, 0 }
  0x65   : > { %2274 = dma.done.wait (%p2826_p4), %s329_s18, 128  }
  0x66   : > { %2276 = vsyncadd (%p2826_p4), %s329_s18, 4294967168  ;;  %p2827_p5 = scmp.eq.s32.totalorder %s2390_s13, 0 }
  0x68   : > { %2278 = dma.done.wait (%p2827_p5), [#allocation6], 272   ;;  %p2828_p8 = pmov %p2827_p5 }
  0x69   : > { %vm379_vm0 = vcmask 261120   ;;  %v376_v0 = vld [vmem:[%s332_s27] sm:$0xff]  ;;  %v2119_v7 = vld [vmem:[#allocation5] sm:$0xff]   ;;  %v2306_v8 = vmov 0.0   ;;  %v2120_v9 = vld [vmem:[#allocation5 + $0x8] sm:$0xff]   ;;  %vm2307_vm1 = vmmov 0   ;;  %v490_v31 = vlaneseq }
  0x6a   : > { %2280 = vsyncadd (%p2828_p8), [#allocation6], 4294967024  ;;  %v380_v1 = vsel %vm379_vm0, %v376_v0, 0.0  ;;  %1982 = vmatprep.subr.bf16.mxu0 %v2306_v8  ;;  %1995 = vmatprep.subr.mxu1 %v2306_v8  ;;  %v1924_v14 = vld [vmem:[%s2805_s1] ss:$0 sm:$0xff]  ;;  %s2308_s21 = smov 104  }
  0x6b   : > { %381 = vadd.xlane.f32.xlu0 %v380_v1  ;;  %1983 = vmatpush3.bf16.msra.mxu0 %v2119_v7  ;;  %v1925_v16 = vld [vmem:[%s2806_s2] ss:$0 sm:$0xff]  ;;  %s2309_s20 = smov 120   ;;  %s2310_s22 = smov 112   ;;  %v2312_v29 = vmov 1983009808  }
  0x6c   : > { %1986 = vmatprep.mubr.msk.bf16.mxu0 %vm2307_vm1, %v2306_v8  ;;  %1984 = vmatprep.subr.bf16.mxu0 %v2306_v8  ;;  %v1926_v20 = vld [vmem:[#allocation7] ss:$0 sm:$0xff]  ;;  %s2311_s28 = smov 96   ;;  %v488_v30 = vunpack.c.l.s4 %v2312_v29  ;;  %v491_v33 = vshrl.u32 %v490_v31, 7  ;;  %v2313_v34 = vmov 1934713408  }
  0x6d   : > { %1997 = vmatprep.mubr.msk.f32.mxu1 %vm2307_vm1, %v2306_v8  ;;  %v520_v35 = vunpack.c.l.s4 %v2313_v34  ;;  %vm917_vm2 = vcmask 64512   ;;  %s2314_s14 = smov 64   ;;  %s2315_s19 = smov 16   ;;  %vm1707_vm3 = vcmask 130048   ;;  %vm1709_vm4 = vcmask 195584  }
  0x6e   : > { %v489_v32 = vunpack.c.0.s8 %v488_v30  ;;  %s2316_s16 = smov 8   ;;  %s1957_s15 = sshll.u32 %s2390_s13, 7 }
  0x6f   : > { %1985 = vmatpush3.bf16.msra.mxu0 %v2120_v9  ;;  %v521_v42 = vunpack.c.0.s8 %v520_v35  ;;  %s374_s17 = scalar_lea.vmem [#allocation8], %s1920_s29  ;;  %p2829_p0 = scmp.ne.s32.totalorder %s2824_s25, 0 }
  0x70   : > { %1990 = vmatprep.subr.mxu0 %v2306_v8  ;;  %v2595_v39 = vsub.s32 %v489_v32, %v491_v33  ;;  %s2318_s13 = smov [#allocation8]  }
  0x71   : > { %v2605_v48 = vsub.s32 %v521_v42, %v491_v33  ;;  %s2233_s29 = sshll.u32 %s2318_s13, 4  ;;  %s2234_s29 = int_to_ptr.vmem [resolvable:$false] %s2233_s29 }
  0xf8   : > { %v382_v2 = vpop.xlane.xlu0 %381 }
  0xf9   : > { %v384_v3 = vmul.f32 0.03125, %v382_v2 }
  0xfb   : > { %v385_v4 = vsub.f32 %v376_v0, %v384_v3 }
  0xfd   : > { %v386_v5 = vmul.f32 %v385_v4, %v385_v4 }
  0xff   : > { %v387_v6 = vsel %vm379_vm0, %v386_v5, 0.0 }
 0x100   : > { %388 = vadd.xlane.f32.xlu0 %v387_v6 }
 0x18d   : > { %v389_v10 = vpop.xlane.xlu0 %388 }
 0x18e   : > { %v390_v11 = vmul.f32 0.03125, %v389_v10 }
 0x190   : > { %v391_v12 = vadd.f32 1e-05, %v390_v11 }
 0x192   : > { %2123 = vrsqrt.f32 %v391_v12 }
 0x19c   : > { %v2124_v13 = vpop.eup %2123 }
 0x19d   : > { %v393_v15 = vmul.f32 %v2124_v13, %v385_v4 }
 0x19f   : > { %v400_v17 = vmul.f32 %v1924_v14, %v393_v15 }
 0x1a1   : > { %v2569_v18 = vadd.f32 %v1925_v16, %v400_v17 }
 0x1a3   : > { %v408_v19 = vpack.c.bf16 %v2569_v18, %v2569_v18 }
 0x1a5   : > { %1987 = vmatmul.mubr.msk.bf16.vlgmr.msra.gmra.mrb[0].mxu0 %vm379_vm0, %v408_v19 }
 0x1a6   : > { %1992 = vmatprep.mubr.msk.f32.mxu0 %vm2307_vm1, %v2306_v8 }
 0x278   : > { %v469_v21 = vpop.f32.mrb[0].mxu0 }
 0x279   : > { %v2576_v22 = vadd.f32 %v1926_v20, %v469_v21  ;;  %v1988_v23 = vpop.f32.mrb[1].mxu0 }
 0x27a   : > { %v472_v24 = vpop.f32.mrb[2].mxu0 }
 0x27b   : > { %482 = vrot.lane.b32.xlu0 %v2576_v22, %s2308_s21  ;;  %476 = vrot.lane.b32.xlu1 %v2576_v22, %s2309_s20  ;;  %v1989_v25 = vpop.f32.mrb[3].mxu0  ;;  %s2317_s21 = smov 24   ;;  %s2759_s20 = scalar_lea.hbm %s2813_s9, %s1957_s15 }
 0x27f   : > { %479 = vrot.lane.b32.xlu1 %v2576_v22, %s2310_s22  ;;  %s1810_s22 = scalar_lea.sflag [#allocation4], %s2539_s24 }
 0x283   : > { %621 = vrot.lane.b32.xlu1 %v2576_v22, %s2311_s28 }
 0x2ed   : > { %v2582_v26 = vpop.permute.xlu1 %476  ;;  %v2588_v28 = vpop.permute.xlu0 %482 }
 0x2ee   : > { %623 = vrot.lane.b32.xlu1 %v2582_v26, %s2311_s28  ;;  %v501_v40 = vcombine.low %v2582_v26, %v2588_v28  ;;  %v502_v41 = vcombine.high %v2582_v26, %v2588_v28 }
 0x2f0   : > { %v509_v46 = vrot.slane %v501_v40, %v2595_v39  ;;  %v516_v47 = vrot.slane %v502_v41, %v2595_v39 }
 0x2f1   : > { %v2585_v27 = vpop.permute.xlu1 %479 }
 0x2f2   : > { %625 = vrot.lane.b32.xlu1 %v2585_v27, %s2311_s28  ;;  %v485_v36 = vcombine.low %v2576_v22, %v2585_v27  ;;  %v486_v37 = vcombine.high %v2576_v22, %v2585_v27 }
 0x2f4   : > { %v493_v43 = vrot.slane %v485_v36, %v2595_v39  ;;  %v500_v44 = vrot.slane %v486_v37, %v2595_v39 }
 0x2f5   : > { %v622_v38 = vpop.permute.xlu1 %621 }
 0x2f6   : > { %627 = vrot.lane.b32.xlu1 %v2588_v28, %s2311_s28  ;;  %v517_v49 = vcombine.low %v493_v43, %v509_v46  ;;  %v518_v50 = vcombine.high %v493_v43, %v509_v46  ;;  %v533_v51 = vcombine.low %v500_v44, %v516_v47  ;;  %v534_v52 = vcombine.high %v500_v44, %v516_v47 }
 0x2f8   : > { %v525_v56 = vrot.slane %v517_v49, %v2605_v48  ;;  %v532_v57 = vrot.slane %v518_v50, %v2605_v48  ;;  %v541_v58 = vrot.slane %v533_v51, %v2605_v48  ;;  %v548_v59 = vrot.slane %v534_v52, %v2605_v48 }
 0x2fa   : > { %v553_v3 = vcombine.low %v525_v56, %v532_v57  ;;  %v1930_v4 = vcombine.high %v525_v56, %v532_v57  ;;  %v569_v5 = vcombine.low %v541_v58, %v548_v59  ;;  %v1931_v6 = vcombine.high %v541_v58, %v548_v59 }
 0x2fc   : > { %v560_v16 = vrot.slane %v553_v3, %v2595_v39  ;;  %v568_v17 = vrot.slane %v1930_v4, %v2595_v39  ;;  %v576_v19 = vrot.slane %v569_v5, %v2595_v39  ;;  %v584_v20 = vrot.slane %v1931_v6, %v2595_v39 }
 0x2fe   : > { %v585_v33 = vcombine.low %v560_v16, %v568_v17  ;;  %v601_v34 = vcombine.low %v576_v19, %v584_v20  ;;  %v586_v42 = vcombine.high %v560_v16, %v568_v17 }
 0x300   : > { %v593_v43 = vrot.slane %v585_v33, %v2605_v48  ;;  %v609_v44 = vrot.slane %v601_v34, %v2605_v48  ;;  %v600_v51 = vrot.slane %v586_v42, %v2605_v48 }
 0x302   : > { %v617_v52 = vcombine.low %v593_v43, %v609_v44 }
 0x360   : > { %v624_v45 = vpop.permute.xlu1 %623 }
 0x364   : > { %v626_v53 = vpop.permute.xlu1 %625 }
 0x365   : > { %v633_v54 = vcombine.low %v622_v38, %v626_v53  ;;  %v634_v55 = vcombine.high %v622_v38, %v626_v53  ;;  %v618_v53 = vcombine.high %v593_v43, %v609_v44 }
 0x367   : > { %v641_v63 = vrot.slane %v633_v54, %v2595_v39  ;;  %v648_v0 = vrot.slane %v634_v55, %v2595_v39 }
 0x368   : > { %v628_v60 = vpop.permute.xlu1 %627 }
 0x369   : > { %v649_v61 = vcombine.low %v624_v45, %v628_v60  ;;  %v650_v62 = vcombine.high %v624_v45, %v628_v60  ;;  %v602_v45 = vcombine.high %v576_v19, %v584_v20 }
 0x36b   : > { %v657_v1 = vrot.slane %v649_v61, %v2595_v39  ;;  %v664_v2 = vrot.slane %v650_v62, %v2595_v39  ;;  %v616_v54 = vrot.slane %v602_v45, %v2605_v48 }
 0x36d   : > { %v665_v7 = vcombine.low %v641_v63, %v657_v1  ;;  %v666_v9 = vcombine.high %v641_v63, %v657_v1  ;;  %v681_v10 = vcombine.low %v648_v0, %v664_v2  ;;  %v682_v11 = vcombine.high %v648_v0, %v664_v2 }
 0x36e   : > { %v619_v57 = vcombine.low %v600_v51, %v616_v54  ;;  %v620_v58 = vcombine.high %v600_v51, %v616_v54 }
 0x36f   : > { %v673_v12 = vrot.slane %v665_v7, %v2605_v48  ;;  %v680_v13 = vrot.slane %v666_v9, %v2605_v48  ;;  %v689_v14 = vrot.slane %v681_v10, %v2605_v48  ;;  %v696_v15 = vrot.slane %v682_v11, %v2605_v48 }
 0x371   : > { %v701_v21 = vcombine.low %v673_v12, %v680_v13  ;;  %v1932_v23 = vcombine.high %v673_v12, %v680_v13  ;;  %v717_v24 = vcombine.low %v689_v14, %v696_v15  ;;  %v1933_v25 = vcombine.high %v689_v14, %v696_v15 }
 0x373   : > { %v708_v29 = vrot.slane %v701_v21, %v2595_v39  ;;  %v716_v30 = vrot.slane %v1932_v23, %v2595_v39  ;;  %v724_v31 = vrot.slane %v717_v24, %v2595_v39  ;;  %v732_v32 = vrot.slane %v1933_v25, %v2595_v39 }
 0x375   : > { %v733_v35 = vcombine.low %v708_v29, %v716_v30  ;;  %v734_v36 = vcombine.high %v708_v29, %v716_v30  ;;  %v749_v37 = vcombine.low %v724_v31, %v732_v32  ;;  %v750_v38 = vcombine.high %v724_v31, %v732_v32 }
 0x377   : > { %v741_v40 = vrot.slane %v733_v35, %v2605_v48  ;;  %v757_v41 = vrot.slane %v749_v37, %v2605_v48  ;;  %v748_v49 = vrot.slane %v734_v36, %v2605_v48  ;;  %v764_v50 = vrot.slane %v750_v38, %v2605_v48 }
 0x379   : > { %v765_v46 = vcombine.low %v741_v40, %v757_v41  ;;  %v766_v47 = vcombine.high %v741_v40, %v757_v41  ;;  %v767_v55 = vcombine.low %v748_v49, %v764_v50  ;;  %v768_v56 = vcombine.high %v748_v49, %v764_v50 }
 0x37b   : > { %1991 = vmatpush3.xpose.msk.msra.mxu0 %vm917_vm2, %v765_v46  ;;  %1996 = vmatpush3.xpose.msk.msra.mxu1 %vm917_vm2, %v766_v47 }
 0x37c   : > { %2000 = vmatprep.subr.mxu1 %v2306_v8  ;;  %2005 = vmatprep.subr.mxu0 %v2306_v8 }
 0x37e   : > { %1993 = vmatmul.mubr.msk.f32.vlgmr.msra.gmra.mrb[4].mxu0 %vm917_vm2, %v617_v52  ;;  %1998 = vmatmul.mubr.msk.f32.vlgmr.msra.gmra.mrb[0].mxu1 %vm917_vm2, %v618_v53 }
 0x37f   : > { %2001 = vmatpush3.xpose.msk.msra.mxu1 %vm917_vm2, %v767_v55  ;;  %2006 = vmatpush3.xpose.msk.msra.mxu0 %vm917_vm2, %v768_v56 }
 0x380   : > { %2002 = vmatprep.mubr.msk.f32.mxu1 %vm2307_vm1, %v2306_v8  ;;  %2007 = vmatprep.mubr.msk.f32.mxu0 %vm2307_vm1, %v2306_v8 }
 0x381   : > { %2010 = vmatprep.subr.mxu1 %v2306_v8  ;;  %2015 = vmatprep.subr.mxu0 %v2306_v8 }
 0x382   : > { %2003 = vmatmul.mubr.msk.f32.vlgmr.msra.gmra.mrb[2].mxu1 %vm917_vm2, %v619_v57  ;;  %2008 = vmatmul.mubr.msk.f32.vlgmr.msra.gmra.mrb[6].mxu0 %vm917_vm2, %v620_v58 }
 0x383   : > { %2012 = vmatprep.mubr.msk.f32.mxu1 %vm2307_vm1, %v2306_v8  ;;  %2017 = vmatprep.mubr.msk.f32.mxu0 %vm2307_vm1, %v2306_v8 }
 0x451   : > { %v990_v59 = vpop.f32.mrb[4].mxu0  ;;  %v1066_v60 = vpop.f32.mrb[0].mxu1 }
 0x452   : > { %v1994_v61 = vpop.f32.mrb[5].mxu0  ;;  %v1999_v62 = vpop.f32.mrb[1].mxu1  ;;  %v1225_v63 = vsel %vm917_vm2, %v1066_v60, -inf  ;;  %v1222_v0 = vsel %vm917_vm2, %v990_v59, -inf }
 0x453   : > { %1226 = vmax.xlane.f32.xlu0 %v1225_v63  ;;  %1223 = vmax.xlane.f32.xlu1 %v1222_v0 }
 0x455   : > { %v1142_v1 = vpop.f32.mrb[2].mxu1  ;;  %v1218_v2 = vpop.f32.mrb[6].mxu0 }
 0x456   : > { %v2004_v3 = vpop.f32.mrb[3].mxu1  ;;  %v2009_v4 = vpop.f32.mrb[7].mxu0  ;;  %v1228_v5 = vsel %vm917_vm2, %v1142_v1, -inf  ;;  %v1231_v6 = vsel %vm917_vm2, %v1218_v2, -inf }
 0x457   : > { %1229 = vmax.xlane.f32.xlu1 %v1228_v5  ;;  %1232 = vmax.xlane.f32.xlu0 %v1231_v6 }
 0x468   : > { %769 = vrot.lane.b32.xlu1 %v2576_v22, %s2314_s14 }
 0x4e0   : > { %v1227_v7 = vpop.xlane.xlu0 %1226  ;;  %v1224_v9 = vpop.xlane.xlu1 %1223 }
 0x4e1   : > { %v1235_v10 = vsub.f32 %v1066_v60, %v1227_v7  ;;  %v1234_v11 = vsub.f32 %v990_v59, %v1224_v9 }
 0x4e3   : > { %v1240_v12 = vmul.f32 1.442695, %v1235_v10  ;;  %v1238_v13 = vmul.f32 1.442695, %v1234_v11 }
 0x4e4   : > { %v1230_v14 = vpop.xlane.xlu1 %1229  ;;  %v1233_v15 = vpop.xlane.xlu0 %1232 }
 0x4e5   : > { %2125 = vpow2.f32 %v1240_v12  ;;  %v1236_v16 = vsub.f32 %v1142_v1, %v1230_v14  ;;  %v1237_v17 = vsub.f32 %v1218_v2, %v1233_v15 }
 0x4e6   : > { %2127 = vpow2.f32 %v1238_v13 }
 0x4e7   : > { %v1242_v19 = vmul.f32 1.442695, %v1236_v16  ;;  %v1244_v20 = vmul.f32 1.442695, %v1237_v17 }
 0x4e8   : > { %v770_v32 = vpop.permute.xlu1 %769 }
 0x4e9   : > { %2129 = vpow2.f32 %v1242_v19 }
 0x4ea   : > { %2131 = vpow2.f32 %v1244_v20 }
 0x4ef   : > { %v2661_v21 = vpop.eup %2125 }
 0x4f0   : > { %v2663_v23 = vpop.eup %2127  ;;  %v1249_v22 = vsel %vm917_vm2, %v2661_v21, 0.0 }
 0x4f1   : > { %v1246_v24 = vsel %vm917_vm2, %v2663_v23, 0.0  ;;  %1250 = vadd.xlane.f32.xlu0 %v1249_v22 }
 0x4f2   : > { %1247 = vadd.xlane.f32.xlu1 %v1246_v24 }
 0x4f3   : > { %v2669_v25 = vpop.eup %2129 }
 0x4f4   : > { %v2671_v29 = vpop.eup %2131  ;;  %v1252_v30 = vsel %vm917_vm2, %v2669_v25, 0.0 }
 0x4f5   : > { %v1255_v31 = vsel %vm917_vm2, %v2671_v29, 0.0 }
 0x4f6   : > { %1253 = vadd.xlane.f32.xlu1 %v1252_v30  ;;  %1256 = vadd.xlane.f32.xlu0 %v1255_v31 }
 0x507   : > { %773 = vrot.lane.b32.xlu1 %v2585_v27, %s2314_s14 }
 0x50b   : > { %775 = vrot.lane.b32.xlu1 %v2588_v28, %s2314_s14 }
 0x50c   : > { %771 = vrot.lane.b32.xlu0 %v2582_v26, %s2314_s14  ;;  %s2235_s14 = scalar_lea.vmem %s2234_s29, 256 }
 0x57e   : > { %v1251_v34 = vpop.xlane.xlu0 %1250 }
 0x57f   : > { %v1248_v33 = vpop.xlane.xlu1 %1247  ;;  %2133 = vrcp.f32 %v1251_v34 }
 0x580   : > { %2135 = vrcp.f32 %v1248_v33 }
 0x583   : > { %v1254_v35 = vpop.xlane.xlu1 %1253  ;;  %v1257_v36 = vpop.xlane.xlu0 %1256 }
 0x584   : > { %2137 = vrcp.f32 %v1254_v35 }
 0x585   : > { %2139 = vrcp.f32 %v1257_v36 }
 0x587   : > { %v774_v37 = vpop.permute.xlu1 %773  ;;  %v772_v41 = vpop.permute.xlu0 %771 }
 0x588   : > { %v781_v38 = vcombine.low %v770_v32, %v774_v37  ;;  %v782_v40 = vcombine.high %v770_v32, %v774_v37 }
 0x589   : > { %v2134_v3 = vpop.eup %2133 }
 0x58a   : > { %v789_v27 = vrot.slane %v781_v38, %v2595_v39  ;;  %v796_v45 = vrot.slane %v782_v40, %v2595_v39  ;;  %v2136_v5 = vpop.eup %2135  ;;  %v1263_v14 = vmul.f32 %v2134_v3, %v2661_v21 }
 0x58b   : > { %v776_v42 = vpop.permute.xlu1 %775  ;;  %v1262_v13 = vmul.f32 %v2136_v5, %v2663_v23 }
 0x58c   : > { %v797_v43 = vcombine.low %v772_v41, %v776_v42  ;;  %v798_v44 = vcombine.high %v772_v41, %v776_v42 }
 0x58e   : > { %v805_v28 = vrot.slane %v797_v43, %v2595_v39  ;;  %v812_v26 = vrot.slane %v798_v44, %v2595_v39  ;;  %v2138_v12 = vpop.eup %2137 }
 0x58f   : > { %v2140_v15 = vpop.eup %2139  ;;  %v1264_v19 = vmul.f32 %v2138_v12, %v2669_v25 }
 0x590   : > { %v813_v46 = vcombine.low %v789_v27, %v805_v28  ;;  %v814_v47 = vcombine.high %v789_v27, %v805_v28  ;;  %v829_v49 = vcombine.low %v796_v45, %v812_v26  ;;  %v830_v50 = vcombine.high %v796_v45, %v812_v26  ;;  %v2121_v27 = vld [vmem:[%s2809_s5] sm:$0xff]  }
 0x591   : > { %v1265_v20 = vmul.f32 %v2140_v15, %v2671_v29 }
 0x592   : > { %v821_v51 = vrot.slane %v813_v46, %v2605_v48  ;;  %v828_v52 = vrot.slane %v814_v47, %v2605_v48  ;;  %v837_v53 = vrot.slane %v829_v49, %v2605_v48  ;;  %v844_v54 = vrot.slane %v830_v50, %v2605_v48 }
 0x594   : > { %v849_v55 = vcombine.low %v821_v51, %v828_v52  ;;  %v1934_v56 = vcombine.high %v821_v51, %v828_v52  ;;  %v865_v57 = vcombine.low %v837_v53, %v844_v54  ;;  %v1935_v58 = vcombine.high %v837_v53, %v844_v54  ;;  %v2122_v52 = vld [vmem:[%s2809_s5 + $0x8] sm:$0xff]  }
 0x596   : > { %v856_v59 = vrot.slane %v849_v55, %v2595_v39  ;;  %v864_v60 = vrot.slane %v1934_v56, %v2595_v39  ;;  %v872_v61 = vrot.slane %v865_v57, %v2595_v39  ;;  %v880_v62 = vrot.slane %v1935_v58, %v2595_v39 }
 0x598   : > { %v881_v63 = vcombine.low %v856_v59, %v864_v60  ;;  %v882_v0 = vcombine.high %v856_v59, %v864_v60  ;;  %v897_v1 = vcombine.low %v872_v61, %v880_v62  ;;  %v898_v2 = vcombine.high %v872_v61, %v880_v62 }
 0x59a   : > { %v889_v4 = vrot.slane %v881_v63, %v2605_v48  ;;  %v905_v6 = vrot.slane %v897_v1, %v2605_v48  ;;  %v896_v7 = vrot.slane %v882_v0, %v2605_v48  ;;  %v912_v9 = vrot.slane %v898_v2, %v2605_v48 }
 0x59c   : > { %v913_v10 = vcombine.low %v889_v4, %v905_v6  ;;  %v914_v11 = vcombine.high %v889_v4, %v905_v6  ;;  %v915_v16 = vcombine.low %v896_v7, %v912_v9  ;;  %v916_v17 = vcombine.high %v896_v7, %v912_v9 }
 0x59e   : > { %2011 = vmatpush3.msra.mxu1 %v913_v10  ;;  %2016 = vmatpush3.msra.mxu0 %v914_v11  ;;  %v1950_v10 = vld [vmem:[%s2810_s6] ss:$0 sm:$0xff] }
 0x59f   : > { %2013 = vmatmul.mubr.msk.f32.vlgmr.msra.gmra.mrb[4].mxu1 %vm917_vm2, %v1262_v13  ;;  %2018 = vmatmul.mubr.msk.f32.vlgmr.msra.gmra.mrb[8].mxu0 %vm917_vm2, %v1263_v14 }
 0x5a0   : > { %2020 = vmatprep.subr.mxu1 %v2306_v8  ;;  %2025 = vmatprep.subr.mxu0 %v2306_v8 }
 0x5a1   : > { %2021 = vmatpush3.msra.mxu1 %v915_v16  ;;  %2026 = vmatpush3.msra.mxu0 %v916_v17 }
 0x5a2   : > { %2022 = vmatprep.mubr.msk.f32.mxu1 %vm2307_vm1, %v2306_v8  ;;  %2027 = vmatprep.mubr.msk.f32.mxu0 %vm2307_vm1, %v2306_v8 }
 0x5a3   : > { %2023 = vmatmul.mubr.msk.f32.vlgmr.msra.gmra.mrb[6].mxu1 %vm917_vm2, %v1264_v19  ;;  %2028 = vmatmul.mubr.msk.f32.vlgmr.msra.gmra.mrb[10].mxu0 %vm917_vm2, %v1265_v20 }
 0x5a4   : > { %2030 = vmatprep.subr.bf16.mxu1 %v2306_v8  ;;  %2034 = vmatprep.mubr.msk.bf16.mxu1 %vm2307_vm1, %v2306_v8 }
 0x5a5   : > { %2031 = vmatpush3.bf16.msra.mxu1 %v2121_v27 }
 0x5a6   : > { %2032 = vmatprep.subr.bf16.mxu1 %v2306_v8 }
 0x5a9   : > { %2033 = vmatpush3.bf16.msra.mxu1 %v2122_v52 }
 0x672   : > { %v1335_v21 = vpop.f32.mrb[4].mxu1  ;;  %v1408_v23 = vpop.f32.mrb[8].mxu0 }
 0x673   : > { %v2014_v22 = vpop.f32.mrb[5].mxu1  ;;  %v2019_v24 = vpop.f32.mrb[9].mxu0 }
 0x676   : > { %v1481_v25 = vpop.f32.mrb[6].mxu1  ;;  %v1554_v29 = vpop.f32.mrb[10].mxu0 }
 0x677   : > { %v1558_v30 = vcombine.low %v1335_v21, %v1481_v25  ;;  %v1559_v31 = vcombine.high %v1335_v21, %v1481_v25  ;;  %v1574_v32 = vcombine.low %v1408_v23, %v1554_v29  ;;  %v1575_v33 = vcombine.high %v1408_v23, %v1554_v29  ;;  %v2024_v34 = vpop.f32.mrb[7].mxu1  ;;  %v2029_v35 = vpop.f32.mrb[11].mxu0 }
 0x679   : > { %v1566_v36 = vrot.slane %v1558_v30, %v2595_v39  ;;  %v1573_v37 = vrot.slane %v1559_v31, %v2595_v39  ;;  %v1582_v38 = vrot.slane %v1574_v32, %v2595_v39  ;;  %v1589_v40 = vrot.slane %v1575_v33, %v2595_v39  ;;  %v1955_v32 = vld [vmem:[%s2812_s8] ss:$0 sm:$0xff] }
 0x67b   : > { %v1590_v41 = vcombine.low %v1566_v36, %v1582_v38  ;;  %v1591_v42 = vcombine.high %v1566_v36, %v1582_v38  ;;  %v1606_v43 = vcombine.low %v1573_v37, %v1589_v40  ;;  %v1607_v44 = vcombine.high %v1573_v37, %v1589_v40 }
 0x67d   : > { %v1598_v45 = vrot.slane %v1590_v41, %v2605_v48  ;;  %v1605_v28 = vrot.slane %v1591_v42, %v2605_v48  ;;  %v1614_v26 = vrot.slane %v1606_v43, %v2605_v48  ;;  %v1621_v46 = vrot.slane %v1607_v44, %v2605_v48 }
 0x67f   : > { %v1626_v47 = vcombine.low %v1598_v45, %v1605_v28  ;;  %v1948_v49 = vcombine.high %v1598_v45, %v1605_v28  ;;  %v1642_v50 = vcombine.low %v1614_v26, %v1621_v46  ;;  %v1949_v51 = vcombine.high %v1614_v26, %v1621_v46 }
 0x681   : > { %v1633_v53 = vrot.slane %v1626_v47, %v2595_v39  ;;  %v1641_v54 = vrot.slane %v1948_v49, %v2595_v39  ;;  %v1649_v55 = vrot.slane %v1642_v50, %v2595_v39  ;;  %v1657_v56 = vrot.slane %v1949_v51, %v2595_v39 }
 0x683   : > { %v1659_v57 = vcombine.high %v1633_v53, %v1641_v54  ;;  %v1675_v58 = vcombine.high %v1649_v55, %v1657_v56  ;;  %v1658_v8 = vcombine.low %v1633_v53, %v1641_v54  ;;  %v1674_v59 = vcombine.low %v1649_v55, %v1657_v56 }
 0x685   : > { %v1673_v60 = vrot.slane %v1659_v57, %v2605_v48  ;;  %v1689_v61 = vrot.slane %v1675_v58, %v2605_v48  ;;  %v1666_v62 = vrot.slane %v1658_v8, %v2605_v48  ;;  %v1682_v63 = vrot.slane %v1674_v59, %v2605_v48 }
 0x687   : > { %v1692_v0 = vcombine.low %v1673_v60, %v1689_v61  ;;  %v1691_v1 = vcombine.high %v1666_v62, %v1682_v63  ;;  %v1693_v2 = vcombine.high %v1673_v60, %v1689_v61  ;;  %v1690_v3 = vcombine.low %v1666_v62, %v1682_v63 }
 0x689   : > { %1699 = vrot.lane.b32.xlu1 %v1692_v0, %s2315_s19  ;;  %1695 = vrot.lane.b32.xlu0 %v1691_v1, %s2316_s16  ;;  %s1823_s19 = sshll.u32 %s374_s17, 4  ;;  %s2761_s19 = int_to_ptr.vmem [resolvable:$true] %s1823_s19 }
 0x68a   : > { %s2229_s28 = scalar_lea.vmem %s2761_s19, 128  ;;  %p2236_p7 = scmp.lt.s32.totalorder %s2761_s19, %s2234_s29 }
 0x68b   : > { %p2230_p11 = scmp.ne.s32.totalorder %s2761_s19, %s2229_s28  ;;  %p2237_p9 = scmp.lt.s32.totalorder %s2235_s14, %s2229_s28 }
 0x68d   : > { %1703 = vrot.lane.b32.xlu0 %v1693_v2, %s2317_s21  ;;  %p2231_p1 = pnand %p2230_p11, %p2829_p0  ;;  %p2238_p12 = por %p2237_p9, %p2236_p7 }
 0x68f   : > { %p2232_p3 = pneg %p2231_p1 }
 0x691   : > { %p2239_p2 = pnand %p2238_p12, %p2232_p3 }
 0x6fb   : > { %v1696_v39 = vpop.permute.xlu0 %1695  ;;  %v1700_v4 = vpop.permute.xlu1 %1699 }
 0x6fc   : > { %v1706_v5 = vsel %vm917_vm2, %v1690_v3, %v1696_v39 }
 0x6fd   : > { %v1708_v7 = vsel %vm1707_vm3, %v1706_v5, %v1700_v4 }
 0x6ff   : > { %v1704_v6 = vpop.permute.xlu0 %1703 }
 0x700   : > { %v1710_v9 = vsel %vm1709_vm4, %v1708_v7, %v1704_v6 }
 0x701   : > { %v1711_v48 = vpack.c.bf16 %v1710_v9, %v1710_v9 }
 0x703   : > { %2035 = vmatmul.mubr.msk.bf16.vlgmr.msra.gmra.mrb[8].mxu1 %vm379_vm0, %v1711_v48 }
 0x7d6   : > { %v1772_v11 = vpop.f32.mrb[8].mxu1 }
 0x7d7   : > { %v1773_v12 = vadd.f32 %v1950_v10, %v1772_v11  ;;  %v2036_v13 = vpop.f32.mrb[9].mxu1 }
 0x7d8   : > { %v1775_v14 = vpop.f32.mrb[10].mxu1 }
 0x7d9   : > { %v2037_v15 = vpop.f32.mrb[11].mxu1  ;;  %v1778_v16 = vadd.f32 %v1773_v12, %v2569_v18  ;;  %v1954_v18 = vld [vmem:[%s2811_s7] ss:$0 sm:$0xff] }
 0x7db   : > { %v1781_v17 = vsel %vm379_vm0, %v1778_v16, 0.0 }
 0x7dc   : > { %1782 = vadd.xlane.f32.xlu1 %v1781_v17 }
 0x869   : > { %v1783_v19 = vpop.xlane.xlu1 %1782 }
 0x86a   : > { %v1784_v20 = vmul.f32 0.03125, %v1783_v19 }
 0x86c   : > { %v1785_v21 = vsub.f32 %v1778_v16, %v1784_v20 }
 0x86e   : > { %v1786_v23 = vmul.f32 %v1785_v21, %v1785_v21 }
 0x870   : > { %v1787_v22 = vsel %vm379_vm0, %v1786_v23, 0.0 }
 0x871   : > { %1788 = vadd.xlane.f32.xlu0 %v1787_v22 }
 0x8fe   : > { %v1789_v24 = vpop.xlane.xlu0 %1788 }
 0x8ff   : > { %v1790_v25 = vmul.f32 0.03125, %v1789_v24 }
 0x901   : > { %v1791_v29 = vadd.f32 1e-05, %v1790_v25 }
 0x903   : > { %2141 = vrsqrt.f32 %v1791_v29 }
 0x90d   : > { %v2142_v30 = vpop.eup %2141 }
 0x90e   : > { %v1793_v31 = vmul.f32 %v2142_v30, %v1785_v21 }
 0x910   : > { %v1800_v33 = vmul.f32 %v1954_v18, %v1793_v31 }
 0x912   : > { %v1807_v34 = vadd.f32 %v1955_v32, %v1800_v33 }
 0x914   : > { %1808 = vst.msk [vmem:[%s374_s17] sm:$0xff] %vm379_vm0, %v1807_v34 }
 0x915   : > { %2242 = shalt.err (!%p2239_p2)
}
 0x916   : > { %s2243_s24 = scalar_lea.hbm %s2759_s20, 128  ;;  %s2247_s15 = scalar_lea.hbm %s2813_s9, 256 }
 0x917   : > { %p2244_p13 = scmp.ne.s32.totalorder %s2759_s20, %s2243_s24  ;;  %p2248_p4 = scmp.lt.u32.totalorder %s2759_s20, %s2813_s9 }
 0x918   : > { %p2249_p5 = scmp.lt.u32.totalorder %s2247_s15, %s2243_s24  ;;  %p2251_p11 = scmp.lt.u32.totalorder %s2243_s24, %s2759_s20 }
 0x919   : > { %p2245_p6 = pnand %p2244_p13, %p2829_p0 }
 0x91a   : > { %p2250_p8 = por %p2249_p5, %p2248_p4 }
 0x91b   : > { %p2246_p10 = pneg %p2245_p6 }
 0x91c   : > { %p2252_p1 = por %p2251_p11, %p2250_p8 }
 0x91e   : > { %p2253_p3 = pnand %p2252_p1, %p2246_p10 }
 0x920   : > { %2256 = shalt.err (!%p2253_p3)
}
 0x921   : > { %2048 = dma.vmem_to_hbm [thread:$0]  (%p2829_p0), %s2761_s19, 128, %s2759_s20, %s1810_s22  }
 0x922 PF: > { %s2830_s21 = sld [smem:[#allocation12_spill]]  ;;  %s1835_s28 = sand.u32 1, %s2287_s30  }
 0x923   : > { %p2832_p9 = scmp.ge.s32.totalorder %s2299_s12, 2  ;;  %s1836_s13 = scalar_lea.sflag [#allocation4], %s1835_s28 }
 0x928   : > { %p2831_p7 = scmp.ne.s32.totalorder %s2830_s21, 0 }
 0x92a   : > { %p2062_p12 = pnand %p2832_p9, %p2831_p7 }
 0x92c   : > { %2282 = dma.done.wait (!%p2062_p12), %s1836_s13, 128  }
 0x92d   : > { %2284 = vsyncadd (!%p2062_p12), %s1836_s13, 4294967168  ;;  %p23_p2 = scmp.ge.s32.totalorder %s2480_s23, 4   ;;  %s2833_s30 = smov %s2291_s10 }
 0x92e   : > { %s2834_s10 = smov %s2295_s11  ;;  %s2835_s11 = smov %s2496_s26 }
 0x92f   : > { %s2836_s12 = smov %s2480_s23  ;;  %25 = sbr.rel (!%p23_p2) target bundleno = 6 (0x6), region = 109 }
 0x936   :  { %1841 = vsyncpa [#allocation3], 1 }
 0x937   :  { %1843 = vsyncpa [#allocation3 + $0x1], 1 }
 0x938   :  { %1844 = vsyncpa [#allocation6], 1 }
 0x939   :  { %1845 = vsyncpa [#allocation4], 1 }
 0x93a   :  { %1847 = vsyncpa [#allocation4 + $0x1], 1 }

// kernel: tpu_custom_call.1
= control target key start
LH: loop header
LB: loop body
LE: loop exit
PB: predicated region body
PF: predicated region fallthrough
CT: control target
= control target key end

     0   :  { %14 = vsyncpa [#allocation3], 0  ;;  %s2804_s0 = inlined_call_operand.hbm [shape: f32[16,32], index: 0, kind: input, shape index: {}]   ;;  %s2805_s1 = inlined_call_operand.vmem [shape: f32[1,32], index: 1, kind: input, shape index: {}]   ;;  %s2806_s2 = inlined_call_operand.vmem [shape: f32[1,32], index: 2, kind: input, shape index: {}]   ;;  %s2807_s3 = inlined_call_operand.hbm [shape: bf16[32,96], index: 3, kind: input, shape index: {}]   ;;  %s2808_s4 = inlined_call_operand.hbm [shape: f32[1,96], index: 4, kind: input, shape index: {}]   ;;  %s2809_s5 = inlined_call_operand.vmem [shape: bf16[32,32], index: 5, kind: input, shape index: {}]   ;;  %s2810_s6 = inlined_call_operand.vmem [shape: f32[1,32], index: 6, kind: input, shape index: {}]   ;;  %s2811_s7 = inlined_call_operand.vmem [shape: f32[1,32], index: 7, kind: input, shape index: {}]   ;;  %s2812_s8 = inlined_call_operand.vmem [shape: f32[1,32], index: 8, kind: input, shape index: {}]   ;;  %s2813_s9 = inlined_call_operand.hbm [shape: f32[16,32], index: 9, kind: output, shape index: {}]  }
   0x1   :  { %16 = vsyncpa [#allocation3 + $0x1], 0 }
   0x2   :  { %17 = vsyncpa [#allocation6], 0 }
   0x3   :  { %18 = vsyncpa [#allocation4], 0 }
   0x4   :  { %20 = vsyncpa [#allocation4 + $0x1], 0  ;;  %s2369_s30 = smov 0   ;;  %s2371_s10 = smov 0  }
   0x5   :  { %s2373_s11 = smov 0   ;;  %s2375_s12 = smov 0  }
   0x6 LB: > { %s2390_s13 = sadd.s32 4294967295, %s2299_s12   ;;  %s1912_s14 = sadd.s32 4294967294, %s2299_s12   ;;  %s2299_s12 = sphi %s2375_s12, %s2836_s12   ;;  %s2295_s11 = sphi %s2373_s11, %s2835_s11   ;;  %s2291_s10 = sphi %s2371_s10, %s2834_s10   ;;  %s2287_s30 = sphi %s2369_s30, %s2833_s30  }
   0x7   : > { %p46_p0 = scmp.ne.s32.totalorder %s2291_s10, %s2287_s30  ;;  %p2814_p1 = scmp.eq.s32.totalorder %s2390_s13, 0 }
   0x8   : > { %p244_p3 = scmp.eq.s32.totalorder %s1912_s14, 1  ;;  %p1913_p5 = scmp.ge.s32.totalorder %s2299_s12, 1 }
   0x9   : > { %p2399_p4 = por %p2814_p1, %p46_p0  ;;  %p251_p7 = scmp.lt.s32.totalorder %s2299_s12, 3 }
   0xa   : > { %p2404_p6 = por %p244_p3, %p46_p0  ;;  %s2301_s18 = smov [#allocation5]  }
   0xb   : > { %s2818_s15 = scalar_select %p2399_p4, 1, 0 }
   0xc   : > { %s2819_s16 = scalar_select %p2404_p6, 1, 0 }
   0xd   : > { %p2409_p8 = pnand %p1913_p5, %p251_p7  ;;  %s269_s19 = sshll.u32 %s2301_s18, 4  ;;  %s2413_s19 = int_to_ptr.vmem [resolvable:$true] %s269_s19 }
   0xe   : > { %2820 = sst [smem:[#allocation12_spill]] %s2819_s16  ;;  %s2302_s21 = smov [#allocation7]  }
   0xf   : > { %p2050_p9 = pneg %p2409_p8  ;;  %s283_s22 = sshll.u32 %s2302_s21, 4  ;;  %s2424_s22 = int_to_ptr.vmem [resolvable:$true] %s283_s22 }
  0x10   : > { %s2143_s25 = scalar_lea.hbm %s2807_s3, 256 }
  0x11   : > { %p2420_p11 = pnand %p2050_p9, %p2814_p1  ;;  %p2144_p12 = scmp.ne.s32.totalorder %s2807_s3, %s2143_s25 }
  0x12   : > { %p2150_p5 = scmp.lt.u32.totalorder %s2143_s25, %s2807_s3 }
  0x13   : > { %p2145_p13 = pneg %p2420_p11 }
  0x15   : > { %p2146_p0 = pnand %p2145_p13, %p2144_p12 }
  0x17   : > { %p2147_p3 = pneg %p2146_p0 }
  0x19   : > { %p2152_p7 = pnand %p2150_p5, %p2147_p3 }
  0x1b   : > { %2155 = shalt.err (!%p2152_p7)
}
  0x1c   : > { %s2156_s14 = scalar_lea.vmem %s2413_s19, 256  ;;  %p2164_p2 = scmp.lt.s32.totalorder %s2413_s19, %s2413_s19 }
  0x1d   : > { %p2157_p9 = scmp.ne.s32.totalorder %s2413_s19, %s2156_s14  ;;  %p2165_p12 = scmp.lt.s32.totalorder %s2156_s14, %s2156_s14 }
  0x1f   : > { %p2159_p10 = pnand %p2157_p9, %p2145_p13  ;;  %p2166_p0 = por %p2165_p12, %p2164_p2 }
  0x21   : > { %p2160_p1 = pneg %p2159_p10 }
  0x23   : > { %p2167_p6 = pnand %p2166_p0, %p2160_p1 }
  0x25   : > { %2170 = shalt.err (!%p2167_p6)
}
  0x26   : > { %s2303_s18 = smov 64   ;;  %s2304_s21 = smov 4  }
  0x27   : > { %2053 = dma.hbm_to_vmem [thread:$0]  (!%p2420_p11), %s2807_s3, 256, %s2413_s19, [#allocation6], %s2303_s18, %s2303_s18, %s2304_s21  }
  0x28   : > { %s2171_s27 = scalar_lea.hbm %s2808_s4, 16 }
  0x29   : > { %p2172_p2 = scmp.ne.s32.totalorder %s2808_s4, %s2171_s27  ;;  %p2178_p10 = scmp.lt.u32.totalorder %s2171_s27, %s2808_s4 }
  0x2b   : > { %p2174_p1 = pnand %p2172_p2, %p2145_p13 }
  0x2d   : > { %p2175_p6 = pneg %p2174_p1 }
  0x2f   : > { %p2180_p3 = pnand %p2178_p10, %p2175_p6 }
  0x31   : > { %2183 = shalt.err (!%p2180_p3)
}
  0x32   : > { %s2184_s19 = scalar_lea.vmem %s2424_s22, 16  ;;  %s2191_s18 = scalar_lea.vmem %s2424_s22, 32 }
  0x33   : > { %p2185_p5 = scmp.ne.s32.totalorder %s2424_s22, %s2184_s19  ;;  %p2192_p12 = scmp.lt.s32.totalorder %s2424_s22, %s2424_s22 }
  0x34   : > { %p2193_p0 = scmp.lt.s32.totalorder %s2191_s18, %s2184_s19 }
  0x35   : > { %p2187_p7 = pnand %p2185_p5, %p2145_p13 }
  0x36   : > { %p2194_p2 = por %p2193_p0, %p2192_p12 }
  0x37   : > { %p2188_p9 = pneg %p2187_p7 }
  0x39   : > { %p2195_p1 = pnand %p2194_p2, %p2188_p9 }
  0x3b   : > { %2198 = shalt.err (!%p2195_p1)
}
  0x3c   : > { %2056 = dma.hbm_to_vmem [thread:$0]  (!%p2420_p11), %s2808_s4, 16, %s2424_s22, [#allocation6]  }
  0x3d   : > { %s2480_s23 = sadd.s32 1, %s2299_s12   ;;  %s33_s20 = sadd.s32 1, %s2295_s11 }
  0x3e   : > { %s30_s24 = ssub.s32 %s2299_s12, %s2480_s23  ;;  %p40_p13 = scmp.ne.s32.totalorder %s2295_s11, %s2291_s10 }
  0x3f   : > { %p31_p6 = scmp.eq.s32.totalorder %s30_s24, 0  ;;  %p41_p10 = scmp.eq.s32.totalorder %s2299_s12, 0 }
  0x40   : > { %p2823_p3 = scmp.eq.s32.totalorder %s2390_s13, 1  ;;  %p2067_p7 = scmp.lt.s32.totalorder %s2299_s12, 2 }
  0x41   : > { %s2496_s26 = scalar_select %p31_p6, %s2295_s11, %s33_s20  }
  0x42   : > { %p2490_p5 = por %p2823_p3, %p40_p13  ;;  %p42_p9 = por %p41_p10, %p40_p13 }
  0x43   : > { %s306_s27 = sand.u32 1, %s2295_s11   ;;  %s1918_s22 = sshll.u32 %s2299_s12, 7 }
  0x44   : > { %s2824_s25 = scalar_select %p2490_p5, 1, 0 }
  0x45   : > { %s1917_s28 = sshll.u32 %s306_s27, 3  ;;  %s2503_s19 = scalar_lea.hbm %s2804_s0, %s1918_s22 }
  0x46   : > { %s310_s18 = scalar_lea.vmem [#allocation2], %s1917_s28  ;;  %p2507_p11 = pnand %p2067_p7, %p42_p9 }
  0x47   : > { %s317_s16 = sshll.u32 %s310_s18, 4  ;;  %s307_s20 = scalar_lea.sflag [#allocation3], %s306_s27  ;;  %s2505_s16 = int_to_ptr.vmem [resolvable:$true] %s317_s16 }
  0x48   : > { %s2199_s24 = scalar_lea.hbm %s2503_s19, 128  ;;  %p2201_p0 = pneg %p2507_p11 }
  0x49   : > { %p2200_p12 = scmp.ne.s32.totalorder %s2503_s19, %s2199_s24  ;;  %s2204_s29 = scalar_lea.hbm %s2804_s0, 256 }
  0x4a   : > { %p2205_p13 = scmp.lt.u32.totalorder %s2503_s19, %s2804_s0  ;;  %p2206_p6 = scmp.lt.u32.totalorder %s2204_s29, %s2199_s24 }
  0x4b   : > { %p2202_p2 = pnand %p2201_p0, %p2200_p12  ;;  %p2208_p3 = scmp.lt.u32.totalorder %s2199_s24, %s2503_s19 }
  0x4c   : > { %p2207_p10 = por %p2206_p6, %p2205_p13 }
  0x4d   : > { %p2203_p1 = pneg %p2202_p2 }
  0x4e   : > { %p2209_p7 = por %p2208_p3, %p2207_p10 }
  0x50   : > { %p2210_p9 = pnand %p2209_p7, %p2203_p1 }
  0x52   : > { %2213 = shalt.err (!%p2210_p9)
}
  0x53   : > { %s2214_s27 = scalar_lea.vmem %s2505_s16, 128  ;;  %s2305_s22 = smov [#allocation2]  }
  0x54   : > { %p2215_p12 = scmp.ne.s32.totalorder %s2505_s16, %s2214_s27  ;;  %s2219_s28 = sshll.u32 %s2305_s22, 4  ;;  %s2220_s28 = int_to_ptr.vmem [resolvable:$false] %s2219_s28 }
  0x55   : > { %s2221_s14 = scalar_lea.vmem %s2220_s28, 256  ;;  %p2222_p4 = scmp.lt.s32.totalorder %s2505_s16, %s2220_s28 }
  0x56   : > { %p2217_p2 = pnand %p2215_p12, %p2201_p0  ;;  %p2223_p13 = scmp.lt.s32.totalorder %s2221_s14, %s2214_s27 }
  0x58   : > { %p2218_p5 = pneg %p2217_p2  ;;  %p2224_p6 = por %p2223_p13, %p2222_p4 }
  0x5a   : > { %p2225_p10 = pnand %p2224_p6, %p2218_p5 }
  0x5c   : > { %2228 = shalt.err (!%p2225_p10)
}
  0x5d   : > { %2060 = dma.hbm_to_vmem [thread:$0]  (!%p2507_p11), %s2503_s19, 128, %s2505_s16, %s307_s20  }
  0x5e   : > { %326 = sbr.rel (%p2409_p8) target bundleno = 2338 (0x922), region = 56  ;;  %s2539_s24 = sand.u32 (!%p2409_p8), 1, %s2291_s10  }
  0x5f   : > { %s1920_s29 = sshll.u32 (!%p2409_p8), %s2539_s24, 3  ;;  %s329_s18 = scalar_lea.sflag (!%p2409_p8), [#allocation3], %s2539_s24 }
  0x60   : > { %s332_s27 = scalar_lea.vmem (!%p2409_p8), [#allocation2], %s1920_s29  ;;  %p2826_p4 = scmp.ne.s32.totalorder (!%p2409_p8), %s2818_s15, 0 }
  0x65   : > { %2274 = dma.done.wait (%p2826_p4), %s329_s18, 128  }
  0x66   : > { %2276 = vsyncadd (%p2826_p4), %s329_s18, 4294967168  ;;  %p2827_p5 = scmp.eq.s32.totalorder %s2390_s13, 0 }
  0x68   : > { %2278 = dma.done.wait (%p2827_p5), [#allocation6], 272   ;;  %p2828_p8 = pmov %p2827_p5 }
  0x69   : > { %vm379_vm0 = vcmask 261120   ;;  %v376_v0 = vld [vmem:[%s332_s27] sm:$0xff]  ;;  %v2119_v7 = vld [vmem:[#allocation5] sm:$0xff]   ;;  %v2306_v8 = vmov 0.0   ;;  %v2120_v9 = vld [vmem:[#allocation5 + $0x8] sm:$0xff]   ;;  %vm2307_vm1 = vmmov 0   ;;  %v490_v31 = vlaneseq }
  0x6a   : > { %2280 = vsyncadd (%p2828_p8), [#allocation6], 4294967024  ;;  %v380_v1 = vsel %vm379_vm0, %v376_v0, 0.0  ;;  %1982 = vmatprep.subr.bf16.mxu0 %v2306_v8  ;;  %1995 = vmatprep.subr.mxu1 %v2306_v8  ;;  %v1924_v14 = vld [vmem:[%s2805_s1] ss:$0 sm:$0xff]  ;;  %s2308_s21 = smov 104  }
  0x6b   : > { %381 = vadd.xlane.f32.xlu0 %v380_v1  ;;  %1983 = vmatpush3.bf16.msra.mxu0 %v2119_v7  ;;  %v1925_v16 = vld [vmem:[%s2806_s2] ss:$0 sm:$0xff]  ;;  %s2309_s20 = smov 120   ;;  %s2310_s22 = smov 112   ;;  %v2312_v29 = vmov 1983009808  }
  0x6c   : > { %1986 = vmatprep.mubr.msk.bf16.mxu0 %vm2307_vm1, %v2306_v8  ;;  %1984 = vmatprep.subr.bf16.mxu0 %v2306_v8  ;;  %v1926_v20 = vld [vmem:[#allocation7] ss:$0 sm:$0xff]  ;;  %s2311_s28 = smov 96   ;;  %v488_v30 = vunpack.c.l.s4 %v2312_v29  ;;  %v491_v33 = vshrl.u32 %v490_v31, 7  ;;  %v2313_v34 = vmov 1934713408  }
  0x6d   : > { %1997 = vmatprep.mubr.msk.f32.mxu1 %vm2307_vm1, %v2306_v8  ;;  %v520_v35 = vunpack.c.l.s4 %v2313_v34  ;;  %vm917_vm2 = vcmask 64512   ;;  %s2314_s14 = smov 64   ;;  %s2315_s19 = smov 16   ;;  %vm1707_vm3 = vcmask 130048   ;;  %vm1709_vm4 = vcmask 195584  }
  0x6e   : > { %v489_v32 = vunpack.c.0.s8 %v488_v30  ;;  %s2316_s16 = smov 8   ;;  %s1957_s15 = sshll.u32 %s2390_s13, 7 }
  0x6f   : > { %1985 = vmatpush3.bf16.msra.mxu0 %v2120_v9  ;;  %v521_v42 = vunpack.c.0.s8 %v520_v35  ;;  %s374_s17 = scalar_lea.vmem [#allocation8], %s1920_s29  ;;  %p2829_p0 = scmp.ne.s32.totalorder %s2824_s25, 0 }
  0x70   : > { %1990 = vmatprep.subr.mxu0 %v2306_v8  ;;  %v2595_v39 = vsub.s32 %v489_v32, %v491_v33  ;;  %s2318_s13 = smov [#allocation8]  }
  0x71   : > { %v2605_v48 = vsub.s32 %v521_v42, %v491_v33  ;;  %s2233_s29 = sshll.u32 %s2318_s13, 4  ;;  %s2234_s29 = int_to_ptr.vmem [resolvable:$false] %s2233_s29 }
  0xf8   : > { %v382_v2 = vpop.xlane.xlu0 %381 }
  0xf9   : > { %v384_v3 = vmul.f32 0.03125, %v382_v2 }
  0xfb   : > { %v385_v4 = vsub.f32 %v376_v0, %v384_v3 }
  0xfd   : > { %v386_v5 = vmul.f32 %v385_v4, %v385_v4 }
  0xff   : > { %v387_v6 = vsel %vm379_vm0, %v386_v5, 0.0 }
 0x100   : > { %388 = vadd.xlane.f32.xlu0 %v387_v6 }
 0x18d   : > { %v389_v10 = vpop.xlane.xlu0 %388 }
 0x18e   : > { %v390_v11 = vmul.f32 0.03125, %v389_v10 }
 0x190   : > { %v391_v12 = vadd.f32 1e-05, %v390_v11 }
 0x192   : > { %2123 = vrsqrt.f32 %v391_v12 }
 0x19c   : > { %v2124_v13 = vpop.eup %2123 }
 0x19d   : > { %v393_v15 = vmul.f32 %v2124_v13, %v385_v4 }
 0x19f   : > { %v400_v17 = vmul.f32 %v1924_v14, %v393_v15 }
 0x1a1   : > { %v2569_v18 = vadd.f32 %v1925_v16, %v400_v17 }
 0x1a3   : > { %v408_v19 = vpack.c.bf16 %v2569_v18, %v2569_v18 }
 0x1a5   : > { %1987 = vmatmul.mubr.msk.bf16.vlgmr.msra.gmra.mrb[0].mxu0 %vm379_vm0, %v408_v19 }
 0x1a6   : > { %1992 = vmatprep.mubr.msk.f32.mxu0 %vm2307_vm1, %v2306_v8 }
 0x278   : > { %v469_v21 = vpop.f32.mrb[0].mxu0 }
 0x279   : > { %v2576_v22 = vadd.f32 %v1926_v20, %v469_v21  ;;  %v1988_v23 = vpop.f32.mrb[1].mxu0 }
 0x27a   : > { %v472_v24 = vpop.f32.mrb[2].mxu0 }
 0x27b   : > { %482 = vrot.lane.b32.xlu0 %v2576_v22, %s2308_s21  ;;  %476 = vrot.lane.b32.xlu1 %v2576_v22, %s2309_s20  ;;  %v1989_v25 = vpop.f32.mrb[3].mxu0  ;;  %s2317_s21 = smov 24   ;;  %s2759_s20 = scalar_lea.hbm %s2813_s9, %s1957_s15 }
 0x27f   : > { %479 = vrot.lane.b32.xlu1 %v2576_v22, %s2310_s22  ;;  %s1810_s22 = scalar_lea.sflag [#allocation4], %s2539_s24 }
 0x283   : > { %621 = vrot.lane.b32.xlu1 %v2576_v22, %s2311_s28 }
 0x2ed   : > { %v2582_v26 = vpop.permute.xlu1 %476  ;;  %v2588_v28 = vpop.permute.xlu0 %482 }
 0x2ee   : > { %623 = vrot.lane.b32.xlu1 %v2582_v26, %s2311_s28  ;;  %v501_v40 = vcombine.low %v2582_v26, %v2588_v28  ;;  %v502_v41 = vcombine.high %v2582_v26, %v2588_v28 }
 0x2f0   : > { %v509_v46 = vrot.slane %v501_v40, %v2595_v39  ;;  %v516_v47 = vrot.slane %v502_v41, %v2595_v39 }
 0x2f1   : > { %v2585_v27 = vpop.permute.xlu1 %479 }
 0x2f2   : > { %625 = vrot.lane.b32.xlu1 %v2585_v27, %s2311_s28  ;;  %v485_v36 = vcombine.low %v2576_v22, %v2585_v27  ;;  %v486_v37 = vcombine.high %v2576_v22, %v2585_v27 }
 0x2f4   : > { %v493_v43 = vrot.slane %v485_v36, %v2595_v39  ;;  %v500_v44 = vrot.slane %v486_v37, %v2595_v39 }
 0x2f5   : > { %v622_v38 = vpop.permute.xlu1 %621 }
 0x2f6   : > { %627 = vrot.lane.b32.xlu1 %v2588_v28, %s2311_s28  ;;  %v517_v49 = vcombine.low %v493_v43, %v509_v46  ;;  %v518_v50 = vcombine.high %v493_v43, %v509_v46  ;;  %v533_v51 = vcombine.low %v500_v44, %v516_v47  ;;  %v534_v52 = vcombine.high %v500_v44, %v516_v47 }
 0x2f8   : > { %v525_v56 = vrot.slane %v517_v49, %v2605_v48  ;;  %v532_v57 = vrot.slane %v518_v50, %v2605_v48  ;;  %v541_v58 = vrot.slane %v533_v51, %v2605_v48  ;;  %v548_v59 = vrot.slane %v534_v52, %v2605_v48 }
 0x2fa   : > { %v553_v3 = vcombine.low %v525_v56, %v532_v57  ;;  %v1930_v4 = vcombine.high %v525_v56, %v532_v57  ;;  %v569_v5 = vcombine.low %v541_v58, %v548_v59  ;;  %v1931_v6 = vcombine.high %v541_v58, %v548_v59 }
 0x2fc   : > { %v560_v16 = vrot.slane %v553_v3, %v2595_v39  ;;  %v568_v17 = vrot.slane %v1930_v4, %v2595_v39  ;;  %v576_v19 = vrot.slane %v569_v5, %v2595_v39  ;;  %v584_v20 = vrot.slane %v1931_v6, %v2595_v39 }
 0x2fe   : > { %v585_v33 = vcombine.low %v560_v16, %v568_v17  ;;  %v601_v34 = vcombine.low %v576_v19, %v584_v20  ;;  %v586_v42 = vcombine.high %v560_v16, %v568_v17 }
 0x300   : > { %v593_v43 = vrot.slane %v585_v33, %v2605_v48  ;;  %v609_v44 = vrot.slane %v601_v34, %v2605_v48  ;;  %v600_v51 = vrot.slane %v586_v42, %v2605_v48 }
 0x302   : > { %v617_v52 = vcombine.low %v593_v43, %v609_v44 }
 0x360   : > { %v624_v45 = vpop.permute.xlu1 %623 }
 0x364   : > { %v626_v53 = vpop.permute.xlu1 %625 }
 0x365   : > { %v633_v54 = vcombine.low %v622_v38, %v626_v53  ;;  %v634_v55 = vcombine.high %v622_v38, %v626_v53  ;;  %v618_v53 = vcombine.high %v593_v43, %v609_v44 }
 0x367   : > { %v641_v63 = vrot.slane %v633_v54, %v2595_v39  ;;  %v648_v0 = vrot.slane %v634_v55, %v2595_v39 }
 0x368   : > { %v628_v60 = vpop.permute.xlu1 %627 }
 0x369   : > { %v649_v61 = vcombine.low %v624_v45, %v628_v60  ;;  %v650_v62 = vcombine.high %v624_v45, %v628_v60  ;;  %v602_v45 = vcombine.high %v576_v19, %v584_v20 }
 0x36b   : > { %v657_v1 = vrot.slane %v649_v61, %v2595_v39  ;;  %v664_v2 = vrot.slane %v650_v62, %v2595_v39  ;;  %v616_v54 = vrot.slane %v602_v45, %v2605_v48 }
 0x36d   : > { %v665_v7 = vcombine.low %v641_v63, %v657_v1  ;;  %v666_v9 = vcombine.high %v641_v63, %v657_v1  ;;  %v681_v10 = vcombine.low %v648_v0, %v664_v2  ;;  %v682_v11 = vcombine.high %v648_v0, %v664_v2 }
 0x36e   : > { %v619_v57 = vcombine.low %v600_v51, %v616_v54  ;;  %v620_v58 = vcombine.high %v600_v51, %v616_v54 }
 0x36f   : > { %v673_v12 = vrot.slane %v665_v7, %v2605_v48  ;;  %v680_v13 = vrot.slane %v666_v9, %v2605_v48  ;;  %v689_v14 = vrot.slane %v681_v10, %v2605_v48  ;;  %v696_v15 = vrot.slane %v682_v11, %v2605_v48 }
 0x371   : > { %v701_v21 = vcombine.low %v673_v12, %v680_v13  ;;  %v1932_v23 = vcombine.high %v673_v12, %v680_v13  ;;  %v717_v24 = vcombine.low %v689_v14, %v696_v15  ;;  %v1933_v25 = vcombine.high %v689_v14, %v696_v15 }
 0x373   : > { %v708_v29 = vrot.slane %v701_v21, %v2595_v39  ;;  %v716_v30 = vrot.slane %v1932_v23, %v2595_v39  ;;  %v724_v31 = vrot.slane %v717_v24, %v2595_v39  ;;  %v732_v32 = vrot.slane %v1933_v25, %v2595_v39 }
 0x375   : > { %v733_v35 = vcombine.low %v708_v29, %v716_v30  ;;  %v734_v36 = vcombine.high %v708_v29, %v716_v30  ;;  %v749_v37 = vcombine.low %v724_v31, %v732_v32  ;;  %v750_v38 = vcombine.high %v724_v31, %v732_v32 }
 0x377   : > { %v741_v40 = vrot.slane %v733_v35, %v2605_v48  ;;  %v757_v41 = vrot.slane %v749_v37, %v2605_v48  ;;  %v748_v49 = vrot.slane %v734_v36, %v2605_v48  ;;  %v764_v50 = vrot.slane %v750_v38, %v2605_v48 }
 0x379   : > { %v765_v46 = vcombine.low %v741_v40, %v757_v41  ;;  %v766_v47 = vcombine.high %v741_v40, %v757_v41  ;;  %v767_v55 = vcombine.low %v748_v49, %v764_v50  ;;  %v768_v56 = vcombine.high %v748_v49, %v764_v50 }
 0x37b   : > { %1991 = vmatpush3.xpose.msk.msra.mxu0 %vm917_vm2, %v765_v46  ;;  %1996 = vmatpush3.xpose.msk.msra.mxu1 %vm917_vm2, %v766_v47 }
 0x37c   : > { %2000 = vmatprep.subr.mxu1 %v2306_v8  ;;  %2005 = vmatprep.subr.mxu0 %v2306_v8 }
 0x37e   : > { %1993 = vmatmul.mubr.msk.f32.vlgmr.msra.gmra.mrb[4].mxu0 %vm917_vm2, %v617_v52  ;;  %1998 = vmatmul.mubr.msk.f32.vlgmr.msra.gmra.mrb[0].mxu1 %vm917_vm2, %v618_v53 }
 0x37f   : > { %2001 = vmatpush3.xpose.msk.msra.mxu1 %vm917_vm2, %v767_v55  ;;  %2006 = vmatpush3.xpose.msk.msra.mxu0 %vm917_vm2, %v768_v56 }
 0x380   : > { %2002 = vmatprep.mubr.msk.f32.mxu1 %vm2307_vm1, %v2306_v8  ;;  %2007 = vmatprep.mubr.msk.f32.mxu0 %vm2307_vm1, %v2306_v8 }
 0x381   : > { %2010 = vmatprep.subr.mxu1 %v2306_v8  ;;  %2015 = vmatprep.subr.mxu0 %v2306_v8 }
 0x382   : > { %2003 = vmatmul.mubr.msk.f32.vlgmr.msra.gmra.mrb[2].mxu1 %vm917_vm2, %v619_v57  ;;  %2008 = vmatmul.mubr.msk.f32.vlgmr.msra.gmra.mrb[6].mxu0 %vm917_vm2, %v620_v58 }
 0x383   : > { %2012 = vmatprep.mubr.msk.f32.mxu1 %vm2307_vm1, %v2306_v8  ;;  %2017 = vmatprep.mubr.msk.f32.mxu0 %vm2307_vm1, %v2306_v8 }
 0x451   : > { %v990_v59 = vpop.f32.mrb[4].mxu0  ;;  %v1066_v60 = vpop.f32.mrb[0].mxu1 }
 0x452   : > { %v1994_v61 = vpop.f32.mrb[5].mxu0  ;;  %v1999_v62 = vpop.f32.mrb[1].mxu1  ;;  %v1225_v63 = vsel %vm917_vm2, %v1066_v60, -inf  ;;  %v1222_v0 = vsel %vm917_vm2, %v990_v59, -inf }
 0x453   : > { %1226 = vmax.xlane.f32.xlu0 %v1225_v63  ;;  %1223 = vmax.xlane.f32.xlu1 %v1222_v0 }
 0x455   : > { %v1142_v1 = vpop.f32.mrb[2].mxu1  ;;  %v1218_v2 = vpop.f32.mrb[6].mxu0 }
 0x456   : > { %v2004_v3 = vpop.f32.mrb[3].mxu1  ;;  %v2009_v4 = vpop.f32.mrb[7].mxu0  ;;  %v1228_v5 = vsel %vm917_vm2, %v1142_v1, -inf  ;;  %v1231_v6 = vsel %vm917_vm2, %v1218_v2, -inf }
 0x457   : > { %1229 = vmax.xlane.f32.xlu1 %v1228_v5  ;;  %1232 = vmax.xlane.f32.xlu0 %v1231_v6 }
 0x468   : > { %769 = vrot.lane.b32.xlu1 %v2576_v22, %s2314_s14 }
 0x4e0   : > { %v1227_v7 = vpop.xlane.xlu0 %1226  ;;  %v1224_v9 = vpop.xlane.xlu1 %1223 }
 0x4e1   : > { %v1235_v10 = vsub.f32 %v1066_v60, %v1227_v7  ;;  %v1234_v11 = vsub.f32 %v990_v59, %v1224_v9 }
 0x4e3   : > { %v1240_v12 = vmul.f32 1.442695, %v1235_v10  ;;  %v1238_v13 = vmul.f32 1.442695, %v1234_v11 }
 0x4e4   : > { %v1230_v14 = vpop.xlane.xlu1 %1229  ;;  %v1233_v15 = vpop.xlane.xlu0 %1232 }
 0x4e5   : > { %2125 = vpow2.f32 %v1240_v12  ;;  %v1236_v16 = vsub.f32 %v1142_v1, %v1230_v14  ;;  %v1237_v17 = vsub.f32 %v1218_v2, %v1233_v15 }
 0x4e6   : > { %2127 = vpow2.f32 %v1238_v13 }
 0x4e7   : > { %v1242_v19 = vmul.f32 1.442695, %v1236_v16  ;;  %v1244_v20 = vmul.f32 1.442695, %v1237_v17 }
 0x4e8   : > { %v770_v32 = vpop.permute.xlu1 %769 }
 0x4e9   : > { %2129 = vpow2.f32 %v1242_v19 }
 0x4ea   : > { %2131 = vpow2.f32 %v1244_v20 }
 0x4ef   : > { %v2661_v21 = vpop.eup %2125 }
 0x4f0   : > { %v2663_v23 = vpop.eup %2127  ;;  %v1249_v22 = vsel %vm917_vm2, %v2661_v21, 0.0 }
 0x4f1   : > { %v1246_v24 = vsel %vm917_vm2, %v2663_v23, 0.0  ;;  %1250 = vadd.xlane.f32.xlu0 %v1249_v22 }
 0x4f2   : > { %1247 = vadd.xlane.f32.xlu1 %v1246_v24 }
 0x4f3   : > { %v2669_v25 = vpop.eup %2129 }
 0x4f4   : > { %v2671_v29 = vpop.eup %2131  ;;  %v1252_v30 = vsel %vm917_vm2, %v2669_v25, 0.0 }
 0x4f5   : > { %v1255_v31 = vsel %vm917_vm2, %v2671_v29, 0.0 }
 0x4f6   : > { %1253 = vadd.xlane.f32.xlu1 %v1252_v30  ;;  %1256 = vadd.xlane.f32.xlu0 %v1255_v31 }
 0x507   : > { %773 = vrot.lane.b32.xlu1 %v2585_v27, %s2314_s14 }
 0x50b   : > { %775 = vrot.lane.b32.xlu1 %v2588_v28, %s2314_s14 }
 0x50c   : > { %771 = vrot.lane.b32.xlu0 %v2582_v26, %s2314_s14  ;;  %s2235_s14 = scalar_lea.vmem %s2234_s29, 256 }
 0x57e   : > { %v1251_v34 = vpop.xlane.xlu0 %1250 }
 0x57f   : > { %v1248_v33 = vpop.xlane.xlu1 %1247  ;;  %2133 = vrcp.f32 %v1251_v34 }
 0x580   : > { %2135 = vrcp.f32 %v1248_v33 }
 0x583   : > { %v1254_v35 = vpop.xlane.xlu1 %1253  ;;  %v1257_v36 = vpop.xlane.xlu0 %1256 }
 0x584   : > { %2137 = vrcp.f32 %v1254_v35 }
 0x585   : > { %2139 = vrcp.f32 %v1257_v36 }
 0x587   : > { %v774_v37 = vpop.permute.xlu1 %773  ;;  %v772_v41 = vpop.permute.xlu0 %771 }
 0x588   : > { %v781_v38 = vcombine.low %v770_v32, %v774_v37  ;;  %v782_v40 = vcombine.high %v770_v32, %v774_v37 }
 0x589   : > { %v2134_v3 = vpop.eup %2133 }
 0x58a   : > { %v789_v27 = vrot.slane %v781_v38, %v2595_v39  ;;  %v796_v45 = vrot.slane %v782_v40, %v2595_v39  ;;  %v2136_v5 = vpop.eup %2135  ;;  %v1263_v14 = vmul.f32 %v2134_v3, %v2661_v21 }
 0x58b   : > { %v776_v42 = vpop.permute.xlu1 %775  ;;  %v1262_v13 = vmul.f32 %v2136_v5, %v2663_v23 }
 0x58c   : > { %v797_v43 = vcombine.low %v772_v41, %v776_v42  ;;  %v798_v44 = vcombine.high %v772_v41, %v776_v42 }
 0x58e   : > { %v805_v28 = vrot.slane %v797_v43, %v2595_v39  ;;  %v812_v26 = vrot.slane %v798_v44, %v2595_v39  ;;  %v2138_v12 = vpop.eup %2137 }
 0x58f   : > { %v2140_v15 = vpop.eup %2139  ;;  %v1264_v19 = vmul.f32 %v2138_v12, %v2669_v25 }
 0x590   : > { %v813_v46 = vcombine.low %v789_v27, %v805_v28  ;;  %v814_v47 = vcombine.high %v789_v27, %v805_v28  ;;  %v829_v49 = vcombine.low %v796_v45, %v812_v26  ;;  %v830_v50 = vcombine.high %v796_v45, %v812_v26  ;;  %v2121_v27 = vld [vmem:[%s2809_s5] sm:$0xff]  }
 0x591   : > { %v1265_v20 = vmul.f32 %v2140_v15, %v2671_v29 }
 0x592   : > { %v821_v51 = vrot.slane %v813_v46, %v2605_v48  ;;  %v828_v52 = vrot.slane %v814_v47, %v2605_v48  ;;  %v837_v53 = vrot.slane %v829_v49, %v2605_v48  ;;  %v844_v54 = vrot.slane %v830_v50, %v2605_v48 }
 0x594   : > { %v849_v55 = vcombine.low %v821_v51, %v828_v52  ;;  %v1934_v56 = vcombine.high %v821_v51, %v828_v52  ;;  %v865_v57 = vcombine.low %v837_v53, %v844_v54  ;;  %v1935_v58 = vcombine.high %v837_v53, %v844_v54  ;;  %v2122_v52 = vld [vmem:[%s2809_s5 + $0x8] sm:$0xff]  }
 0x596   : > { %v856_v59 = vrot.slane %v849_v55, %v2595_v39  ;;  %v864_v60 = vrot.slane %v1934_v56, %v2595_v39  ;;  %v872_v61 = vrot.slane %v865_v57, %v2595_v39  ;;  %v880_v62 = vrot.slane %v1935_v58, %v2595_v39 }
 0x598   : > { %v881_v63 = vcombine.low %v856_v59, %v864_v60  ;;  %v882_v0 = vcombine.high %v856_v59, %v864_v60  ;;  %v897_v1 = vcombine.low %v872_v61, %v880_v62  ;;  %v898_v2 = vcombine.high %v872_v61, %v880_v62 }
 0x59a   : > { %v889_v4 = vrot.slane %v881_v63, %v2605_v48  ;;  %v905_v6 = vrot.slane %v897_v1, %v2605_v48  ;;  %v896_v7 = vrot.slane %v882_v0, %v2605_v48  ;;  %v912_v9 = vrot.slane %v898_v2, %v2605_v48 }
 0x59c   : > { %v913_v10 = vcombine.low %v889_v4, %v905_v6  ;;  %v914_v11 = vcombine.high %v889_v4, %v905_v6  ;;  %v915_v16 = vcombine.low %v896_v7, %v912_v9  ;;  %v916_v17 = vcombine.high %v896_v7, %v912_v9 }
 0x59e   : > { %2011 = vmatpush3.msra.mxu1 %v913_v10  ;;  %2016 = vmatpush3.msra.mxu0 %v914_v11  ;;  %v1950_v10 = vld [vmem:[%s2810_s6] ss:$0 sm:$0xff] }
 0x59f   : > { %2013 = vmatmul.mubr.msk.f32.vlgmr.msra.gmra.mrb[4].mxu1 %vm917_vm2, %v1262_v13  ;;  %2018 = vmatmul.mubr.msk.f32.vlgmr.msra.gmra.mrb[8].mxu0 %vm917_vm2, %v1263_v14 }
 0x5a0   : > { %2020 = vmatprep.subr.mxu1 %v2306_v8  ;;  %2025 = vmatprep.subr.mxu0 %v2306_v8 }
 0x5a1   : > { %2021 = vmatpush3.msra.mxu1 %v915_v16  ;;  %2026 = vmatpush3.msra.mxu0 %v916_v17 }
 0x5a2   : > { %2022 = vmatprep.mubr.msk.f32.mxu1 %vm2307_vm1, %v2306_v8  ;;  %2027 = vmatprep.mubr.msk.f32.mxu0 %vm2307_vm1, %v2306_v8 }
 0x5a3   : > { %2023 = vmatmul.mubr.msk.f32.vlgmr.msra.gmra.mrb[6].mxu1 %vm917_vm2, %v1264_v19  ;;  %2028 = vmatmul.mubr.msk.f32.vlgmr.msra.gmra.mrb[10].mxu0 %vm917_vm2, %v1265_v20 }
 0x5a4   : > { %2030 = vmatprep.subr.bf16.mxu1 %v2306_v8  ;;  %2034 = vmatprep.mubr.msk.bf16.mxu1 %vm2307_vm1, %v2306_v8 }
 0x5a5   : > { %2031 = vmatpush3.bf16.msra.mxu1 %v2121_v27 }
 0x5a6   : > { %2032 = vmatprep.subr.bf16.mxu1 %v2306_v8 }
 0x5a9   : > { %2033 = vmatpush3.bf16.msra.mxu1 %v2122_v52 }
 0x672   : > { %v1335_v21 = vpop.f32.mrb[4].mxu1  ;;  %v1408_v23 = vpop.f32.mrb[8].mxu0 }
 0x673   : > { %v2014_v22 = vpop.f32.mrb[5].mxu1  ;;  %v2019_v24 = vpop.f32.mrb[9].mxu0 }
 0x676   : > { %v1481_v25 = vpop.f32.mrb[6].mxu1  ;;  %v1554_v29 = vpop.f32.mrb[10].mxu0 }
 0x677   : > { %v1558_v30 = vcombine.low %v1335_v21, %v1481_v25  ;;  %v1559_v31 = vcombine.high %v1335_v21, %v1481_v25  ;;  %v1574_v32 = vcombine.low %v1408_v23, %v1554_v29  ;;  %v1575_v33 = vcombine.high %v1408_v23, %v1554_v29  ;;  %v2024_v34 = vpop.f32.mrb[7].mxu1  ;;  %v2029_v35 = vpop.f32.mrb[11].mxu0 }
 0x679   : > { %v1566_v36 = vrot.slane %v1558_v30, %v2595_v39  ;;  %v1573_v37 = vrot.slane %v1559_v31, %v2595_v39  ;;  %v1582_v38 = vrot.slane %v1574_v32, %v2595_v39  ;;  %v1589_v40 = vrot.slane %v1575_v33, %v2595_v39  ;;  %v1955_v32 = vld [vmem:[%s2812_s8] ss:$0 sm:$0xff] }
 0x67b   : > { %v1590_v41 = vcombine.low %v1566_v36, %v1582_v38  ;;  %v1591_v42 = vcombine.high %v1566_v36, %v1582_v38  ;;  %v1606_v43 = vcombine.low %v1573_v37, %v1589_v40  ;;  %v1607_v44 = vcombine.high %v1573_v37, %v1589_v40 }
 0x67d   : > { %v1598_v45 = vrot.slane %v1590_v41, %v2605_v48  ;;  %v1605_v28 = vrot.slane %v1591_v42, %v2605_v48  ;;  %v1614_v26 = vrot.slane %v1606_v43, %v2605_v48  ;;  %v1621_v46 = vrot.slane %v1607_v44, %v2605_v48 }
 0x67f   : > { %v1626_v47 = vcombine.low %v1598_v45, %v1605_v28  ;;  %v1948_v49 = vcombine.high %v1598_v45, %v1605_v28  ;;  %v1642_v50 = vcombine.low %v1614_v26, %v1621_v46  ;;  %v1949_v51 = vcombine.high %v1614_v26, %v1621_v46 }
 0x681   : > { %v1633_v53 = vrot.slane %v1626_v47, %v2595_v39  ;;  %v1641_v54 = vrot.slane %v1948_v49, %v2595_v39  ;;  %v1649_v55 = vrot.slane %v1642_v50, %v2595_v39  ;;  %v1657_v56 = vrot.slane %v1949_v51, %v2595_v39 }
 0x683   : > { %v1659_v57 = vcombine.high %v1633_v53, %v1641_v54  ;;  %v1675_v58 = vcombine.high %v1649_v55, %v1657_v56  ;;  %v1658_v8 = vcombine.low %v1633_v53, %v1641_v54  ;;  %v1674_v59 = vcombine.low %v1649_v55, %v1657_v56 }
 0x685   : > { %v1673_v60 = vrot.slane %v1659_v57, %v2605_v48  ;;  %v1689_v61 = vrot.slane %v1675_v58, %v2605_v48  ;;  %v1666_v62 = vrot.slane %v1658_v8, %v2605_v48  ;;  %v1682_v63 = vrot.slane %v1674_v59, %v2605_v48 }
 0x687   : > { %v1692_v0 = vcombine.low %v1673_v60, %v1689_v61  ;;  %v1691_v1 = vcombine.high %v1666_v62, %v1682_v63  ;;  %v1693_v2 = vcombine.high %v1673_v60, %v1689_v61  ;;  %v1690_v3 = vcombine.low %v1666_v62, %v1682_v63 }
 0x689   : > { %1699 = vrot.lane.b32.xlu1 %v1692_v0, %s2315_s19  ;;  %1695 = vrot.lane.b32.xlu0 %v1691_v1, %s2316_s16  ;;  %s1823_s19 = sshll.u32 %s374_s17, 4  ;;  %s2761_s19 = int_to_ptr.vmem [resolvable:$true] %s1823_s19 }
 0x68a   : > { %s2229_s28 = scalar_lea.vmem %s2761_s19, 128  ;;  %p2236_p7 = scmp.lt.s32.totalorder %s2761_s19, %s2234_s29 }
 0x68b   : > { %p2230_p11 = scmp.ne.s32.totalorder %s2761_s19, %s2229_s28  ;;  %p2237_p9 = scmp.lt.s32.totalorder %s2235_s14, %s2229_s28 }
 0x68d   : > { %1703 = vrot.lane.b32.xlu0 %v1693_v2, %s2317_s21  ;;  %p2231_p1 = pnand %p2230_p11, %p2829_p0  ;;  %p2238_p12 = por %p2237_p9, %p2236_p7 }
 0x68f   : > { %p2232_p3 = pneg %p2231_p1 }
 0x691   : > { %p2239_p2 = pnand %p2238_p12, %p2232_p3 }
 0x6fb   : > { %v1696_v39 = vpop.permute.xlu0 %1695  ;;  %v1700_v4 = vpop.permute.xlu1 %1699 }
 0x6fc   : > { %v1706_v5 = vsel %vm917_vm2, %v1690_v3, %v1696_v39 }
 0x6fd   : > { %v1708_v7 = vsel %vm1707_vm3, %v1706_v5, %v1700_v4 }
 0x6ff   : > { %v1704_v6 = vpop.permute.xlu0 %1703 }
 0x700   : > { %v1710_v9 = vsel %vm1709_vm4, %v1708_v7, %v1704_v6 }
 0x701   : > { %v1711_v48 = vpack.c.bf16 %v1710_v9, %v1710_v9 }
 0x703   : > { %2035 = vmatmul.mubr.msk.bf16.vlgmr.msra.gmra.mrb[8].mxu1 %vm379_vm0, %v1711_v48 }
 0x7d6   : > { %v1772_v11 = vpop.f32.mrb[8].mxu1 }
 0x7d7   : > { %v1773_v12 = vadd.f32 %v1950_v10, %v1772_v11  ;;  %v2036_v13 = vpop.f32.mrb[9].mxu1 }
 0x7d8   : > { %v1775_v14 = vpop.f32.mrb[10].mxu1 }
 0x7d9   : > { %v2037_v15 = vpop.f32.mrb[11].mxu1  ;;  %v1778_v16 = vadd.f32 %v1773_v12, %v2569_v18  ;;  %v1954_v18 = vld [vmem:[%s2811_s7] ss:$0 sm:$0xff] }
 0x7db   : > { %v1781_v17 = vsel %vm379_vm0, %v1778_v16, 0.0 }
 0x7dc   : > { %1782 = vadd.xlane.f32.xlu1 %v1781_v17 }
 0x869   : > { %v1783_v19 = vpop.xlane.xlu1 %1782 }
 0x86a   : > { %v1784_v20 = vmul.f32 0.03125, %v1783_v19 }
 0x86c   : > { %v1785_v21 = vsub.f32 %v1778_v16, %v1784_v20 }
 0x86e   : > { %v1786_v23 = vmul.f32 %v1785_v21, %v1785_v21 }
 0x870   : > { %v1787_v22 = vsel %vm379_vm0, %v1786_v23, 0.0 }
 0x871   : > { %1788 = vadd.xlane.f32.xlu0 %v1787_v22 }
 0x8fe   : > { %v1789_v24 = vpop.xlane.xlu0 %1788 }
 0x8ff   : > { %v1790_v25 = vmul.f32 0.03125, %v1789_v24 }
 0x901   : > { %v1791_v29 = vadd.f32 1e-05, %v1790_v25 }
 0x903   : > { %2141 = vrsqrt.f32 %v1791_v29 }
 0x90d   : > { %v2142_v30 = vpop.eup %2141 }
 0x90e   : > { %v1793_v31 = vmul.f32 %v2142_v30, %v1785_v21 }
 0x910   : > { %v1800_v33 = vmul.f32 %v1954_v18, %v1793_v31 }
 0x912   : > { %v1807_v34 = vadd.f32 %v1955_v32, %v1800_v33 }
 0x914   : > { %1808 = vst.msk [vmem:[%s374_s17] sm:$0xff] %vm379_vm0, %v1807_v34 }
 0x915   : > { %2242 = shalt.err (!%p2239_p2)
}
 0x916   : > { %s2243_s24 = scalar_lea.hbm %s2759_s20, 128  ;;  %s2247_s15 = scalar_lea.hbm %s2813_s9, 256 }
 0x917   : > { %p2244_p13 = scmp.ne.s32.totalorder %s2759_s20, %s2243_s24  ;;  %p2248_p4 = scmp.lt.u32.totalorder %s2759_s20, %s2813_s9 }
 0x918   : > { %p2249_p5 = scmp.lt.u32.totalorder %s2247_s15, %s2243_s24  ;;  %p2251_p11 = scmp.lt.u32.totalorder %s2243_s24, %s2759_s20 }
 0x919   : > { %p2245_p6 = pnand %p2244_p13, %p2829_p0 }
 0x91a   : > { %p2250_p8 = por %p2249_p5, %p2248_p4 }
 0x91b   : > { %p2246_p10 = pneg %p2245_p6 }
 0x91c   : > { %p2252_p1 = por %p2251_p11, %p2250_p8 }
 0x91e   : > { %p2253_p3 = pnand %p2252_p1, %p2246_p10 }
 0x920   : > { %2256 = shalt.err (!%p2253_p3)
}
 0x921   : > { %2048 = dma.vmem_to_hbm [thread:$0]  (%p2829_p0), %s2761_s19, 128, %s2759_s20, %s1810_s22  }
 0x922 PF: > { %s2830_s21 = sld [smem:[#allocation12_spill]]  ;;  %s1835_s28 = sand.u32 1, %s2287_s30  }
 0x923   : > { %p2832_p9 = scmp.ge.s32.totalorder %s2299_s12, 2  ;;  %s1836_s13 = scalar_lea.sflag [#allocation4], %s1835_s28 }
 0x928   : > { %p2831_p7 = scmp.ne.s32.totalorder %s2830_s21, 0 }
 0x92a   : > { %p2062_p12 = pnand %p2832_p9, %p2831_p7 }
 0x92c   : > { %2282 = dma.done.wait (!%p2062_p12), %s1836_s13, 128  }
 0x92d   : > { %2284 = vsyncadd (!%p2062_p12), %s1836_s13, 4294967168  ;;  %p23_p2 = scmp.ge.s32.totalorder %s2480_s23, 4   ;;  %s2833_s30 = smov %s2291_s10 }
 0x92e   : > { %s2834_s10 = smov %s2295_s11  ;;  %s2835_s11 = smov %s2496_s26 }
 0x92f   : > { %s2836_s12 = smov %s2480_s23  ;;  %25 = sbr.rel (!%p23_p2) target bundleno = 6 (0x6), region = 109 }
 0x936   :  { %1841 = vsyncpa [#allocation3], 1 }
 0x937   :  { %1843 = vsyncpa [#allocation3 + $0x1], 1 }
 0x938   :  { %1844 = vsyncpa [#allocation6], 1 }
 0x939   :  { %1845 = vsyncpa [#allocation4], 1 }
 0x93a   :  { %1847 = vsyncpa [#allocation4 + $0x1], 1 }

// kernel: tpu_custom_call.1
= control target key start
LH: loop header
LB: loop body
LE: loop exit
PB: predicated region body
PF: predicated region fallthrough
CT: control target
= control target key end

     0   :  { %14 = vsyncpa [#allocation3], 0  ;;  %s2147_s0 = inlined_call_operand.hbm [shape: f32[16,32], index: 0, kind: input, shape index: {}]   ;;  %s2148_s1 = inlined_call_operand.vmem [shape: f32[1,32], index: 1, kind: input, shape index: {}]   ;;  %s2149_s2 = inlined_call_operand.vmem [shape: f32[1,32], index: 2, kind: input, shape index: {}]   ;;  %s2150_s3 = inlined_call_operand.hbm [shape: bf16[32,96], index: 3, kind: input, shape index: {}]   ;;  %s2151_s4 = inlined_call_operand.hbm [shape: f32[1,96], index: 4, kind: input, shape index: {}]   ;;  %s2152_s5 = inlined_call_operand.vmem [shape: bf16[32,32], index: 5, kind: input, shape index: {}]   ;;  %s2153_s6 = inlined_call_operand.vmem [shape: f32[1,32], index: 6, kind: input, shape index: {}]   ;;  %s2154_s7 = inlined_call_operand.vmem [shape: f32[1,32], index: 7, kind: input, shape index: {}]   ;;  %s2155_s8 = inlined_call_operand.vmem [shape: f32[1,32], index: 8, kind: input, shape index: {}]   ;;  %s2156_s9 = inlined_call_operand.hbm [shape: f32[16,32], index: 9, kind: output, shape index: {}]  }
   0x1   :  { %16 = vsyncpa [#allocation3 + $0x1], 0 }
   0x2   :  { %17 = vsyncpa [#allocation6], 0 }
   0x3   :  { %18 = vsyncpa [#allocation4], 0 }
   0x4   :  { %20 = vsyncpa [#allocation4 + $0x1], 0  ;;  %s1810_s30 = smov 0   ;;  %s1812_s10 = smov 0  }
   0x5   :  { %s1814_s11 = smov 0   ;;  %s1816_s12 = smov 0  }
   0x6 LB: > { %s1831_s13 = sadd.s32 4294967295, %s1736_s12   ;;  %s1353_s14 = sadd.s32 4294967294, %s1736_s12   ;;  %s1736_s12 = sphi %s1816_s12, %s2179_s12   ;;  %s1732_s11 = sphi %s1814_s11, %s2178_s11   ;;  %s1728_s10 = sphi %s1812_s10, %s2177_s10   ;;  %s1724_s30 = sphi %s1810_s30, %s2176_s30  }
   0x7   : > { %p46_p0 = scmp.ne.s32.totalorder %s1728_s10, %s1724_s30  ;;  %p2157_p1 = scmp.eq.s32.totalorder %s1831_s13, 0 }
   0x8   : > { %p244_p3 = scmp.eq.s32.totalorder %s1353_s14, 1  ;;  %p1354_p5 = scmp.ge.s32.totalorder %s1736_s12, 1 }
   0x9   : > { %p1840_p4 = por %p2157_p1, %p46_p0  ;;  %p251_p7 = scmp.lt.s32.totalorder %s1736_s12, 3 }
   0xa   : > { %p1845_p6 = por %p244_p3, %p46_p0  ;;  %s1738_s18 = smov [#allocation5]  }
   0xb   : > { %s2161_s15 = scalar_select %p1840_p4, 1, 0 }
   0xc   : > { %s2162_s16 = scalar_select %p1845_p6, 1, 0 }
   0xd   : > { %p1850_p8 = pnand %p1354_p5, %p251_p7  ;;  %s269_s19 = sshll.u32 %s1738_s18, 4  ;;  %s1854_s19 = int_to_ptr.vmem [resolvable:$true] %s269_s19 }
   0xe   : > { %2163 = sst [smem:[#allocation12_spill]] %s2162_s16  ;;  %s1739_s21 = smov [#allocation7]  }
   0xf   : > { %p1483_p9 = pneg %p1850_p8  ;;  %s283_s22 = sshll.u32 %s1739_s21, 4  ;;  %s1865_s22 = int_to_ptr.vmem [resolvable:$true] %s283_s22 }
  0x10   : > { %s1580_s25 = scalar_lea.hbm %s2150_s3, 256 }
  0x11   : > { %p1861_p11 = pnand %p1483_p9, %p2157_p1  ;;  %p1581_p12 = scmp.ne.s32.totalorder %s2150_s3, %s1580_s25 }
  0x12   : > { %p1587_p5 = scmp.lt.u32.totalorder %s1580_s25, %s2150_s3 }
  0x13   : > { %p1582_p13 = pneg %p1861_p11 }
  0x15   : > { %p1583_p0 = pnand %p1582_p13, %p1581_p12 }
  0x17   : > { %p1584_p3 = pneg %p1583_p0 }
  0x19   : > { %p1589_p7 = pnand %p1587_p5, %p1584_p3 }
  0x1b   : > { %1592 = shalt.err (!%p1589_p7)
}
  0x1c   : > { %s1593_s14 = scalar_lea.vmem %s1854_s19, 256  ;;  %p1601_p2 = scmp.lt.s32.totalorder %s1854_s19, %s1854_s19 }
  0x1d   : > { %p1594_p9 = scmp.ne.s32.totalorder %s1854_s19, %s1593_s14  ;;  %p1602_p12 = scmp.lt.s32.totalorder %s1593_s14, %s1593_s14 }
  0x1f   : > { %p1596_p10 = pnand %p1594_p9, %p1582_p13  ;;  %p1603_p0 = por %p1602_p12, %p1601_p2 }
  0x21   : > { %p1597_p1 = pneg %p1596_p10 }
  0x23   : > { %p1604_p6 = pnand %p1603_p0, %p1597_p1 }
  0x25   : > { %1607 = shalt.err (!%p1604_p6)
}
  0x26   : > { %s1740_s18 = smov 64   ;;  %s1741_s21 = smov 4  }
  0x27   : > { %1486 = dma.hbm_to_vmem [thread:$0]  (!%p1861_p11), %s2150_s3, 256, %s1854_s19, [#allocation6], %s1740_s18, %s1740_s18, %s1741_s21  }
  0x28   : > { %s1608_s27 = scalar_lea.hbm %s2151_s4, 16 }
  0x29   : > { %p1609_p2 = scmp.ne.s32.totalorder %s2151_s4, %s1608_s27  ;;  %p1615_p10 = scmp.lt.u32.totalorder %s1608_s27, %s2151_s4 }
  0x2b   : > { %p1611_p1 = pnand %p1609_p2, %p1582_p13 }
  0x2d   : > { %p1612_p6 = pneg %p1611_p1 }
  0x2f   : > { %p1617_p3 = pnand %p1615_p10, %p1612_p6 }
  0x31   : > { %1620 = shalt.err (!%p1617_p3)
}
  0x32   : > { %s1621_s19 = scalar_lea.vmem %s1865_s22, 16  ;;  %s1628_s18 = scalar_lea.vmem %s1865_s22, 32 }
  0x33   : > { %p1622_p5 = scmp.ne.s32.totalorder %s1865_s22, %s1621_s19  ;;  %p1629_p12 = scmp.lt.s32.totalorder %s1865_s22, %s1865_s22 }
  0x34   : > { %p1630_p0 = scmp.lt.s32.totalorder %s1628_s18, %s1621_s19 }
  0x35   : > { %p1624_p7 = pnand %p1622_p5, %p1582_p13 }
  0x36   : > { %p1631_p2 = por %p1630_p0, %p1629_p12 }
  0x37   : > { %p1625_p9 = pneg %p1624_p7 }
  0x39   : > { %p1632_p1 = pnand %p1631_p2, %p1625_p9 }
  0x3b   : > { %1635 = shalt.err (!%p1632_p1)
}
  0x3c   : > { %1489 = dma.hbm_to_vmem [thread:$0]  (!%p1861_p11), %s2151_s4, 16, %s1865_s22, [#allocation6]  }
  0x3d   : > { %s1921_s23 = sadd.s32 1, %s1736_s12   ;;  %s33_s20 = sadd.s32 1, %s1732_s11 }
  0x3e   : > { %s30_s24 = ssub.s32 %s1736_s12, %s1921_s23  ;;  %p40_p13 = scmp.ne.s32.totalorder %s1732_s11, %s1728_s10 }
  0x3f   : > { %p31_p6 = scmp.eq.s32.totalorder %s30_s24, 0  ;;  %p41_p10 = scmp.eq.s32.totalorder %s1736_s12, 0 }
  0x40   : > { %p2166_p3 = scmp.eq.s32.totalorder %s1831_s13, 1  ;;  %p1500_p7 = scmp.lt.s32.totalorder %s1736_s12, 2 }
  0x41   : > { %s1937_s26 = scalar_select %p31_p6, %s1732_s11, %s33_s20  }
  0x42   : > { %p1931_p5 = por %p2166_p3, %p40_p13  ;;  %p42_p9 = por %p41_p10, %p40_p13 }
  0x43   : > { %s306_s27 = sand.u32 1, %s1732_s11   ;;  %s1359_s22 = sshll.u32 %s1736_s12, 7 }
  0x44   : > { %s2167_s25 = scalar_select %p1931_p5, 1, 0 }
  0x45   : > { %s1358_s28 = sshll.u32 %s306_s27, 3  ;;  %s1944_s19 = scalar_lea.hbm %s2147_s0, %s1359_s22 }
  0x46   : > { %s310_s18 = scalar_lea.vmem [#allocation2], %s1358_s28  ;;  %p1948_p11 = pnand %p1500_p7, %p42_p9 }
  0x47   : > { %s317_s16 = sshll.u32 %s310_s18, 4  ;;  %s307_s20 = scalar_lea.sflag [#allocation3], %s306_s27  ;;  %s1946_s16 = int_to_ptr.vmem [resolvable:$true] %s317_s16 }
  0x48   : > { %s1636_s24 = scalar_lea.hbm %s1944_s19, 128  ;;  %p1638_p0 = pneg %p1948_p11 }
  0x49   : > { %p1637_p12 = scmp.ne.s32.totalorder %s1944_s19, %s1636_s24  ;;  %s1641_s29 = scalar_lea.hbm %s2147_s0, 256 }
  0x4a   : > { %p1642_p13 = scmp.lt.u32.totalorder %s1944_s19, %s2147_s0  ;;  %p1643_p6 = scmp.lt.u32.totalorder %s1641_s29, %s1636_s24 }
  0x4b   : > { %p1639_p2 = pnand %p1638_p0, %p1637_p12  ;;  %p1645_p3 = scmp.lt.u32.totalorder %s1636_s24, %s1944_s19 }
  0x4c   : > { %p1644_p10 = por %p1643_p6, %p1642_p13 }
  0x4d   : > { %p1640_p1 = pneg %p1639_p2 }
  0x4e   : > { %p1646_p7 = por %p1645_p3, %p1644_p10 }
  0x50   : > { %p1647_p9 = pnand %p1646_p7, %p1640_p1 }
  0x52   : > { %1650 = shalt.err (!%p1647_p9)
}
  0x53   : > { %s1651_s27 = scalar_lea.vmem %s1946_s16, 128  ;;  %s1742_s22 = smov [#allocation2]  }
  0x54   : > { %p1652_p12 = scmp.ne.s32.totalorder %s1946_s16, %s1651_s27  ;;  %s1656_s28 = sshll.u32 %s1742_s22, 4  ;;  %s1657_s28 = int_to_ptr.vmem [resolvable:$false] %s1656_s28 }
  0x55   : > { %s1658_s14 = scalar_lea.vmem %s1657_s28, 256  ;;  %p1659_p4 = scmp.lt.s32.totalorder %s1946_s16, %s1657_s28 }
  0x56   : > { %p1654_p2 = pnand %p1652_p12, %p1638_p0  ;;  %p1660_p13 = scmp.lt.s32.totalorder %s1658_s14, %s1651_s27 }
  0x58   : > { %p1655_p5 = pneg %p1654_p2  ;;  %p1661_p6 = por %p1660_p13, %p1659_p4 }
  0x5a   : > { %p1662_p10 = pnand %p1661_p6, %p1655_p5 }
  0x5c   : > { %1665 = shalt.err (!%p1662_p10)
}
  0x5d   : > { %1493 = dma.hbm_to_vmem [thread:$0]  (!%p1948_p11), %s1944_s19, 128, %s1946_s16, %s307_s20  }
  0x5e   : > { %326 = sbr.rel (%p1850_p8) target bundleno = 2690 (0xa82), region = 56  ;;  %s1980_s24 = sand.u32 (!%p1850_p8), 1, %s1728_s10  }
  0x5f   : > { %s1361_s29 = sshll.u32 (!%p1850_p8), %s1980_s24, 3  ;;  %s329_s18 = scalar_lea.sflag (!%p1850_p8), [#allocation3], %s1980_s24 }
  0x60   : > { %s332_s27 = scalar_lea.vmem (!%p1850_p8), [#allocation2], %s1361_s29  ;;  %p2169_p4 = scmp.ne.s32.totalorder (!%p1850_p8), %s2161_s15, 0 }
  0x65   : > { %1711 = dma.done.wait (%p2169_p4), %s329_s18, 128  }
  0x66   : > { %1713 = vsyncadd (%p2169_p4), %s329_s18, 4294967168  ;;  %p2170_p5 = scmp.eq.s32.totalorder %s1831_s13, 0 }
  0x68   : > { %1715 = dma.done.wait (%p2170_p5), [#allocation6], 272   ;;  %p2171_p8 = pmov %p2170_p5 }
  0x69   : > { %vm379_vm0 = vcmask 261120   ;;  %v376_v0 = vld [vmem:[%s332_s27] sm:$0xff]  ;;  %v1556_v7 = vld [vmem:[#allocation5] sm:$0xff]   ;;  %v1743_v8 = vmov 0.0   ;;  %v1557_v9 = vld [vmem:[#allocation5 + $0x8] sm:$0xff]   ;;  %vm1744_vm1 = vmmov 0  }
  0x6a   : > { %1717 = vsyncadd (%p2171_p8), [#allocation6], 4294967024  ;;  %v380_v1 = vsel %vm379_vm0, %v376_v0, 0.0  ;;  %1415 = vmatprep.subr.bf16.mxu0 %v1743_v8  ;;  %1428 = vmatprep.subr.mxu1 %v1743_v8  ;;  %v1365_v14 = vld [vmem:[%s2148_s1] ss:$0 sm:$0xff]  ;;  %s1745_s21 = smov 64  }
  0x6b   : > { %381 = vadd.xlane.f32.xlu0 %v380_v1  ;;  %1416 = vmatpush3.bf16.msra.mxu0 %v1556_v7  ;;  %v1366_v16 = vld [vmem:[%s2149_s2] ss:$0 sm:$0xff]  ;;  %s1746_s20 = smov 96   ;;  %s1747_s22 = smov 88   ;;  %vm478_vm2 = vcmask 64512   ;;  %vm1148_vm3 = vcmask 130048  }
  0x6c   : > { %1419 = vmatprep.mubr.msk.bf16.mxu0 %vm1744_vm1, %v1743_v8  ;;  %1417 = vmatprep.subr.bf16.mxu0 %v1743_v8  ;;  %v1367_v20 = vld [vmem:[#allocation7] ss:$0 sm:$0xff]  ;;  %s1748_s28 = smov 120   ;;  %s1749_s14 = smov 80   ;;  %vm1150_vm4 = vcmask 195584  }
  0x6d   : > { %1430 = vmatprep.mubr.msk.f32.mxu1 %vm1744_vm1, %v1743_v8  ;;  %s1750_s18 = smov 112   ;;  %s1751_s27 = smov 72  }
  0x6e   : > { %s1752_s15 = smov 104   ;;  %s1753_s17 = smov 48  }
  0x6f   : > { %1418 = vmatpush3.bf16.msra.mxu0 %v1557_v9  ;;  %s1754_s19 = smov 40   ;;  %s1755_s16 = smov 56  }
  0x70   : > { %1423 = vmatprep.subr.mxu0 %v1743_v8  ;;  %p2172_p0 = scmp.ne.s32.totalorder %s2167_s25, 0 }
  0xf8   : > { %v382_v2 = vpop.xlane.xlu0 %381 }
  0xf9   : > { %v384_v3 = vmul.f32 0.03125, %v382_v2 }
  0xfb   : > { %v385_v4 = vsub.f32 %v376_v0, %v384_v3 }
  0xfd   : > { %v386_v5 = vmul.f32 %v385_v4, %v385_v4 }
  0xff   : > { %v387_v6 = vsel %vm379_vm0, %v386_v5, 0.0 }
 0x100   : > { %388 = vadd.xlane.f32.xlu0 %v387_v6 }
 0x18d   : > { %v389_v10 = vpop.xlane.xlu0 %388 }
 0x18e   : > { %v390_v11 = vmul.f32 0.03125, %v389_v10 }
 0x190   : > { %v391_v12 = vadd.f32 1e-05, %v390_v11 }
 0x192   : > { %1560 = vrsqrt.f32 %v391_v12 }
 0x19c   : > { %v1561_v13 = vpop.eup %1560 }
 0x19d   : > { %v393_v15 = vmul.f32 %v1561_v13, %v385_v4 }
 0x19f   : > { %v400_v17 = vmul.f32 %v1365_v14, %v393_v15 }
 0x1a1   : > { %v2010_v18 = vadd.f32 %v1366_v16, %v400_v17 }
 0x1a3   : > { %v408_v19 = vpack.c.bf16 %v2010_v18, %v2010_v18 }
 0x1a5   : > { %1420 = vmatmul.mubr.msk.bf16.vlgmr.msra.gmra.mrb[0].mxu0 %vm379_vm0, %v408_v19 }
 0x1a6   : > { %1425 = vmatprep.mubr.msk.f32.mxu0 %vm1744_vm1, %v1743_v8 }
 0x278   : > { %v469_v21 = vpop.f32.mrb[0].mxu0 }
 0x279   : > { %v2017_v22 = vadd.f32 %v1367_v20, %v469_v21  ;;  %v1421_v23 = vpop.f32.mrb[1].mxu0  ;;  %v1558_v21 = vld [vmem:[%s2152_s5] sm:$0xff]  }
 0x27a   : > { %v472_v24 = vpop.f32.mrb[2].mxu0 }
 0x27b   : > { %564 = vrot.lane.b32.xlu0 %v2017_v22, %s1745_s21  ;;  %476 = vrot.lane.b32.xlu1 %v2017_v22, %s1746_s20  ;;  %v1422_v25 = vpop.f32.mrb[3].mxu0 }
 0x27f   : > { %642 = vrot.lane.b32.xlu0 %v2017_v22, %s1747_s22  ;;  %s1390_s22 = sshll.u32 %s1831_s13, 7  ;;  %s1759_s13 = smov [#allocation8]  }
 0x283   : > { %640 = vrot.lane.b32.xlu0 %v2017_v22, %s1748_s28  ;;  %s374_s28 = scalar_lea.vmem [#allocation8], %s1361_s29  ;;  %s1670_s29 = sshll.u32 %s1759_s13, 4  ;;  %s1671_s29 = int_to_ptr.vmem [resolvable:$false] %s1670_s29 }
 0x2ed   : > { %v565_v26 = vpop.permute.xlu0 %564  ;;  %v477_v27 = vpop.permute.xlu1 %476 }
 0x2ee   : > { %1424 = vmatpush3.xpose.msk.msra.mxu0 %vm478_vm2, %v477_v27  ;;  %1429 = vmatpush3.msra.mxu1 %v565_v26 }
 0x2ef   : > { %1433 = vmatprep.subr.mxu1 %v1743_v8  ;;  %1438 = vmatprep.subr.mxu0 %v1743_v8 }
 0x2f1   : > { %1426 = vmatmul.mubr.msk.f32.vlgmr.msra.gmra.mrb[4].mxu0 %vm478_vm2, %v2017_v22  ;;  %v643_v36 = vpop.permute.xlu0 %642 }
 0x2f2   : > { %1440 = vmatprep.mubr.msk.f32.mxu0 %vm1744_vm1, %v1743_v8 }
 0x2f5   : > { %v641_v37 = vpop.permute.xlu0 %640 }
 0x3c4   : > { %v549_v28 = vpop.f32.mrb[4].mxu0 }
 0x3c5   : > { %v1427_v29 = vpop.f32.mrb[5].mxu0  ;;  %v553_v30 = vsel %vm478_vm2, %v549_v28, -inf }
 0x3c6   : > { %554 = vmax.xlane.f32.xlu1 %v553_v30 }
 0x3d7   : > { %807 = vrot.lane.b32.xlu1 %v2017_v22, %s1749_s14  ;;  %s1756_s14 = smov 8  }
 0x453   : > { %v555_v31 = vpop.xlane.xlu1 %554 }
 0x454   : > { %v556_v32 = vsub.f32 %v549_v28, %v555_v31 }
 0x456   : > { %v557_v33 = vmul.f32 1.442695, %v556_v32 }
 0x457   : > { %v808_v42 = vpop.permute.xlu1 %807 }
 0x458   : > { %1562 = vpow2.f32 %v557_v33 }
 0x462   : > { %v1563_v34 = vpop.eup %1562 }
 0x463   : > { %v559_v35 = vsel %vm478_vm2, %v1563_v34, 0.0 }
 0x464   : > { %560 = vadd.xlane.f32.xlu0 %v559_v35  ;;  %v1383_v35 = vld [vmem:[%s2153_s6] ss:$0 sm:$0xff] }
 0x47a   : > { %805 = vrot.lane.b32.xlu0 %v2017_v22, %s1750_s18  ;;  %s1757_s18 = smov 16  }
 0x47e   : > { %972 = vrot.lane.b32.xlu0 %v2017_v22, %s1751_s27  ;;  %s1758_s27 = smov 24  }
 0x482   : > { %970 = vrot.lane.b32.xlu0 %v2017_v22, %s1752_s15  ;;  %s2102_s15 = scalar_lea.hbm %s2156_s9, %s1390_s22 }
 0x4f1   : > { %v561_v38 = vpop.xlane.xlu0 %560 }
 0x4f2   : > { %1564 = vrcp.f32 %v561_v38 }
 0x4f5   : > { %v806_v41 = vpop.permute.xlu0 %805 }
 0x4f9   : > { %v973_v43 = vpop.permute.xlu0 %972 }
 0x4fc   : > { %v1565_v39 = vpop.eup %1564 }
 0x4fd   : > { %v563_v40 = vmul.f32 %v1565_v39, %v1563_v34  ;;  %v971_v44 = vpop.permute.xlu0 %970 }
 0x4ff   : > { %1431 = vmatmul.mubr.msk.f32.vlgmr.msra.gmra.mrb[0].mxu1 %vm478_vm2, %v563_v40 }
 0x500   : > { %1434 = vmatpush3.xpose.msk.msra.mxu1 %vm478_vm2, %v643_v36  ;;  %1435 = vmatprep.mubr.msk.f32.mxu1 %vm1744_vm1, %v1743_v8 }
 0x501   : > { %1443 = vmatprep.subr.mxu1 %v1743_v8 }
 0x503   : > { %1436 = vmatmul.mubr.msk.f32.vlgmr.msra.gmra.mrb[2].mxu1 %vm478_vm2, %v641_v37 }
 0x504   : > { %1444 = vmatpush3.xpose.msk.msra.mxu1 %vm478_vm2, %v808_v42  ;;  %1445 = vmatprep.mubr.msk.f32.mxu1 %vm1744_vm1, %v1743_v8 }
 0x505   : > { %1453 = vmatprep.subr.mxu1 %v1743_v8 }
 0x507   : > { %1446 = vmatmul.mubr.msk.f32.vlgmr.msra.gmra.mrb[4].mxu1 %vm478_vm2, %v806_v41 }
 0x508   : > { %1454 = vmatpush3.xpose.msk.msra.mxu1 %vm478_vm2, %v973_v43  ;;  %1455 = vmatprep.mubr.msk.f32.mxu1 %vm1744_vm1, %v1743_v8 }
 0x509   : > { %1463 = vmatprep.subr.bf16.mxu1 %v1743_v8 }
 0x50b   : > { %1456 = vmatmul.mubr.msk.f32.vlgmr.msra.gmra.mrb[6].mxu1 %vm478_vm2, %v971_v44 }
 0x50c   : > { %1467 = vmatprep.mubr.msk.bf16.mxu1 %vm1744_vm1, %v1743_v8  ;;  %1464 = vmatpush3.bf16.msra.mxu1 %v1558_v21 }
 0x50d   : > { %1465 = vmatprep.subr.bf16.mxu1 %v1743_v8 }
 0x5d2   : > { %v2054_v45 = vpop.f32.mrb[0].mxu1 }
 0x5d3   : > { %v1432_v46 = vpop.f32.mrb[1].mxu1 }
 0x5d6   : > { %v714_v47 = vpop.f32.mrb[2].mxu1 }
 0x5d7   : > { %v1437_v48 = vpop.f32.mrb[3].mxu1  ;;  %v718_v49 = vsel %vm478_vm2, %v714_v47, -inf }
 0x5d8   : > { %719 = vmax.xlane.f32.xlu0 %v718_v49 }
 0x5da   : > { %v879_v50 = vpop.f32.mrb[4].mxu1 }
 0x5db   : > { %v1447_v51 = vpop.f32.mrb[5].mxu1  ;;  %v883_v52 = vsel %vm478_vm2, %v879_v50, -inf }
 0x5dc   : > { %884 = vmax.xlane.f32.xlu1 %v883_v52 }
 0x5de   : > { %v1044_v53 = vpop.f32.mrb[6].mxu1 }
 0x5df   : > { %v1457_v54 = vpop.f32.mrb[7].mxu1  ;;  %v1048_v55 = vsel %vm478_vm2, %v1044_v53, -inf }
 0x5e0   : > { %1049 = vmax.xlane.f32.xlu0 %v1048_v55 }
 0x5ed   : > { %894 = vrot.lane.b32.xlu1 %v2017_v22, %s1753_s17  ;;  %s1251_s17 = scalar_lea.sflag [#allocation4], %s1980_s24 }
 0x665   : > { %v720_v56 = vpop.xlane.xlu0 %719 }
 0x666   : > { %v721_v57 = vsub.f32 %v714_v47, %v720_v56 }
 0x668   : > { %v722_v58 = vmul.f32 1.442695, %v721_v57 }
 0x669   : > { %v885_v59 = vpop.xlane.xlu1 %884 }
 0x66a   : > { %1566 = vpow2.f32 %v722_v58  ;;  %v886_v60 = vsub.f32 %v879_v50, %v885_v59 }
 0x66c   : > { %v887_v61 = vmul.f32 1.442695, %v886_v60 }
 0x66d   : > { %v1050_v62 = vpop.xlane.xlu0 %1049  ;;  %v895_v9 = vpop.permute.xlu1 %894 }
 0x66e   : > { %1568 = vpow2.f32 %v887_v61  ;;  %v1051_v63 = vsub.f32 %v1044_v53, %v1050_v62  ;;  %v1388_v53 = vld [vmem:[%s2155_s8] ss:$0 sm:$0xff] }
 0x670   : > { %v1052_v0 = vmul.f32 1.442695, %v1051_v63 }
 0x672   : > { %1570 = vpow2.f32 %v1052_v0 }
 0x674   : > { %v1567_v1 = vpop.eup %1566 }
 0x675   : > { %v724_v2 = vsel %vm478_vm2, %v1567_v1, 0.0 }
 0x676   : > { %725 = vadd.xlane.f32.xlu0 %v724_v2 }
 0x678   : > { %v1569_v3 = vpop.eup %1568 }
 0x679   : > { %v889_v4 = vsel %vm478_vm2, %v1569_v3, 0.0 }
 0x67a   : > { %890 = vadd.xlane.f32.xlu0 %v889_v4 }
 0x67c   : > { %v1571_v5 = vpop.eup %1570 }
 0x67d   : > { %v1054_v6 = vsel %vm478_vm2, %v1571_v5, 0.0 }
 0x67e   : > { %1055 = vadd.xlane.f32.xlu1 %v1054_v6 }
 0x68f   : > { %1059 = vrot.lane.b32.xlu1 %v2017_v22, %s1754_s19 }
 0x690   : > { %729 = vrot.lane.b32.xlu0 %v2017_v22, %s1755_s16  ;;  %v1559_v22 = vld [vmem:[%s2152_s5 + $0x8] sm:$0xff]   ;;  %s1672_s16 = scalar_lea.vmem %s1671_s29, 256 }
 0x691   : > { %1466 = vmatpush3.bf16.msra.mxu1 %v1559_v22 }
 0x703   : > { %v726_v7 = vpop.xlane.xlu0 %725 }
 0x704   : > { %1572 = vrcp.f32 %v726_v7 }
 0x707   : > { %v891_v10 = vpop.xlane.xlu0 %890 }
 0x708   : > { %1574 = vrcp.f32 %v891_v10 }
 0x70b   : > { %v1056_v11 = vpop.xlane.xlu1 %1055  ;;  %v730_v12 = vpop.permute.xlu0 %729 }
 0x70c   : > { %1576 = vrcp.f32 %v1056_v11  ;;  %1439 = vmatpush3.msra.mxu0 %v730_v12 }
 0x70d   : > { %1448 = vmatprep.subr.mxu0 %v1743_v8 }
 0x70e   : > { %v1573_v13 = vpop.eup %1572 }
 0x70f   : > { %v728_v14 = vmul.f32 %v1573_v13, %v1567_v1  ;;  %v1060_v17 = vpop.permute.xlu1 %1059 }
 0x711   : > { %1441 = vmatmul.mubr.msk.f32.vlgmr.msra.gmra.mrb[6].mxu0 %vm478_vm2, %v728_v14 }
 0x712   : > { %v1575_v15 = vpop.eup %1574  ;;  %1449 = vmatpush3.msra.mxu0 %v895_v9  ;;  %1450 = vmatprep.mubr.msk.f32.mxu0 %vm1744_vm1, %v1743_v8 }
 0x713   : > { %v893_v16 = vmul.f32 %v1575_v15, %v1569_v3  ;;  %1458 = vmatprep.subr.mxu0 %v1743_v8 }
 0x715   : > { %1451 = vmatmul.mubr.msk.f32.vlgmr.msra.gmra.mrb[8].mxu0 %vm478_vm2, %v893_v16 }
 0x716   : > { %v1577_v19 = vpop.eup %1576  ;;  %1459 = vmatpush3.msra.mxu0 %v1060_v17  ;;  %1460 = vmatprep.mubr.msk.f32.mxu0 %vm1744_vm1, %v1743_v8 }
 0x717   : > { %v1058_v20 = vmul.f32 %v1577_v19, %v1571_v5 }
 0x719   : > { %1461 = vmatmul.mubr.msk.f32.vlgmr.msra.gmra.mrb[10].mxu0 %vm478_vm2, %v1058_v20 }
 0x7e4   : > { %v801_v23 = vpop.f32.mrb[6].mxu0 }
 0x7e5   : > { %1136 = vrot.lane.b32.xlu1 %v801_v23, %s1756_s14  ;;  %v1442_v24 = vpop.f32.mrb[7].mxu0  ;;  %s1264_s14 = sshll.u32 %s374_s28, 4  ;;  %s2104_s14 = int_to_ptr.vmem [resolvable:$true] %s1264_s14 }
 0x7e6   : > { %s1666_s19 = scalar_lea.vmem %s2104_s14, 128  ;;  %p1673_p7 = scmp.lt.s32.totalorder %s2104_s14, %s1671_s29 }
 0x7e7   : > { %p1667_p11 = scmp.ne.s32.totalorder %s2104_s14, %s1666_s19  ;;  %p1674_p9 = scmp.lt.s32.totalorder %s1672_s16, %s1666_s19 }
 0x7e8   : > { %v966_v25 = vpop.f32.mrb[8].mxu0 }
 0x7e9   : > { %1140 = vrot.lane.b32.xlu0 %v966_v25, %s1757_s18  ;;  %v1452_v26 = vpop.f32.mrb[9].mxu0  ;;  %p1668_p1 = pnand %p1667_p11, %p2172_p0  ;;  %p1675_p12 = por %p1674_p9, %p1673_p7 }
 0x7eb   : > { %p1669_p3 = pneg %p1668_p1 }
 0x7ec   : > { %v1131_v27 = vpop.f32.mrb[10].mxu0 }
 0x7ed   : > { %1144 = vrot.lane.b32.xlu1 %v1131_v27, %s1758_s27  ;;  %v1462_v28 = vpop.f32.mrb[11].mxu0  ;;  %p1676_p2 = pnand %p1675_p12, %p1669_p3 }
 0x857   : > { %v1137_v29 = vpop.permute.xlu1 %1136 }
 0x858   : > { %v1147_v30 = vsel %vm478_vm2, %v2054_v45, %v1137_v29 }
 0x85b   : > { %v1141_v8 = vpop.permute.xlu0 %1140 }
 0x85c   : > { %v1149_v31 = vsel %vm1148_vm3, %v1147_v30, %v1141_v8 }
 0x85f   : > { %v1145_v32 = vpop.permute.xlu1 %1144 }
 0x860   : > { %v1151_v33 = vsel %vm1150_vm4, %v1149_v31, %v1145_v32 }
 0x861   : > { %v1152_v34 = vpack.c.bf16 %v1151_v33, %v1151_v33 }
 0x863   : > { %1468 = vmatmul.mubr.msk.bf16.vlgmr.msra.gmra.mrb[8].mxu1 %vm379_vm0, %v1152_v34 }
 0x936   : > { %v1213_v36 = vpop.f32.mrb[8].mxu1 }
 0x937   : > { %v1214_v37 = vadd.f32 %v1383_v35, %v1213_v36  ;;  %v1469_v38 = vpop.f32.mrb[9].mxu1 }
 0x938   : > { %v1216_v39 = vpop.f32.mrb[10].mxu1 }
 0x939   : > { %v1470_v40 = vpop.f32.mrb[11].mxu1  ;;  %v1219_v41 = vadd.f32 %v1214_v37, %v2010_v18  ;;  %v1387_v18 = vld [vmem:[%s2154_s7] ss:$0 sm:$0xff] }
 0x93b   : > { %v1222_v42 = vsel %vm379_vm0, %v1219_v41, 0.0 }
 0x93c   : > { %1223 = vadd.xlane.f32.xlu0 %v1222_v42 }
 0x9c9   : > { %v1224_v43 = vpop.xlane.xlu0 %1223 }
 0x9ca   : > { %v1225_v44 = vmul.f32 0.03125, %v1224_v43 }
 0x9cc   : > { %v1226_v45 = vsub.f32 %v1219_v41, %v1225_v44 }
 0x9ce   : > { %v1227_v46 = vmul.f32 %v1226_v45, %v1226_v45 }
 0x9d0   : > { %v1228_v47 = vsel %vm379_vm0, %v1227_v46, 0.0 }
 0x9d1   : > { %1229 = vadd.xlane.f32.xlu1 %v1228_v47 }
 0xa5e   : > { %v1230_v48 = vpop.xlane.xlu1 %1229 }
 0xa5f   : > { %v1231_v49 = vmul.f32 0.03125, %v1230_v48 }
 0xa61   : > { %v1232_v50 = vadd.f32 1e-05, %v1231_v49 }
 0xa63   : > { %1578 = vrsqrt.f32 %v1232_v50 }
 0xa6d   : > { %v1579_v51 = vpop.eup %1578 }
 0xa6e   : > { %v1234_v52 = vmul.f32 %v1579_v51, %v1226_v45 }
 0xa70   : > { %v1241_v54 = vmul.f32 %v1387_v18, %v1234_v52 }
 0xa72   : > { %v1248_v55 = vadd.f32 %v1388_v53, %v1241_v54 }
 0xa74   : > { %1249 = vst.msk [vmem:[%s374_s28] sm:$0xff] %vm379_vm0, %v1248_v55 }
 0xa75   : > { %1679 = shalt.err (!%p1676_p2)
}
 0xa76   : > { %s1680_s24 = scalar_lea.hbm %s2102_s15, 128  ;;  %s1684_s22 = scalar_lea.hbm %s2156_s9, 256 }
 0xa77   : > { %p1681_p13 = scmp.ne.s32.totalorder %s2102_s15, %s1680_s24  ;;  %p1685_p4 = scmp.lt.u32.totalorder %s2102_s15, %s2156_s9 }
 0xa78   : > { %p1686_p5 = scmp.lt.u32.totalorder %s1684_s22, %s1680_s24  ;;  %p1688_p11 = scmp.lt.u32.totalorder %s1680_s24, %s2102_s15 }
 0xa79   : > { %p1682_p6 = pnand %p1681_p13, %p2172_p0 }
 0xa7a   : > { %p1687_p8 = por %p1686_p5, %p1685_p4 }
 0xa7b   : > { %p1683_p10 = pneg %p1682_p6 }
 0xa7c   : > { %p1689_p1 = por %p1688_p11, %p1687_p8 }
 0xa7e   : > { %p1690_p3 = pnand %p1689_p1, %p1683_p10 }
 0xa80   : > { %1693 = shalt.err (!%p1690_p3)
}
 0xa81   : > { %1481 = dma.vmem_to_hbm [thread:$0]  (%p2172_p0), %s2104_s14, 128, %s2102_s15, %s1251_s17  }
 0xa82 PF: > { %s2173_s27 = sld [smem:[#allocation12_spill]]  ;;  %s1276_s19 = sand.u32 1, %s1724_s30  }
 0xa83   : > { %p2175_p9 = scmp.ge.s32.totalorder %s1736_s12, 2  ;;  %s1277_s13 = scalar_lea.sflag [#allocation4], %s1276_s19 }
 0xa88   : > { %p2174_p7 = scmp.ne.s32.totalorder %s2173_s27, 0 }
 0xa8a   : > { %p1495_p12 = pnand %p2175_p9, %p2174_p7 }
 0xa8c   : > { %1719 = dma.done.wait (!%p1495_p12), %s1277_s13, 128  }
 0xa8d   : > { %1721 = vsyncadd (!%p1495_p12), %s1277_s13, 4294967168  ;;  %p23_p2 = scmp.ge.s32.totalorder %s1921_s23, 4   ;;  %s2176_s30 = smov %s1728_s10 }
 0xa8e   : > { %s2177_s10 = smov %s1732_s11  ;;  %s2178_s11 = smov %s1937_s26 }
 0xa8f   : > { %s2179_s12 = smov %s1921_s23  ;;  %25 = sbr.rel (!%p23_p2) target bundleno = 6 (0x6), region = 109 }
 0xa96   :  { %1282 = vsyncpa [#allocation3], 1 }
 0xa97   :  { %1284 = vsyncpa [#allocation3 + $0x1], 1 }
 0xa98   :  { %1285 = vsyncpa [#allocation6], 1 }
 0xa99   :  { %1286 = vsyncpa [#allocation4], 1 }
 0xa9a   :  { %1288 = vsyncpa [#allocation4 + $0x1], 1 }

</bundles_post_ra>
